<compile_context>
chip_gen: v5e
topology: v5e:2x2
jax: 0.10.0
libtpu: 0.0.40
codegen_flags: <defaults>
</compile_context>

<pallas_src>
import functools

import jax
import jax.numpy as jnp
import numpy as np
from jax.experimental import pallas as pl
from jax.experimental.pallas import tpu as pltpu

IN_DIM = 8631                 # fc1 input features (base_model output dim)
H1, H2, H3, OUT = 1024, 512, 128, 64

B_PAD = 8                     # padded batch (both branches stacked, <= 8 rows)
K_PAD = 8704                  # 8631 padded to a multiple of 128 (68 * 128)
TK = 2176                     # K chunk (K_PAD / TK = 4 grid steps)
H1_SPLIT = 2                  # split W1's output dim across a parallel grid axis
H1_BLK = H1 // H1_SPLIT       # 512


def _layer1_kernel(x_ref, w1_ref, b1_ref, h1_ref, acc_ref):
    """h1 = relu(x @ W1 + b1).

    Grid = (H1 halves [parallel], K chunks [arbitrary/reduction]). acc_ref
    accumulates the partial matmul over K; bias + ReLU applied on the last chunk.
    """
    k = pl.program_id(1)

    @pl.when(k == 0)
    def _():
        acc_ref[...] = jnp.zeros_like(acc_ref)

    acc_ref[...] += jnp.dot(x_ref[...], w1_ref[...],
                            preferred_element_type=jnp.float32)

    @pl.when(k == pl.num_programs(1) - 1)
    def _():
        h1_ref[...] = jnp.maximum(acc_ref[...] + b1_ref[...], 0.0
                                  ).astype(h1_ref.dtype)


def _tail_kernel(h1_ref, w2_ref, b2_ref, w3_ref, b3_ref, w4_ref, b4_ref,
                 out_ref):
    """Layers 2-4 (all weights fit whole in VMEM; single grid point)."""
    h2 = jnp.dot(h1_ref[...], w2_ref[...],
                 preferred_element_type=jnp.float32) + b2_ref[...]
    h2 = jnp.maximum(h2, 0.0)                       # ReLU (Dropout == identity)
    h3 = jnp.dot(h2, w3_ref[...],
                 preferred_element_type=jnp.float32) + b3_ref[...]
    h3 = jax.nn.sigmoid(h3)                         # Sigmoid
    h4 = jnp.dot(h3, w4_ref[...],
                 preferred_element_type=jnp.float32) + b4_ref[...]
    out_ref[...] = h4.astype(out_ref.dtype)


def prepare_params(params):
    """One-time (off the hot path) param prep: pad W1 to K_PAD, reshape biases."""
    w1, b1, w2, b2, w3, b3, w4, b4 = params
    w1_p = jnp.zeros((K_PAD, H1), jnp.float32).at[:IN_DIM, :].set(w1)
    return (w1_p, b1.reshape(1, H1), w2, b2.reshape(1, H2),
            w3, b3.reshape(1, H3), w4, b4.reshape(1, OUT))


@functools.partial(jax.jit, static_argnames=("batch",))
def siamese_forward_pallas(input1, input2, prepared, *, batch):
    """SiameseNet.forward on 8631-dim features: one fused call for both branches."""
    w1_p, b1, w2, b2, w3, b3, w4, b4 = prepared
    assert 2 * batch <= B_PAD, "fused-branch batch must fit the padded batch"

    # Fuse both Siamese branches: weights are shared, so stacking along batch
    # streams W1 once instead of twice and drops one kernel launch.
    x = jnp.concatenate([input1, input2], axis=0)             # (2*batch, IN_DIM)
    x_p = jnp.zeros((B_PAD, K_PAD), jnp.float32).at[:2 * batch, :IN_DIM].set(x)

    h1 = pl.pallas_call(
        _layer1_kernel,
        out_shape=jax.ShapeDtypeStruct((B_PAD, H1), jnp.float32),
        grid_spec=pltpu.PrefetchScalarGridSpec(
            num_scalar_prefetch=0,
            grid=(H1_SPLIT, K_PAD // TK),
            in_specs=[
                pl.BlockSpec((B_PAD, TK), lambda j, k: (0, k)),    # x K-chunk
                pl.BlockSpec((TK, H1_BLK), lambda j, k: (k, j)),   # W1 chunk
                pl.BlockSpec((1, H1_BLK), lambda j, k: (0, j)),    # b1 half
            ],
            out_specs=pl.BlockSpec((B_PAD, H1_BLK), lambda j, k: (0, j)),
            scratch_shapes=[pltpu.VMEM((B_PAD, H1_BLK), jnp.float32)],
        ),
        compiler_params=pltpu.CompilerParams(
            dimension_semantics=("parallel", "arbitrary"),
            vmem_limit_bytes=40 << 20,   # actual footprint ~9 MiB; safe on v7x
        ),
    )(x_p, w1_p, b1)

    # Tiny epilogue kernel: layers 2-4 on the (8, 1024) hidden activations.
    out = pl.pallas_call(
        _tail_kernel,
        out_shape=jax.ShapeDtypeStruct((B_PAD, OUT), jnp.float32),
    )(h1, w2, b2, w3, b3, w4, b4)

    return out[:batch], out[batch:2 * batch]


def init_params(key):
    """Deterministic synthetic parameters matching nn.Linear shapes (stored as W.T)."""
    dims = [(IN_DIM, H1), (H1, H2), (H2, H3), (H3, OUT)]
    params = []
    for i, (din, dout) in enumerate(dims):
        kw, kb = jax.random.split(jax.random.fold_in(key, i))
        bound = 1.0 / np.sqrt(din)
        w = jax.random.uniform(kw, (din, dout), jnp.float32, -bound, bound)
        b = jax.random.uniform(kb, (dout,), jnp.float32, -bound, bound)
        params += [w, b]
    return tuple(params)


def fc1_reference(x, params):
    """Plain-JAX reference for correctness check."""
    w1, b1, w2, b2, w3, b3, w4, b4 = params
    h = jnp.maximum(x @ w1 + b1, 0.0)
    h = jnp.maximum(h @ w2 + b2, 0.0)
    h = jax.nn.sigmoid(h @ w3 + b3)
    return h @ w4 + b4


if __name__ == "__main__":
    key = jax.random.PRNGKey(0)
    kp, k1, k2 = jax.random.split(key, 3)

    params = init_params(kp)
    prepared = jax.block_until_ready(prepare_params(params))   # one-time prep

    batch = 2  # small batch; feature dims fixed by the module (8631 -> ... -> 64)
    input1 = jax.random.normal(k1, (batch, IN_DIM), jnp.float32)
    input2 = jax.random.normal(k2, (batch, IN_DIM), jnp.float32)

    out1, out2 = siamese_forward_pallas(input1, input2, prepared, batch=batch)
    out1, out2 = jax.block_until_ready((out1, out2))

    ref1 = fc1_reference(input1, params)
    ref2 = fc1_reference(input2, params)
    np.testing.assert_allclose(np.asarray(out1), np.asarray(ref1), rtol=1e-4, atol=1e-4)
    np.testing.assert_allclose(np.asarray(out2), np.asarray(ref2), rtol=1e-4, atol=1e-4)
    assert out1.shape == (batch, OUT) and out2.shape == (batch, OUT)

    print("KERNEL_OK")
</pallas_src>

<mosaic_0001>
module attributes {stable_mosaic.version = 11 : i64} {
  func.func @_layer1_kernel(%arg0: i32, %arg1: i32, %arg2: memref<8x2176xf32, #tpu.memory_space<vmem>>, %arg3: memref<2176x512xf32, #tpu.memory_space<vmem>>, %arg4: memref<1x512xf32, #tpu.memory_space<vmem>>, %arg5: memref<8x512xf32, #tpu.memory_space<vmem>>, %arg6: memref<8x512xf32, #tpu.memory_space<vmem>>) attributes {dimension_semantics = [#tpu.dimension_semantics<parallel>, #tpu.dimension_semantics<arbitrary>], iteration_bounds = array<i64: 2, 4>, scalar_prefetch = 0 : i64, scratch_operands = 1 : i64, tpu.core_type = #tpu.core_type<tc>, window_params = [{transform_indices = @transform_0, window_bounds = array<i64: 8, 2176>}, {transform_indices = @transform_1, window_bounds = array<i64: 2176, 512>}, {transform_indices = @transform_2, window_bounds = array<i64: 1, 512>}, {transform_indices = @transform_3, window_bounds = array<i64: 8, 512>}]} {
    %c0_i32 = arith.constant 0 : i32
    %0 = arith.cmpi eq, %arg1, %c0_i32 : i32
    %1 = arith.extui %0 : i1 to i32
    %c0_i32_0 = arith.constant 0 : i32
    %2 = arith.cmpi ne, %1, %c0_i32_0 : i32
    scf.if %2 {
      %cst_9 = arith.constant 0.000000e+00 : f32
      %12 = vector.broadcast %cst_9 : f32 to vector<8x512xf32>
      %c0_10 = arith.constant 0 : index
      %c0_11 = arith.constant 0 : index
      %13 = vector.load %arg6[%c0_10, %c0_11] : memref<8x512xf32, #tpu.memory_space<vmem>>, vector<8x512xf32>
      tpu.vector_store %arg6[%c0_10, %c0_11], %12 {strides = array<i32>} : memref<8x512xf32, #tpu.memory_space<vmem>>, vector<8x512xf32>,
    } else {
    }
    %c0 = arith.constant 0 : index
    %c0_1 = arith.constant 0 : index
    %3 = vector.load %arg6[%c0, %c0_1] : memref<8x512xf32, #tpu.memory_space<vmem>>, vector<8x512xf32>
    %c0_2 = arith.constant 0 : index
    %c0_3 = arith.constant 0 : index
    %4 = vector.load %arg2[%c0_2, %c0_3] : memref<8x2176xf32, #tpu.memory_space<vmem>>, vector<8x2176xf32>
    %c0_4 = arith.constant 0 : index
    %c0_5 = arith.constant 0 : index
    %5 = vector.load %arg3[%c0_4, %c0_5] : memref<2176x512xf32, #tpu.memory_space<vmem>>, vector<2176x512xf32>
    %cst = arith.constant dense<0.000000e+00> : vector<8x512xf32>
    %6 = tpu.matmul %4, %5, %cst {dimension_numbers = #tpu.dot_dimension_numbers<[1], [0], [0], [1], [0, 0, 1, 1], [], []>} : vector<8x2176xf32>, vector<2176x512xf32>, vector<8x512xf32> -> vector<8x512xf32>
    %7 = arith.addf %3, %6 : vector<8x512xf32>
    %c0_6 = arith.constant 0 : index
    %c0_7 = arith.constant 0 : index
    %8 = vector.load %arg6[%c0_6, %c0_7] : memref<8x512xf32, #tpu.memory_space<vmem>>, vector<8x512xf32>
    tpu.vector_store %arg6[%c0_6, %c0_7], %7 {strides = array<i32>} : memref<8x512xf32, #tpu.memory_space<vmem>>, vector<8x512xf32>,
    %c3_i32 = arith.constant 3 : i32
    %9 = arith.cmpi eq, %arg1, %c3_i32 : i32
    %10 = arith.extui %9 : i1 to i32
    %c0_i32_8 = arith.constant 0 : i32
    %11 = arith.cmpi ne, %10, %c0_i32_8 : i32
    scf.if %11 {
      %c0_9 = arith.constant 0 : index
      %c0_10 = arith.constant 0 : index
      %12 = vector.load %arg6[%c0_9, %c0_10] : memref<8x512xf32, #tpu.memory_space<vmem>>, vector<8x512xf32>
      %c0_11 = arith.constant 0 : index
      %c0_12 = arith.constant 0 : index
      %13 = vector.load %arg4[%c0_11, %c0_12] : memref<1x512xf32, #tpu.memory_space<vmem>>, vector<1x512xf32>
      %14 = vector.broadcast %13 : vector<1x512xf32> to vector<8x512xf32>
      %15 = arith.addf %12, %14 : vector<8x512xf32>
      %cst_13 = arith.constant 0.000000e+00 : f32
      %16 = vector.broadcast %cst_13 : f32 to vector<8x512xf32>
      %17 = arith.maximumf %15, %16 : vector<8x512xf32>
      %c0_14 = arith.constant 0 : index
      %c0_15 = arith.constant 0 : index
      %18 = vector.load %arg5[%c0_14, %c0_15] : memref<8x512xf32, #tpu.memory_space<vmem>>, vector<8x512xf32>
      tpu.vector_store %arg5[%c0_14, %c0_15], %17 {strides = array<i32>} : memref<8x512xf32, #tpu.memory_space<vmem>>, vector<8x512xf32>,
    } else {
    }
    return
  }
  func.func @transform_0(%arg0: i32, %arg1: i32) -> (i32, i32) {
    %c0_i32 = arith.constant 0 : i32
    %c0_i32_0 = arith.constant 0 : i32
    return %c0_i32, %arg1 : i32, i32
  }
  func.func @transform_1(%arg0: i32, %arg1: i32) -> (i32, i32) {
    %c0_i32 = arith.constant 0 : i32
    return %arg1, %arg0 : i32, i32
  }
  func.func @transform_2(%arg0: i32, %arg1: i32) -> (i32, i32) {
    %c0_i32 = arith.constant 0 : i32
    %c0_i32_0 = arith.constant 0 : i32
    return %c0_i32, %arg0 : i32, i32
  }
  func.func @transform_3(%arg0: i32, %arg1: i32) -> (i32, i32) {
    %c0_i32 = arith.constant 0 : i32
    %c0_i32_0 = arith.constant 0 : i32
    return %c0_i32, %arg0 : i32, i32
  }
}

module attributes {stable_mosaic.version = 11 : i64} {
  func.func @_tail_kernel(%arg0: memref<8x1024xf32, #tpu.memory_space<vmem>>, %arg1: memref<1024x512xf32, #tpu.memory_space<vmem>>, %arg2: memref<1x512xf32, #tpu.memory_space<vmem>>, %arg3: memref<512x128xf32, #tpu.memory_space<vmem>>, %arg4: memref<1x128xf32, #tpu.memory_space<vmem>>, %arg5: memref<128x64xf32, #tpu.memory_space<vmem>>, %arg6: memref<1x64xf32, #tpu.memory_space<vmem>>, %arg7: memref<8x64xf32, #tpu.memory_space<vmem>>) attributes {dimension_semantics = [], scalar_prefetch = 0 : i64, scratch_operands = 0 : i64, tpu.core_type = #tpu.core_type<tc>} {
    %c0 = arith.constant 0 : index
    %c0_0 = arith.constant 0 : index
    %0 = vector.load %arg0[%c0, %c0_0] : memref<8x1024xf32, #tpu.memory_space<vmem>>, vector<8x1024xf32>
    %c0_1 = arith.constant 0 : index
    %c0_2 = arith.constant 0 : index
    %1 = vector.load %arg1[%c0_1, %c0_2] : memref<1024x512xf32, #tpu.memory_space<vmem>>, vector<1024x512xf32>
    %cst = arith.constant dense<0.000000e+00> : vector<8x512xf32>
    %2 = tpu.matmul %0, %1, %cst {dimension_numbers = #tpu.dot_dimension_numbers<[1], [0], [0], [1], [0, 0, 1, 1], [], []>} : vector<8x1024xf32>, vector<1024x512xf32>, vector<8x512xf32> -> vector<8x512xf32>
    %c0_3 = arith.constant 0 : index
    %c0_4 = arith.constant 0 : index
    %3 = vector.load %arg2[%c0_3, %c0_4] : memref<1x512xf32, #tpu.memory_space<vmem>>, vector<1x512xf32>
    %4 = vector.broadcast %3 : vector<1x512xf32> to vector<8x512xf32>
    %5 = arith.addf %2, %4 : vector<8x512xf32>
    %cst_5 = arith.constant 0.000000e+00 : f32
    %6 = vector.broadcast %cst_5 : f32 to vector<8x512xf32>
    %7 = arith.maximumf %5, %6 : vector<8x512xf32>
    %c0_6 = arith.constant 0 : index
    %c0_7 = arith.constant 0 : index
    %8 = vector.load %arg3[%c0_6, %c0_7] : memref<512x128xf32, #tpu.memory_space<vmem>>, vector<512x128xf32>
    %cst_8 = arith.constant dense<0.000000e+00> : vector<8x128xf32>
    %9 = tpu.matmul %7, %8, %cst_8 {dimension_numbers = #tpu.dot_dimension_numbers<[1], [0], [0], [1], [0, 0, 1, 1], [], []>} : vector<8x512xf32>, vector<512x128xf32>, vector<8x128xf32> -> vector<8x128xf32>
    %c0_9 = arith.constant 0 : index
    %c0_10 = arith.constant 0 : index
    %10 = vector.load %arg4[%c0_9, %c0_10] : memref<1x128xf32, #tpu.memory_space<vmem>>, vector<1x128xf32>
    %11 = vector.broadcast %10 : vector<1x128xf32> to vector<8x128xf32>
    %12 = arith.addf %9, %11 : vector<8x128xf32>
    %13 = arith.negf %12 : vector<8x128xf32>
    %14 = math.exp %13 : vector<8x128xf32>
    %cst_11 = arith.constant 1.000000e+00 : f32
    %15 = vector.broadcast %cst_11 : f32 to vector<8x128xf32>
    %16 = arith.addf %15, %14 : vector<8x128xf32>
    %17 = arith.divf %15, %16 : vector<8x128xf32>
    %c0_12 = arith.constant 0 : index
    %c0_13 = arith.constant 0 : index
    %18 = vector.load %arg5[%c0_12, %c0_13] : memref<128x64xf32, #tpu.memory_space<vmem>>, vector<128x64xf32>
    %cst_14 = arith.constant dense<0.000000e+00> : vector<8x64xf32>
    %19 = tpu.matmul %17, %18, %cst_14 {dimension_numbers = #tpu.dot_dimension_numbers<[1], [0], [0], [1], [0, 0, 1, 1], [], []>} : vector<8x128xf32>, vector<128x64xf32>, vector<8x64xf32> -> vector<8x64xf32>
    %c0_15 = arith.constant 0 : index
    %c0_16 = arith.constant 0 : index
    %20 = vector.load %arg6[%c0_15, %c0_16] : memref<1x64xf32, #tpu.memory_space<vmem>>, vector<1x64xf32>
    %21 = vector.broadcast %20 : vector<1x64xf32> to vector<8x64xf32>
    %22 = arith.addf %19, %21 : vector<8x64xf32>
    %c0_17 = arith.constant 0 : index
    %c0_18 = arith.constant 0 : index
    %23 = vector.load %arg7[%c0_17, %c0_18] : memref<8x64xf32, #tpu.memory_space<vmem>>, vector<8x64xf32>
    tpu.vector_store %arg7[%c0_17, %c0_18], %22 {strides = array<i32>} : memref<8x64xf32, #tpu.memory_space<vmem>>, vector<8x64xf32>,
    return
  }
}

</mosaic_0001>

<bundles_post_ra>
// kernel: siamese_forward_pallas.3
= control target key start
LH: loop header
LB: loop body
LE: loop exit
PB: predicated region body
PF: predicated region fallthrough
CT: control target
= control target key end

     0   :  { %12 = vsyncpa [#allocation3], 0  ;;  %s1877_s0 = inlined_call_operand.vmem [shape: f32[8,1024], index: 0, kind: input, shape index: {}]   ;;  %s1878_s1 = inlined_call_operand.hbm [shape: f32[1024,512], index: 1, kind: input, shape index: {}]   ;;  %s1879_s2 = inlined_call_operand.hbm [shape: f32[1,512], index: 2, kind: input, shape index: {}]   ;;  %s1880_s3 = inlined_call_operand.hbm [shape: f32[512,128], index: 3, kind: input, shape index: {}]   ;;  %s1881_s4 = inlined_call_operand.hbm [shape: f32[1,128], index: 4, kind: input, shape index: {}]   ;;  %s1882_s5 = inlined_call_operand.vmem [shape: f32[128,64], index: 5, kind: input, shape index: {}]   ;;  %s1883_s6 = inlined_call_operand.hbm [shape: f32[1,64], index: 6, kind: input, shape index: {}]   ;;  %s1884_s7 = inlined_call_operand.vmem [shape: f32[8,64], index: 7, kind: output, shape index: {}]  }
   0x1   :  { %13 = vsyncpa [#allocation5], 0  ;;  %s35_s26 = sshll.u32 %s1879_s2, 4  ;;  %s36_s26 = int_to_ptr.hbm [resolvable:$true] %s35_s26 }
   0x2   :  { %14 = vsyncpa [#allocation8], 0  ;;  %s1638_s27 = smov [#allocation4]   ;;  %s59_s8 = sshll.u32 %s1881_s4, 4  ;;  %s60_s8 = int_to_ptr.hbm [resolvable:$true] %s59_s8 }
   0x3   :  { %s37_s28 = sshll.u32 %s1638_s27, 4  ;;  %s1639_s9 = smov [#allocation7]   ;;  %s38_s28 = int_to_ptr.vmem [resolvable:$true] %s37_s28 }
   0x4   :  { %40 = dma.hbm_to_vmem [thread:$0]  %s36_s26, 64, %s38_s28, [#allocation5]  }
   0x5   :  { %s61_s10 = sshll.u32 %s1639_s9, 4  ;;  %s21_s13 = sshll.u32 %s1878_s1, 4  ;;  %s62_s10 = int_to_ptr.vmem [resolvable:$true] %s61_s10  ;;  %s22_s13 = int_to_ptr.hbm [resolvable:$true] %s21_s13 }
   0x6   :  { %64 = dma.hbm_to_vmem [thread:$0]  %s60_s8, 16, %s62_s10, [#allocation8]  }
   0x7   :  { %s1640_s2 = smov [#allocation2]   ;;  %s45_s17 = sshll.u32 %s1880_s3, 4  ;;  %s46_s17 = int_to_ptr.hbm [resolvable:$true] %s45_s17 }
   0x8   :  { %s23_s14 = sshll.u32 %s1640_s2, 4  ;;  %s1641_s18 = smov 512   ;;  %s24_s14 = int_to_ptr.vmem [resolvable:$true] %s23_s14 }
   0x9   :  { %s1642_s4 = smov 32   ;;  %s1643_s19 = smov [#allocation6]  }
   0xa   :  { %29 = dma.hbm_to_vmem [thread:$0]  %s22_s13, 65536, %s24_s14, [#allocation3], %s1641_s18, %s1641_s18, %s1642_s4  }
   0xb   :  { %s47_s20 = sshll.u32 %s1643_s19, 4  ;;  %s1644_s21 = smov 128   ;;  %s48_s20 = int_to_ptr.vmem [resolvable:$true] %s47_s20 }
   0xc   :  { %s1645_s22 = smov 8   ;;  %s72_s24 = sshll.u32 %s1883_s6, 4  ;;  %s73_s24 = int_to_ptr.hbm [resolvable:$true] %s72_s24 }
   0xd   :  { %53 = dma.hbm_to_vmem [thread:$0]  %s46_s17, 8192, %s48_s20, [#allocation5], %s1644_s21, %s1644_s21, %s1645_s22  }
   0xe   :  { %s1646_s25 = smov [#allocation9]  }
   0xf   :  { %s74_s26 = sshll.u32 %s1646_s25, 4  ;;  %s75_s26 = int_to_ptr.vmem [resolvable:$true] %s74_s26 }
  0x10   :  { %77 = dma.hbm_to_vmem [thread:$0]  %s73_s24, 16, %s75_s26, [#allocation8]  }
  0x11   :  { %1632 = dma.done.wait [#allocation3], 65536  }
  0x12   :  { %1633 = vsyncadd [#allocation3], 4294901760 }
  0x13   :  { %1634 = dma.done.wait [#allocation5], 8256  }
  0x14   :  { %1635 = vsyncadd [#allocation5], 4294959040 }
  0x15   :  { %1636 = dma.done.wait [#allocation8], 32  }
  0x16   :  { %1637 = vsyncadd [#allocation8], 4294967264  ;;  %v166_v0 = vld [vmem:[#allocation2 + $0x1e0] sm:$0xff]  ;;  %vm1479_vm4 = vcmask 523264  }
  0x17   :  { %v230_v1 = vld [vmem:[#allocation2 + $0x3e0] sm:$0xff]  ;;  %628 = vmatpush.msra.mxu0 %v166_v0 }
  0x18   :  { %v294_v2 = vld [vmem:[#allocation2 + $0x5e0] sm:$0xff]  ;;  %648 = vmatpush.msra.mxu1 %v230_v1 }
  0x19   :  { %v162_v3 = vld [vmem:[#allocation2 + $0x1c0] sm:$0xff]  ;;  %668 = vmatpush.msra.mxu2 %v294_v2 }
  0x1a   :  { %v226_v4 = vld [vmem:[#allocation2 + $0x3c0] sm:$0xff]  ;;  %629 = vmatpush.msra.mxu0 %v162_v3 }
  0x1b   :  { %v290_v5 = vld [vmem:[#allocation2 + $0x5c0] sm:$0xff]  ;;  %649 = vmatpush.msra.mxu1 %v226_v4 }
  0x1c   :  { %v358_v6 = vld [vmem:[#allocation2 + $0x7e0] sm:$0xff]  ;;  %669 = vmatpush.msra.mxu2 %v290_v5 }
  0x1d   :  { %v158_v7 = vld [vmem:[#allocation2 + $0x1a0] sm:$0xff]  ;;  %688 = vmatpush.msra.mxu3 %v358_v6 }
  0x1e   :  { %v222_v8 = vld [vmem:[#allocation2 + $0x3a0] sm:$0xff]  ;;  %630 = vmatpush.msra.mxu0 %v158_v7 }
  0x1f   :  { %v286_v9 = vld [vmem:[#allocation2 + $0x5a0] sm:$0xff]  ;;  %650 = vmatpush.msra.mxu1 %v222_v8 }
  0x20   :  { %v354_v10 = vld [vmem:[#allocation2 + $0x7c0] sm:$0xff]  ;;  %670 = vmatpush.msra.mxu2 %v286_v9 }
  0x21   :  { %v154_v11 = vld [vmem:[#allocation2 + $0x180] sm:$0xff]  ;;  %689 = vmatpush.msra.mxu3 %v354_v10 }
  0x22   :  { %v218_v12 = vld [vmem:[#allocation2 + $0x380] sm:$0xff]  ;;  %631 = vmatpush.msra.mxu0 %v154_v11 }
  0x23   :  { %v282_v13 = vld [vmem:[#allocation2 + $0x580] sm:$0xff]  ;;  %651 = vmatpush.msra.mxu1 %v218_v12 }
  0x24   :  { %v350_v14 = vld [vmem:[#allocation2 + $0x7a0] sm:$0xff]  ;;  %671 = vmatpush.msra.mxu2 %v282_v13 }
  0x25   :  { %v150_v15 = vld [vmem:[#allocation2 + $0x160] sm:$0xff]  ;;  %690 = vmatpush.msra.mxu3 %v350_v14 }
  0x26   :  { %v214_v16 = vld [vmem:[#allocation2 + $0x360] sm:$0xff]  ;;  %632 = vmatpush.msra.mxu0 %v150_v15 }
  0x27   :  { %v278_v17 = vld [vmem:[#allocation2 + $0x560] sm:$0xff]  ;;  %652 = vmatpush.msra.mxu1 %v214_v16 }
  0x28   :  { %v346_v18 = vld [vmem:[#allocation2 + $0x780] sm:$0xff]  ;;  %672 = vmatpush.msra.mxu2 %v278_v17 }
  0x29   :  { %v146_v19 = vld [vmem:[#allocation2 + $0x140] sm:$0xff]  ;;  %691 = vmatpush.msra.mxu3 %v346_v18 }
  0x2a   :  { %v210_v20 = vld [vmem:[#allocation2 + $0x340] sm:$0xff]  ;;  %633 = vmatpush.msra.mxu0 %v146_v19 }
  0x2b   :  { %v274_v21 = vld [vmem:[#allocation2 + $0x540] sm:$0xff]  ;;  %653 = vmatpush.msra.mxu1 %v210_v20 }
  0x2c   :  { %v342_v22 = vld [vmem:[#allocation2 + $0x760] sm:$0xff]  ;;  %673 = vmatpush.msra.mxu2 %v274_v21 }
  0x2d   :  { %v142_v23 = vld [vmem:[#allocation2 + $0x120] sm:$0xff]  ;;  %692 = vmatpush.msra.mxu3 %v342_v22 }
  0x2e   :  { %v206_v24 = vld [vmem:[#allocation2 + $0x320] sm:$0xff]  ;;  %634 = vmatpush.msra.mxu0 %v142_v23 }
  0x2f   :  { %v270_v25 = vld [vmem:[#allocation2 + $0x520] sm:$0xff]  ;;  %654 = vmatpush.msra.mxu1 %v206_v24 }
  0x30   :  { %v338_v26 = vld [vmem:[#allocation2 + $0x740] sm:$0xff]  ;;  %674 = vmatpush.msra.mxu2 %v270_v25 }
  0x31   :  { %v138_v27 = vld [vmem:[#allocation2 + $0x100] sm:$0xff]  ;;  %693 = vmatpush.msra.mxu3 %v338_v26 }
  0x32   :  { %v202_v28 = vld [vmem:[#allocation2 + $0x300] sm:$0xff]  ;;  %635 = vmatpush.msra.mxu0 %v138_v27 }
  0x33   :  { %v266_v29 = vld [vmem:[#allocation2 + $0x500] sm:$0xff]  ;;  %655 = vmatpush.msra.mxu1 %v202_v28 }
  0x34   :  { %v334_v30 = vld [vmem:[#allocation2 + $0x720] sm:$0xff]  ;;  %675 = vmatpush.msra.mxu2 %v266_v29 }
  0x35   :  { %v134_v31 = vld [vmem:[#allocation2 + $0xe0] sm:$0xff]  ;;  %694 = vmatpush.msra.mxu3 %v334_v30 }
  0x36   :  { %v198_v32 = vld [vmem:[#allocation2 + $0x2e0] sm:$0xff]  ;;  %636 = vmatpush.msra.mxu0 %v134_v31 }
  0x37   :  { %v262_v33 = vld [vmem:[#allocation2 + $0x4e0] sm:$0xff]  ;;  %656 = vmatpush.msra.mxu1 %v198_v32 }
  0x38   :  { %v330_v34 = vld [vmem:[#allocation2 + $0x700] sm:$0xff]  ;;  %676 = vmatpush.msra.mxu2 %v262_v33 }
  0x39   :  { %v130_v35 = vld [vmem:[#allocation2 + $0xc0] sm:$0xff]  ;;  %695 = vmatpush.msra.mxu3 %v330_v34 }
  0x3a   :  { %v194_v36 = vld [vmem:[#allocation2 + $0x2c0] sm:$0xff]  ;;  %637 = vmatpush.msra.mxu0 %v130_v35 }
  0x3b   :  { %v258_v37 = vld [vmem:[#allocation2 + $0x4c0] sm:$0xff]  ;;  %657 = vmatpush.msra.mxu1 %v194_v36 }
  0x3c   :  { %v326_v38 = vld [vmem:[#allocation2 + $0x6e0] sm:$0xff]  ;;  %677 = vmatpush.msra.mxu2 %v258_v37 }
  0x3d   :  { %v126_v39 = vld [vmem:[#allocation2 + $0xa0] sm:$0xff]  ;;  %696 = vmatpush.msra.mxu3 %v326_v38 }
  0x3e   :  { %v190_v40 = vld [vmem:[#allocation2 + $0x2a0] sm:$0xff]  ;;  %638 = vmatpush.msra.mxu0 %v126_v39 }
  0x3f   :  { %v254_v41 = vld [vmem:[#allocation2 + $0x4a0] sm:$0xff]  ;;  %658 = vmatpush.msra.mxu1 %v190_v40 }
  0x40   :  { %v322_v42 = vld [vmem:[#allocation2 + $0x6c0] sm:$0xff]  ;;  %678 = vmatpush.msra.mxu2 %v254_v41 }
  0x41   :  { %v122_v43 = vld [vmem:[#allocation2 + $0x80] sm:$0xff]  ;;  %697 = vmatpush.msra.mxu3 %v322_v42 }
  0x42   :  { %v186_v44 = vld [vmem:[#allocation2 + $0x280] sm:$0xff]  ;;  %639 = vmatpush.msra.mxu0 %v122_v43 }
  0x43   :  { %v250_v45 = vld [vmem:[#allocation2 + $0x480] sm:$0xff]  ;;  %659 = vmatpush.msra.mxu1 %v186_v44 }
  0x44   :  { %v318_v46 = vld [vmem:[#allocation2 + $0x6a0] sm:$0xff]  ;;  %679 = vmatpush.msra.mxu2 %v250_v45 }
  0x45   :  { %v118_v47 = vld [vmem:[#allocation2 + $0x60] sm:$0xff]  ;;  %698 = vmatpush.msra.mxu3 %v318_v46 }
  0x46   :  { %v182_v48 = vld [vmem:[#allocation2 + $0x260] sm:$0xff]  ;;  %640 = vmatpush.msra.mxu0 %v118_v47 }
  0x47   :  { %v246_v49 = vld [vmem:[#allocation2 + $0x460] sm:$0xff]  ;;  %660 = vmatpush.msra.mxu1 %v182_v48 }
  0x48   :  { %v314_v50 = vld [vmem:[#allocation2 + $0x680] sm:$0xff]  ;;  %680 = vmatpush.msra.mxu2 %v246_v49 }
  0x49   :  { %v114_v51 = vld [vmem:[#allocation2 + $0x40] sm:$0xff]  ;;  %699 = vmatpush.msra.mxu3 %v314_v50 }
  0x4a   :  { %v178_v52 = vld [vmem:[#allocation2 + $0x240] sm:$0xff]  ;;  %641 = vmatpush.msra.mxu0 %v114_v51 }
  0x4b   :  { %v242_v53 = vld [vmem:[#allocation2 + $0x440] sm:$0xff]  ;;  %661 = vmatpush.msra.mxu1 %v178_v52 }
  0x4c   :  { %v310_v54 = vld [vmem:[#allocation2 + $0x660] sm:$0xff]  ;;  %681 = vmatpush.msra.mxu2 %v242_v53 }
  0x4d   :  { %v110_v55 = vld [vmem:[#allocation2 + $0x20] sm:$0xff]  ;;  %700 = vmatpush.msra.mxu3 %v310_v54 }
  0x4e   :  { %v174_v56 = vld [vmem:[#allocation2 + $0x220] sm:$0xff]  ;;  %642 = vmatpush.msra.mxu0 %v110_v55 }
  0x4f   :  { %v238_v57 = vld [vmem:[#allocation2 + $0x420] sm:$0xff]  ;;  %662 = vmatpush.msra.mxu1 %v174_v56 }
  0x50   :  { %v306_v58 = vld [vmem:[#allocation2 + $0x640] sm:$0xff]  ;;  %682 = vmatpush.msra.mxu2 %v238_v57 }
  0x51   :  { %v106_v59 = vld [vmem:[#allocation2] sm:$0xff]  ;;  %701 = vmatpush.msra.mxu3 %v306_v58 }
  0x52   :  { %v170_v60 = vld [vmem:[#allocation2 + $0x200] sm:$0xff]  ;;  %643 = vmatpush.msra.mxu0 %v106_v59 }
  0x53   :  { %v234_v61 = vld [vmem:[#allocation2 + $0x400] sm:$0xff]  ;;  %663 = vmatpush.msra.mxu1 %v170_v60 }
  0x54   :  { %v302_v62 = vld [vmem:[#allocation2 + $0x620] sm:$0xff]  ;;  %683 = vmatpush.msra.mxu2 %v234_v61 }
  0x55   :  { %v422_v63 = vld [vmem:[#allocation2 + $0x9e0] sm:$0xff]  ;;  %702 = vmatpush.msra.mxu3 %v302_v62 }
  0x56   :  { %v486_v0 = vld [vmem:[#allocation2 + $0xbe0] sm:$0xff]  ;;  %708 = vmatpush.msrb.mxu0 %v422_v63 }
  0x57   :  { %v550_v1 = vld [vmem:[#allocation2 + $0xde0] sm:$0xff]  ;;  %728 = vmatpush.msrb.mxu1 %v486_v0  ;;  %v1710_v0 = vld [vmem:[%s1877_s0 + $0x8] sm:$0xff] }
  0x58   :  { %v298_v2 = vld [vmem:[#allocation2 + $0x600] sm:$0xff]  ;;  %748 = vmatpush.msrb.mxu2 %v550_v1  ;;  %v1715_v1 = vld [vmem:[%s1877_s0 + $0x10] sm:$0xff]  ;;  %664 = vmatmul.f32.vlgmr.msra.gmra.mxu1 %v1710_v0 }
  0x59   :  { %v418_v3 = vld [vmem:[#allocation2 + $0x9c0] sm:$0xff]  ;;  %703 = vmatpush.msra.mxu3 %v298_v2  ;;  %v167_v2 = vld [vmem:[#allocation2 + $0x1e8] sm:$0xff]  ;;  %684 = vmatmul.f32.vlgmr.msra.gmra.mxu2 %v1715_v1 }
  0x5a   :  { %v482_v4 = vld [vmem:[#allocation2 + $0xbc0] sm:$0xff]  ;;  %709 = vmatpush.msrb.mxu0 %v418_v3  ;;  %v231_v3 = vld [vmem:[#allocation2 + $0x3e8] sm:$0xff] }
  0x5b   :  { %v546_v5 = vld [vmem:[#allocation2 + $0xdc0] sm:$0xff]  ;;  %729 = vmatpush.msrb.mxu1 %v482_v4  ;;  %v295_v4 = vld [vmem:[#allocation2 + $0x5e8] sm:$0xff] }
  0x5c   :  { %v614_v6 = vld [vmem:[#allocation2 + $0xfe0] sm:$0xff]  ;;  %749 = vmatpush.msrb.mxu2 %v546_v5 }
  0x5d   :  { %v414_v7 = vld [vmem:[#allocation2 + $0x9a0] sm:$0xff]  ;;  %768 = vmatpush.msrb.mxu3 %v614_v6  ;;  %v163_v6 = vld [vmem:[#allocation2 + $0x1c8] sm:$0xff] }
  0x5e   :  { %v478_v8 = vld [vmem:[#allocation2 + $0xba0] sm:$0xff]  ;;  %710 = vmatpush.msrb.mxu0 %v414_v7  ;;  %v1723_v7 = vld [vmem:[%s1877_s0 + $0x18] sm:$0xff] }
  0x5f   :  { %v542_v9 = vld [vmem:[#allocation2 + $0xda0] sm:$0xff]  ;;  %730 = vmatpush.msrb.mxu1 %v478_v8  ;;  %v227_v8 = vld [vmem:[#allocation2 + $0x3c8] sm:$0xff]  ;;  %704 = vmatmul.f32.vlgmr.msra.gmra.mxu3 %v1723_v7 }
  0x60   :  { %v610_v10 = vld [vmem:[#allocation2 + $0xfc0] sm:$0xff]  ;;  %750 = vmatpush.msrb.mxu2 %v542_v9  ;;  %v291_v9 = vld [vmem:[#allocation2 + $0x5c8] sm:$0xff] }
  0x61   :  { %v410_v11 = vld [vmem:[#allocation2 + $0x980] sm:$0xff]  ;;  %769 = vmatpush.msrb.mxu3 %v610_v10  ;;  %v359_v10 = vld [vmem:[#allocation2 + $0x7e8] sm:$0xff] }
  0x62   :  { %v474_v12 = vld [vmem:[#allocation2 + $0xb80] sm:$0xff]  ;;  %711 = vmatpush.msrb.mxu0 %v410_v11  ;;  %v159_v11 = vld [vmem:[#allocation2 + $0x1a8] sm:$0xff] }
  0x63   :  { %v538_v13 = vld [vmem:[#allocation2 + $0xd80] sm:$0xff]  ;;  %731 = vmatpush.msrb.mxu1 %v474_v12  ;;  %v223_v12 = vld [vmem:[#allocation2 + $0x3a8] sm:$0xff] }
  0x64   :  { %v606_v14 = vld [vmem:[#allocation2 + $0xfa0] sm:$0xff]  ;;  %751 = vmatpush.msrb.mxu2 %v538_v13  ;;  %v287_v13 = vld [vmem:[#allocation2 + $0x5a8] sm:$0xff] }
  0x65   :  { %v406_v15 = vld [vmem:[#allocation2 + $0x960] sm:$0xff]  ;;  %770 = vmatpush.msrb.mxu3 %v606_v14  ;;  %v355_v14 = vld [vmem:[#allocation2 + $0x7c8] sm:$0xff] }
  0x66   :  { %v470_v16 = vld [vmem:[#allocation2 + $0xb60] sm:$0xff]  ;;  %712 = vmatpush.msrb.mxu0 %v406_v15  ;;  %v155_v15 = vld [vmem:[#allocation2 + $0x188] sm:$0xff] }
  0x67   :  { %v534_v17 = vld [vmem:[#allocation2 + $0xd60] sm:$0xff]  ;;  %732 = vmatpush.msrb.mxu1 %v470_v16  ;;  %v219_v16 = vld [vmem:[#allocation2 + $0x388] sm:$0xff] }
  0x68   :  { %v602_v18 = vld [vmem:[#allocation2 + $0xf80] sm:$0xff]  ;;  %752 = vmatpush.msrb.mxu2 %v534_v17  ;;  %v283_v17 = vld [vmem:[#allocation2 + $0x588] sm:$0xff] }
  0x69   :  { %v402_v19 = vld [vmem:[#allocation2 + $0x940] sm:$0xff]  ;;  %771 = vmatpush.msrb.mxu3 %v602_v18  ;;  %v351_v18 = vld [vmem:[#allocation2 + $0x7a8] sm:$0xff] }
  0x6a   :  { %v466_v20 = vld [vmem:[#allocation2 + $0xb40] sm:$0xff]  ;;  %713 = vmatpush.msrb.mxu0 %v402_v19  ;;  %v1729_v19 = vld [vmem:[%s1877_s0 + $0x30] sm:$0xff] }
  0x6b   :  { %v530_v21 = vld [vmem:[#allocation2 + $0xd40] sm:$0xff]  ;;  %733 = vmatpush.msrb.mxu1 %v466_v20  ;;  %v151_v20 = vld [vmem:[#allocation2 + $0x168] sm:$0xff] }
  0x6c   :  { %v598_v22 = vld [vmem:[#allocation2 + $0xf60] sm:$0xff]  ;;  %753 = vmatpush.msrb.mxu2 %v530_v21  ;;  %v215_v21 = vld [vmem:[#allocation2 + $0x368] sm:$0xff] }
  0x6d   :  { %v398_v23 = vld [vmem:[#allocation2 + $0x920] sm:$0xff]  ;;  %772 = vmatpush.msrb.mxu3 %v598_v22  ;;  %v279_v22 = vld [vmem:[#allocation2 + $0x568] sm:$0xff] }
  0x6e   :  { %v462_v24 = vld [vmem:[#allocation2 + $0xb20] sm:$0xff]  ;;  %714 = vmatpush.msrb.mxu0 %v398_v23  ;;  %v347_v23 = vld [vmem:[#allocation2 + $0x788] sm:$0xff] }
  0x6f   :  { %v526_v25 = vld [vmem:[#allocation2 + $0xd20] sm:$0xff]  ;;  %734 = vmatpush.msrb.mxu1 %v462_v24 }
  0x70   :  { %v594_v26 = vld [vmem:[#allocation2 + $0xf40] sm:$0xff]  ;;  %754 = vmatpush.msrb.mxu2 %v526_v25  ;;  %v1740_v25 = vld [vmem:[%s1877_s0 + $0x38] sm:$0xff] }
  0x71   :  { %v394_v27 = vld [vmem:[#allocation2 + $0x900] sm:$0xff]  ;;  %773 = vmatpush.msrb.mxu3 %v594_v26  ;;  %v147_v26 = vld [vmem:[#allocation2 + $0x148] sm:$0xff] }
  0x72   :  { %v458_v28 = vld [vmem:[#allocation2 + $0xb00] sm:$0xff]  ;;  %715 = vmatpush.msrb.mxu0 %v394_v27  ;;  %v211_v27 = vld [vmem:[#allocation2 + $0x348] sm:$0xff] }
  0x73   :  { %v522_v29 = vld [vmem:[#allocation2 + $0xd00] sm:$0xff]  ;;  %735 = vmatpush.msrb.mxu1 %v458_v28  ;;  %v275_v28 = vld [vmem:[#allocation2 + $0x548] sm:$0xff] }
  0x74   :  { %v590_v30 = vld [vmem:[#allocation2 + $0xf20] sm:$0xff]  ;;  %755 = vmatpush.msrb.mxu2 %v522_v29  ;;  %v343_v29 = vld [vmem:[#allocation2 + $0x768] sm:$0xff] }
  0x75   :  { %v390_v31 = vld [vmem:[#allocation2 + $0x8e0] sm:$0xff]  ;;  %774 = vmatpush.msrb.mxu3 %v590_v30  ;;  %v1746_v30 = vld [vmem:[%s1877_s0 + $0x28] sm:$0xff] }
  0x76   :  { %v454_v32 = vld [vmem:[#allocation2 + $0xae0] sm:$0xff]  ;;  %716 = vmatpush.msrb.mxu0 %v390_v31  ;;  %v143_v31 = vld [vmem:[#allocation2 + $0x128] sm:$0xff] }
  0x77   :  { %v518_v33 = vld [vmem:[#allocation2 + $0xce0] sm:$0xff]  ;;  %736 = vmatpush.msrb.mxu1 %v454_v32  ;;  %v207_v32 = vld [vmem:[#allocation2 + $0x328] sm:$0xff] }
  0x78   :  { %v586_v34 = vld [vmem:[#allocation2 + $0xf00] sm:$0xff]  ;;  %756 = vmatpush.msrb.mxu2 %v518_v33  ;;  %v271_v33 = vld [vmem:[#allocation2 + $0x528] sm:$0xff] }
  0x79   :  { %v386_v35 = vld [vmem:[#allocation2 + $0x8c0] sm:$0xff]  ;;  %775 = vmatpush.msrb.mxu3 %v586_v34  ;;  %v339_v34 = vld [vmem:[#allocation2 + $0x748] sm:$0xff] }
  0x7a   :  { %v450_v36 = vld [vmem:[#allocation2 + $0xac0] sm:$0xff]  ;;  %717 = vmatpush.msrb.mxu0 %v386_v35  ;;  %v139_v35 = vld [vmem:[#allocation2 + $0x108] sm:$0xff] }
  0x7b   :  { %v514_v37 = vld [vmem:[#allocation2 + $0xcc0] sm:$0xff]  ;;  %737 = vmatpush.msrb.mxu1 %v450_v36  ;;  %v203_v36 = vld [vmem:[#allocation2 + $0x308] sm:$0xff] }
  0x7c   :  { %v582_v38 = vld [vmem:[#allocation2 + $0xee0] sm:$0xff]  ;;  %757 = vmatpush.msrb.mxu2 %v514_v37  ;;  %v267_v37 = vld [vmem:[#allocation2 + $0x508] sm:$0xff] }
  0x7d   :  { %v382_v39 = vld [vmem:[#allocation2 + $0x8a0] sm:$0xff]  ;;  %776 = vmatpush.msrb.mxu3 %v582_v38  ;;  %v335_v38 = vld [vmem:[#allocation2 + $0x728] sm:$0xff] }
  0x7e   :  { %v446_v40 = vld [vmem:[#allocation2 + $0xaa0] sm:$0xff]  ;;  %718 = vmatpush.msrb.mxu0 %v382_v39  ;;  %v135_v39 = vld [vmem:[#allocation2 + $0xe8] sm:$0xff] }
  0x7f   :  { %v510_v41 = vld [vmem:[#allocation2 + $0xca0] sm:$0xff]  ;;  %738 = vmatpush.msrb.mxu1 %v446_v40  ;;  %v199_v40 = vld [vmem:[#allocation2 + $0x2e8] sm:$0xff] }
  0x80   :  { %v578_v42 = vld [vmem:[#allocation2 + $0xec0] sm:$0xff]  ;;  %758 = vmatpush.msrb.mxu2 %v510_v41  ;;  %v263_v41 = vld [vmem:[#allocation2 + $0x4e8] sm:$0xff] }
  0x81   :  { %v378_v43 = vld [vmem:[#allocation2 + $0x880] sm:$0xff]  ;;  %777 = vmatpush.msrb.mxu3 %v578_v42  ;;  %v331_v42 = vld [vmem:[#allocation2 + $0x708] sm:$0xff] }
  0x82   :  { %v442_v44 = vld [vmem:[#allocation2 + $0xa80] sm:$0xff]  ;;  %719 = vmatpush.msrb.mxu0 %v378_v43  ;;  %v131_v43 = vld [vmem:[#allocation2 + $0xc8] sm:$0xff] }
  0x83   :  { %v506_v45 = vld [vmem:[#allocation2 + $0xc80] sm:$0xff]  ;;  %739 = vmatpush.msrb.mxu1 %v442_v44  ;;  %v195_v44 = vld [vmem:[#allocation2 + $0x2c8] sm:$0xff] }
  0x84   :  { %v574_v46 = vld [vmem:[#allocation2 + $0xea0] sm:$0xff]  ;;  %759 = vmatpush.msrb.mxu2 %v506_v45  ;;  %v259_v45 = vld [vmem:[#allocation2 + $0x4c8] sm:$0xff] }
  0x85   :  { %v374_v47 = vld [vmem:[#allocation2 + $0x860] sm:$0xff]  ;;  %778 = vmatpush.msrb.mxu3 %v574_v46  ;;  %v327_v46 = vld [vmem:[#allocation2 + $0x6e8] sm:$0xff] }
  0x86   :  { %v438_v48 = vld [vmem:[#allocation2 + $0xa60] sm:$0xff]  ;;  %720 = vmatpush.msrb.mxu0 %v374_v47  ;;  %v127_v47 = vld [vmem:[#allocation2 + $0xa8] sm:$0xff] }
  0x87   :  { %v502_v49 = vld [vmem:[#allocation2 + $0xc60] sm:$0xff]  ;;  %740 = vmatpush.msrb.mxu1 %v438_v48  ;;  %v191_v48 = vld [vmem:[#allocation2 + $0x2a8] sm:$0xff] }
  0x88   :  { %v570_v50 = vld [vmem:[#allocation2 + $0xe80] sm:$0xff]  ;;  %760 = vmatpush.msrb.mxu2 %v502_v49  ;;  %v255_v49 = vld [vmem:[#allocation2 + $0x4a8] sm:$0xff] }
  0x89   :  { %v370_v51 = vld [vmem:[#allocation2 + $0x840] sm:$0xff]  ;;  %779 = vmatpush.msrb.mxu3 %v570_v50  ;;  %v323_v50 = vld [vmem:[#allocation2 + $0x6c8] sm:$0xff] }
  0x8a   :  { %v434_v52 = vld [vmem:[#allocation2 + $0xa40] sm:$0xff]  ;;  %721 = vmatpush.msrb.mxu0 %v370_v51  ;;  %v123_v51 = vld [vmem:[#allocation2 + $0x88] sm:$0xff] }
  0x8b   :  { %v498_v53 = vld [vmem:[#allocation2 + $0xc40] sm:$0xff]  ;;  %741 = vmatpush.msrb.mxu1 %v434_v52  ;;  %v187_v52 = vld [vmem:[#allocation2 + $0x288] sm:$0xff] }
  0x8c   :  { %v566_v54 = vld [vmem:[#allocation2 + $0xe60] sm:$0xff]  ;;  %761 = vmatpush.msrb.mxu2 %v498_v53  ;;  %v251_v53 = vld [vmem:[#allocation2 + $0x488] sm:$0xff] }
  0x8d   :  { %v366_v55 = vld [vmem:[#allocation2 + $0x820] sm:$0xff]  ;;  %780 = vmatpush.msrb.mxu3 %v566_v54  ;;  %v319_v54 = vld [vmem:[#allocation2 + $0x6a8] sm:$0xff] }
  0x8e   :  { %v430_v56 = vld [vmem:[#allocation2 + $0xa20] sm:$0xff]  ;;  %722 = vmatpush.msrb.mxu0 %v366_v55  ;;  %v119_v55 = vld [vmem:[#allocation2 + $0x68] sm:$0xff] }
  0x8f   :  { %v494_v57 = vld [vmem:[#allocation2 + $0xc20] sm:$0xff]  ;;  %742 = vmatpush.msrb.mxu1 %v430_v56  ;;  %v183_v56 = vld [vmem:[#allocation2 + $0x268] sm:$0xff] }
  0x90   :  { %v562_v58 = vld [vmem:[#allocation2 + $0xe40] sm:$0xff]  ;;  %762 = vmatpush.msrb.mxu2 %v494_v57  ;;  %v247_v57 = vld [vmem:[#allocation2 + $0x468] sm:$0xff] }
  0x91   :  { %v362_v59 = vld [vmem:[#allocation2 + $0x800] sm:$0xff]  ;;  %781 = vmatpush.msrb.mxu3 %v562_v58  ;;  %v315_v58 = vld [vmem:[#allocation2 + $0x688] sm:$0xff] }
  0x92   :  { %v426_v60 = vld [vmem:[#allocation2 + $0xa00] sm:$0xff]  ;;  %723 = vmatpush.msrb.mxu0 %v362_v59  ;;  %v115_v59 = vld [vmem:[#allocation2 + $0x48] sm:$0xff] }
  0x93   :  { %v490_v61 = vld [vmem:[#allocation2 + $0xc00] sm:$0xff]  ;;  %743 = vmatpush.msrb.mxu1 %v426_v60  ;;  %v179_v60 = vld [vmem:[#allocation2 + $0x248] sm:$0xff] }
  0x94   :  { %v558_v62 = vld [vmem:[#allocation2 + $0xe20] sm:$0xff]  ;;  %763 = vmatpush.msrb.mxu2 %v490_v61  ;;  %744 = vmatmul.f32.vlgmr.msrb.gmra.mxu1 %v1746_v30  ;;  %v243_v61 = vld [vmem:[#allocation2 + $0x448] sm:$0xff] }
  0x95   :  { %v1705_v63 = vld [vmem:[%s1877_s0] sm:$0xff]  ;;  %782 = vmatpush.msrb.mxu3 %v558_v62  ;;  %808 = vmatpush.msra.mxu1 %v231_v3  ;;  %v311_v62 = vld [vmem:[#allocation2 + $0x668] sm:$0xff] }
  0x96   :  { %644 = vmatmul.f32.vlgmr.msra.gmra.mxu0 %v1705_v63  ;;  %v554_v5 = vld [vmem:[#allocation2 + $0xe00] sm:$0xff]  ;;  %828 = vmatpush.msra.mxu2 %v295_v4  ;;  %v175_v3 = vld [vmem:[#allocation2 + $0x228] sm:$0xff] }
  0x97   :  { %788 = vmatpush.msra.mxu0 %v167_v2  ;;  %783 = vmatpush.msrb.mxu3 %v554_v5  ;;  %v1734_v24 = vld [vmem:[%s1877_s0 + $0x20] sm:$0xff]  ;;  %v111_v2 = vld [vmem:[#allocation2 + $0x28] sm:$0xff] }
  0x98   :  { %809 = vmatpush.msra.mxu1 %v227_v8  ;;  %829 = vmatpush.msra.mxu2 %v291_v9  ;;  %v239_v4 = vld [vmem:[#allocation2 + $0x428] sm:$0xff] }
  0x99   :  { %789 = vmatpush.msra.mxu0 %v163_v6  ;;  %848 = vmatpush.msra.mxu3 %v359_v10  ;;  %v307_v5 = vld [vmem:[#allocation2 + $0x648] sm:$0xff] }
  0x9a   :  { %810 = vmatpush.msra.mxu1 %v223_v12  ;;  %830 = vmatpush.msra.mxu2 %v287_v13  ;;  %v107_v6 = vld [vmem:[#allocation2 + $0x8] sm:$0xff] }
  0x9b   :  { %790 = vmatpush.msra.mxu0 %v159_v11  ;;  %849 = vmatpush.msra.mxu3 %v355_v14  ;;  %v171_v8 = vld [vmem:[#allocation2 + $0x208] sm:$0xff] }
  0x9c   :  { %811 = vmatpush.msra.mxu1 %v219_v16  ;;  %831 = vmatpush.msra.mxu2 %v283_v17  ;;  %v235_v9 = vld [vmem:[#allocation2 + $0x408] sm:$0xff] }
  0x9d   :  { %791 = vmatpush.msra.mxu0 %v155_v15  ;;  %850 = vmatpush.msra.mxu3 %v351_v18  ;;  %v303_v10 = vld [vmem:[#allocation2 + $0x628] sm:$0xff] }
  0x9e   :  { %764 = vmatmul.f32.vlgmr.msrb.gmra.mxu2 %v1729_v19  ;;  %812 = vmatpush.msra.mxu1 %v215_v21  ;;  %v423_v11 = vld [vmem:[#allocation2 + $0x9e8] sm:$0xff] }
  0x9f   :  { %792 = vmatpush.msra.mxu0 %v151_v20  ;;  %832 = vmatpush.msra.mxu2 %v279_v22  ;;  %v487_v12 = vld [vmem:[#allocation2 + $0xbe8] sm:$0xff] }
  0xa0   :  { %851 = vmatpush.msra.mxu3 %v347_v23  ;;  %724 = vmatmul.f32.vlgmr.msrb.gmra.mxu0 %v1734_v24  ;;  %v551_v13 = vld [vmem:[#allocation2 + $0xde8] sm:$0xff] }
  0xa1   :  { %784 = vmatmul.f32.vlgmr.msrb.gmra.mxu3 %v1740_v25  ;;  %793 = vmatpush.msra.mxu0 %v147_v26  ;;  %v299_v14 = vld [vmem:[#allocation2 + $0x608] sm:$0xff] }
  0xa2   :  { %813 = vmatpush.msra.mxu1 %v211_v27  ;;  %833 = vmatpush.msra.mxu2 %v275_v28  ;;  %v419_v15 = vld [vmem:[#allocation2 + $0x9c8] sm:$0xff] }
  0xa3   :  { %852 = vmatpush.msra.mxu3 %v343_v29  ;;  %794 = vmatpush.msra.mxu0 %v143_v31  ;;  %v483_v16 = vld [vmem:[#allocation2 + $0xbc8] sm:$0xff] }
  0xa4   :  { %814 = vmatpush.msra.mxu1 %v207_v32  ;;  %834 = vmatpush.msra.mxu2 %v271_v33  ;;  %v547_v17 = vld [vmem:[#allocation2 + $0xdc8] sm:$0xff] }
  0xa5   :  { %853 = vmatpush.msra.mxu3 %v339_v34  ;;  %795 = vmatpush.msra.mxu0 %v139_v35  ;;  %v615_v18 = vld [vmem:[#allocation2 + $0xfe8] sm:$0xff] }
  0xa6   :  { %815 = vmatpush.msra.mxu1 %v203_v36  ;;  %835 = vmatpush.msra.mxu2 %v267_v37  ;;  %v415_v20 = vld [vmem:[#allocation2 + $0x9a8] sm:$0xff] }
  0xa7   :  { %854 = vmatpush.msra.mxu3 %v335_v38  ;;  %796 = vmatpush.msra.mxu0 %v135_v39  ;;  %v479_v21 = vld [vmem:[#allocation2 + $0xba8] sm:$0xff] }
  0xa8   :  { %816 = vmatpush.msra.mxu1 %v199_v40  ;;  %836 = vmatpush.msra.mxu2 %v263_v41  ;;  %v543_v22 = vld [vmem:[#allocation2 + $0xda8] sm:$0xff] }
  0xa9   :  { %855 = vmatpush.msra.mxu3 %v331_v42  ;;  %797 = vmatpush.msra.mxu0 %v131_v43  ;;  %v611_v23 = vld [vmem:[#allocation2 + $0xfc8] sm:$0xff] }
  0xaa   :  { %817 = vmatpush.msra.mxu1 %v195_v44  ;;  %837 = vmatpush.msra.mxu2 %v259_v45  ;;  %v411_v26 = vld [vmem:[#allocation2 + $0x988] sm:$0xff] }
  0xab   :  { %856 = vmatpush.msra.mxu3 %v327_v46  ;;  %798 = vmatpush.msra.mxu0 %v127_v47  ;;  %v475_v27 = vld [vmem:[#allocation2 + $0xb88] sm:$0xff] }
  0xac   :  { %818 = vmatpush.msra.mxu1 %v191_v48  ;;  %838 = vmatpush.msra.mxu2 %v255_v49  ;;  %v539_v28 = vld [vmem:[#allocation2 + $0xd88] sm:$0xff] }
  0xad   :  { %857 = vmatpush.msra.mxu3 %v323_v50  ;;  %799 = vmatpush.msra.mxu0 %v123_v51  ;;  %v607_v29 = vld [vmem:[#allocation2 + $0xfa8] sm:$0xff] }
  0xae   :  { %819 = vmatpush.msra.mxu1 %v187_v52  ;;  %839 = vmatpush.msra.mxu2 %v251_v53  ;;  %v407_v31 = vld [vmem:[#allocation2 + $0x968] sm:$0xff] }
  0xaf   :  { %858 = vmatpush.msra.mxu3 %v319_v54  ;;  %800 = vmatpush.msra.mxu0 %v119_v55  ;;  %v471_v32 = vld [vmem:[#allocation2 + $0xb68] sm:$0xff] }
  0xb0   :  { %820 = vmatpush.msra.mxu1 %v183_v56  ;;  %840 = vmatpush.msra.mxu2 %v247_v57  ;;  %v535_v33 = vld [vmem:[#allocation2 + $0xd68] sm:$0xff] }
  0xb1   :  { %859 = vmatpush.msra.mxu3 %v315_v58  ;;  %801 = vmatpush.msra.mxu0 %v115_v59  ;;  %v603_v34 = vld [vmem:[#allocation2 + $0xf88] sm:$0xff] }
  0xb2   :  { %821 = vmatpush.msra.mxu1 %v179_v60  ;;  %841 = vmatpush.msra.mxu2 %v243_v61  ;;  %v403_v35 = vld [vmem:[#allocation2 + $0x948] sm:$0xff] }
  0xb3   :  { %860 = vmatpush.msra.mxu3 %v311_v62  ;;  %802 = vmatpush.msra.mxu0 %v111_v2  ;;  %v467_v36 = vld [vmem:[#allocation2 + $0xb48] sm:$0xff] }
  0xb4   :  { %822 = vmatpush.msra.mxu1 %v175_v3  ;;  %842 = vmatpush.msra.mxu2 %v239_v4  ;;  %v531_v37 = vld [vmem:[#allocation2 + $0xd48] sm:$0xff] }
  0xb5   :  { %861 = vmatpush.msra.mxu3 %v307_v5  ;;  %803 = vmatpush.msra.mxu0 %v107_v6  ;;  %v599_v38 = vld [vmem:[#allocation2 + $0xf68] sm:$0xff] }
  0xb6   :  { %823 = vmatpush.msra.mxu1 %v171_v8  ;;  %843 = vmatpush.msra.mxu2 %v235_v9  ;;  %v399_v39 = vld [vmem:[#allocation2 + $0x928] sm:$0xff] }
  0xb7   :  { %862 = vmatpush.msra.mxu3 %v303_v10  ;;  %868 = vmatpush.msrb.mxu0 %v423_v11  ;;  %v463_v40 = vld [vmem:[#allocation2 + $0xb28] sm:$0xff] }
  0xb8   :  { %888 = vmatpush.msrb.mxu1 %v487_v12  ;;  %908 = vmatpush.msrb.mxu2 %v551_v13  ;;  %v527_v41 = vld [vmem:[#allocation2 + $0xd28] sm:$0xff] }
  0xb9   :  { %863 = vmatpush.msra.mxu3 %v299_v14  ;;  %869 = vmatpush.msrb.mxu0 %v419_v15  ;;  %v595_v42 = vld [vmem:[#allocation2 + $0xf48] sm:$0xff] }
  0xba   :  { %889 = vmatpush.msrb.mxu1 %v483_v16  ;;  %909 = vmatpush.msrb.mxu2 %v547_v17  ;;  %v395_v43 = vld [vmem:[#allocation2 + $0x908] sm:$0xff] }
  0xbb   :  { %928 = vmatpush.msrb.mxu3 %v615_v18  ;;  %870 = vmatpush.msrb.mxu0 %v415_v20  ;;  %v459_v44 = vld [vmem:[#allocation2 + $0xb08] sm:$0xff]  ;;  %v168_v20 = vld [vmem:[#allocation2 + $0x1f0] sm:$0xff] }
  0xbc   :  { %890 = vmatpush.msrb.mxu1 %v479_v21  ;;  %910 = vmatpush.msrb.mxu2 %v543_v22  ;;  %v523_v45 = vld [vmem:[#allocation2 + $0xd08] sm:$0xff]  ;;  %v232_v21 = vld [vmem:[#allocation2 + $0x3f0] sm:$0xff] }
  0xbd   :  { %929 = vmatpush.msrb.mxu3 %v611_v23  ;;  %871 = vmatpush.msrb.mxu0 %v411_v26  ;;  %v591_v46 = vld [vmem:[#allocation2 + $0xf28] sm:$0xff]  ;;  %v296_v22 = vld [vmem:[#allocation2 + $0x5f0] sm:$0xff] }
  0xbe   :  { %891 = vmatpush.msrb.mxu1 %v475_v27  ;;  %911 = vmatpush.msrb.mxu2 %v539_v28  ;;  %v391_v47 = vld [vmem:[#allocation2 + $0x8e8] sm:$0xff]  ;;  %v164_v26 = vld [vmem:[#allocation2 + $0x1d0] sm:$0xff] }
  0xbf   :  { %930 = vmatpush.msrb.mxu3 %v607_v29  ;;  %872 = vmatpush.msrb.mxu0 %v407_v31  ;;  %v455_v48 = vld [vmem:[#allocation2 + $0xae8] sm:$0xff]  ;;  %v228_v27 = vld [vmem:[#allocation2 + $0x3d0] sm:$0xff] }
  0xc0   :  { %892 = vmatpush.msrb.mxu1 %v471_v32  ;;  %912 = vmatpush.msrb.mxu2 %v535_v33  ;;  %v519_v49 = vld [vmem:[#allocation2 + $0xce8] sm:$0xff]  ;;  %v292_v28 = vld [vmem:[#allocation2 + $0x5d0] sm:$0xff] }
  0xc1   :  { %931 = vmatpush.msrb.mxu3 %v603_v34  ;;  %873 = vmatpush.msrb.mxu0 %v403_v35  ;;  %v587_v50 = vld [vmem:[#allocation2 + $0xf08] sm:$0xff]  ;;  %v360_v29 = vld [vmem:[#allocation2 + $0x7f0] sm:$0xff] }
  0xc2   :  { %893 = vmatpush.msrb.mxu1 %v467_v36  ;;  %913 = vmatpush.msrb.mxu2 %v531_v37  ;;  %v387_v51 = vld [vmem:[#allocation2 + $0x8c8] sm:$0xff]  ;;  %v160_v31 = vld [vmem:[#allocation2 + $0x1b0] sm:$0xff] }
  0xc3   :  { %932 = vmatpush.msrb.mxu3 %v599_v38  ;;  %874 = vmatpush.msrb.mxu0 %v399_v39  ;;  %v451_v52 = vld [vmem:[#allocation2 + $0xac8] sm:$0xff]  ;;  %v224_v32 = vld [vmem:[#allocation2 + $0x3b0] sm:$0xff] }
  0xc4   :  { %894 = vmatpush.msrb.mxu1 %v463_v40  ;;  %914 = vmatpush.msrb.mxu2 %v527_v41  ;;  %v515_v53 = vld [vmem:[#allocation2 + $0xcc8] sm:$0xff]  ;;  %v356_v33 = vld [vmem:[#allocation2 + $0x7d0] sm:$0xff] }
  0xc5   :  { %933 = vmatpush.msrb.mxu3 %v595_v42  ;;  %875 = vmatpush.msrb.mxu0 %v395_v43  ;;  %v583_v54 = vld [vmem:[#allocation2 + $0xee8] sm:$0xff]  ;;  %v220_v34 = vld [vmem:[#allocation2 + $0x390] sm:$0xff] }
  0xc6   :  { %895 = vmatpush.msrb.mxu1 %v459_v44  ;;  %915 = vmatpush.msrb.mxu2 %v523_v45  ;;  %v383_v55 = vld [vmem:[#allocation2 + $0x8a8] sm:$0xff]  ;;  %v284_v35 = vld [vmem:[#allocation2 + $0x590] sm:$0xff] }
  0xc7   :  { %934 = vmatpush.msrb.mxu3 %v591_v46  ;;  %876 = vmatpush.msrb.mxu0 %v391_v47  ;;  %v447_v56 = vld [vmem:[#allocation2 + $0xaa8] sm:$0xff]  ;;  %v352_v36 = vld [vmem:[#allocation2 + $0x7b0] sm:$0xff] }
  0xc8   :  { %896 = vmatpush.msrb.mxu1 %v455_v48  ;;  %916 = vmatpush.msrb.mxu2 %v519_v49  ;;  %v511_v57 = vld [vmem:[#allocation2 + $0xca8] sm:$0xff]  ;;  %v152_v37 = vld [vmem:[#allocation2 + $0x170] sm:$0xff] }
  0xc9   :  { %935 = vmatpush.msrb.mxu3 %v587_v50  ;;  %877 = vmatpush.msrb.mxu0 %v387_v51  ;;  %v579_v58 = vld [vmem:[#allocation2 + $0xec8] sm:$0xff]  ;;  %v216_v38 = vld [vmem:[#allocation2 + $0x370] sm:$0xff] }
  0xca   :  { %897 = vmatpush.msrb.mxu1 %v451_v52  ;;  %917 = vmatpush.msrb.mxu2 %v515_v53  ;;  %v379_v59 = vld [vmem:[#allocation2 + $0x888] sm:$0xff]  ;;  %v280_v39 = vld [vmem:[#allocation2 + $0x570] sm:$0xff] }
  0xcb   :  { %936 = vmatpush.msrb.mxu3 %v583_v54  ;;  %v443_v60 = vld [vmem:[#allocation2 + $0xa88] sm:$0xff]  ;;  %878 = vmatpush.msrb.mxu0 %v383_v55  ;;  %v348_v40 = vld [vmem:[#allocation2 + $0x790] sm:$0xff] }
  0xcc   :  { %898 = vmatpush.msrb.mxu1 %v447_v56  ;;  %v507_v61 = vld [vmem:[#allocation2 + $0xc88] sm:$0xff]  ;;  %918 = vmatpush.msrb.mxu2 %v511_v57  ;;  %v148_v41 = vld [vmem:[#allocation2 + $0x150] sm:$0xff] }
  0xcd   :  { %v575_v62 = vld [vmem:[#allocation2 + $0xea8] sm:$0xff]  ;;  %937 = vmatpush.msrb.mxu3 %v579_v58  ;;  %879 = vmatpush.msrb.mxu0 %v379_v59  ;;  %v212_v42 = vld [vmem:[#allocation2 + $0x350] sm:$0xff] }
  0xce   :  { %v375_v2 = vld [vmem:[#allocation2 + $0x868] sm:$0xff]  ;;  %899 = vmatpush.msrb.mxu1 %v443_v60  ;;  %919 = vmatpush.msrb.mxu2 %v507_v61  ;;  %v276_v43 = vld [vmem:[#allocation2 + $0x550] sm:$0xff] }
  0xcf   :  { %v439_v3 = vld [vmem:[#allocation2 + $0xa68] sm:$0xff]  ;;  %938 = vmatpush.msrb.mxu3 %v575_v62  ;;  %880 = vmatpush.msrb.mxu0 %v375_v2  ;;  %v344_v44 = vld [vmem:[#allocation2 + $0x770] sm:$0xff] }
  0xd0   :  { %v503_v4 = vld [vmem:[#allocation2 + $0xc68] sm:$0xff]  ;;  %900 = vmatpush.msrb.mxu1 %v439_v3  ;;  %804 = vmatmul.f32.vlgmr.msra.gmra.mxu0 %v1705_v63  ;;  %v288_v63 = vld [vmem:[#allocation2 + $0x5b0] sm:$0xff] }
  0xd1   :  { %v571_v5 = vld [vmem:[#allocation2 + $0xe88] sm:$0xff]  ;;  %920 = vmatpush.msrb.mxu2 %v503_v4  ;;  %824 = vmatmul.f32.vlgmr.msra.gmra.mxu1 %v1710_v0  ;;  %v156_v0 = vld [vmem:[#allocation2 + $0x190] sm:$0xff] }
  0xd2   :  { %v371_v6 = vld [vmem:[#allocation2 + $0x848] sm:$0xff]  ;;  %939 = vmatpush.msrb.mxu3 %v571_v5  ;;  %844 = vmatmul.f32.vlgmr.msra.gmra.mxu2 %v1715_v1  ;;  %v144_v45 = vld [vmem:[#allocation2 + $0x130] sm:$0xff] }
  0xd3   :  { %v435_v8 = vld [vmem:[#allocation2 + $0xa48] sm:$0xff]  ;;  %881 = vmatpush.msrb.mxu0 %v371_v6  ;;  %864 = vmatmul.f32.vlgmr.msra.gmra.mxu3 %v1723_v7  ;;  %v208_v46 = vld [vmem:[#allocation2 + $0x330] sm:$0xff] }
  0xd4   :  { %v499_v9 = vld [vmem:[#allocation2 + $0xc48] sm:$0xff]  ;;  %901 = vmatpush.msrb.mxu1 %v435_v8  ;;  %v272_v47 = vld [vmem:[#allocation2 + $0x530] sm:$0xff] }
  0xd5   :  { %v567_v10 = vld [vmem:[#allocation2 + $0xe68] sm:$0xff]  ;;  %921 = vmatpush.msrb.mxu2 %v499_v9  ;;  %v340_v48 = vld [vmem:[#allocation2 + $0x750] sm:$0xff] }
  0xd6   :  { %v367_v11 = vld [vmem:[#allocation2 + $0x828] sm:$0xff]  ;;  %940 = vmatpush.msrb.mxu3 %v567_v10  ;;  %v140_v49 = vld [vmem:[#allocation2 + $0x110] sm:$0xff] }
  0xd7   :  { %v431_v12 = vld [vmem:[#allocation2 + $0xa28] sm:$0xff]  ;;  %882 = vmatpush.msrb.mxu0 %v367_v11  ;;  %v204_v50 = vld [vmem:[#allocation2 + $0x310] sm:$0xff] }
  0xd8   :  { %v495_v13 = vld [vmem:[#allocation2 + $0xc28] sm:$0xff]  ;;  %902 = vmatpush.msrb.mxu1 %v431_v12  ;;  %v268_v51 = vld [vmem:[#allocation2 + $0x510] sm:$0xff] }
  0xd9   :  { %v563_v14 = vld [vmem:[#allocation2 + $0xe48] sm:$0xff]  ;;  %922 = vmatpush.msrb.mxu2 %v495_v13  ;;  %v336_v52 = vld [vmem:[#allocation2 + $0x730] sm:$0xff] }
  0xda   :  { %v363_v15 = vld [vmem:[#allocation2 + $0x808] sm:$0xff]  ;;  %941 = vmatpush.msrb.mxu3 %v563_v14  ;;  %v136_v53 = vld [vmem:[#allocation2 + $0xf0] sm:$0xff] }
  0xdb   :  { %v427_v16 = vld [vmem:[#allocation2 + $0xa08] sm:$0xff]  ;;  %883 = vmatpush.msrb.mxu0 %v363_v15  ;;  %v200_v54 = vld [vmem:[#allocation2 + $0x2f0] sm:$0xff] }
  0xdc   :  { %v491_v17 = vld [vmem:[#allocation2 + $0xc08] sm:$0xff]  ;;  %903 = vmatpush.msrb.mxu1 %v427_v16  ;;  %884 = vmatmul.f32.vlgmr.msrb.gmra.mxu0 %v1734_v24  ;;  %v264_v55 = vld [vmem:[#allocation2 + $0x4f0] sm:$0xff] }
  0xdd   :  { %v559_v18 = vld [vmem:[#allocation2 + $0xe28] sm:$0xff]  ;;  %923 = vmatpush.msrb.mxu2 %v491_v17  ;;  %948 = vmatpush.msra.mxu0 %v168_v20  ;;  %v332_v56 = vld [vmem:[#allocation2 + $0x710] sm:$0xff] }
  0xde   :  { %942 = vmatpush.msrb.mxu3 %v559_v18  ;;  %v555_v23 = vld [vmem:[#allocation2 + $0xe08] sm:$0xff]  ;;  %968 = vmatpush.msra.mxu1 %v232_v21  ;;  %v132_v57 = vld [vmem:[#allocation2 + $0xd0] sm:$0xff] }
  0xdf   :  { %988 = vmatpush.msra.mxu2 %v296_v22  ;;  %949 = vmatpush.msra.mxu0 %v164_v26  ;;  %v196_v58 = vld [vmem:[#allocation2 + $0x2d0] sm:$0xff] }
  0xe0   :  { %943 = vmatpush.msrb.mxu3 %v555_v23  ;;  %969 = vmatpush.msra.mxu1 %v228_v27  ;;  %v260_v59 = vld [vmem:[#allocation2 + $0x4d0] sm:$0xff] }
  0xe1   :  { %989 = vmatpush.msra.mxu2 %v292_v28  ;;  %950 = vmatpush.msra.mxu0 %v160_v31  ;;  %v328_v60 = vld [vmem:[#allocation2 + $0x6f0] sm:$0xff] }
  0xe2   :  { %1008 = vmatpush.msra.mxu3 %v360_v29  ;;  %970 = vmatpush.msra.mxu1 %v224_v32  ;;  %v128_v61 = vld [vmem:[#allocation2 + $0xb0] sm:$0xff] }
  0xe3   :  { %990 = vmatpush.msra.mxu2 %v288_v63  ;;  %951 = vmatpush.msra.mxu0 %v156_v0  ;;  %v192_v62 = vld [vmem:[#allocation2 + $0x2b0] sm:$0xff] }
  0xe4   :  { %1009 = vmatpush.msra.mxu3 %v356_v33  ;;  %971 = vmatpush.msra.mxu1 %v220_v34  ;;  %v256_v2 = vld [vmem:[#allocation2 + $0x4b0] sm:$0xff] }
  0xe5   :  { %991 = vmatpush.msra.mxu2 %v284_v35  ;;  %952 = vmatpush.msra.mxu0 %v152_v37  ;;  %v324_v3 = vld [vmem:[#allocation2 + $0x6d0] sm:$0xff] }
  0xe6   :  { %1010 = vmatpush.msra.mxu3 %v352_v36  ;;  %924 = vmatmul.f32.vlgmr.msrb.gmra.mxu2 %v1729_v19  ;;  %v124_v4 = vld [vmem:[#allocation2 + $0x90] sm:$0xff] }
  0xe7   :  { %972 = vmatpush.msra.mxu1 %v216_v38  ;;  %992 = vmatpush.msra.mxu2 %v280_v39  ;;  %v188_v5 = vld [vmem:[#allocation2 + $0x290] sm:$0xff] }
  0xe8   :  { %1011 = vmatpush.msra.mxu3 %v348_v40  ;;  %953 = vmatpush.msra.mxu0 %v148_v41  ;;  %v252_v6 = vld [vmem:[#allocation2 + $0x490] sm:$0xff] }
  0xe9   :  { %944 = vmatmul.f32.vlgmr.msrb.gmra.mxu3 %v1740_v25  ;;  %973 = vmatpush.msra.mxu1 %v212_v42  ;;  %v320_v8 = vld [vmem:[#allocation2 + $0x6b0] sm:$0xff] }
  0xea   :  { %993 = vmatpush.msra.mxu2 %v276_v43  ;;  %1012 = vmatpush.msra.mxu3 %v344_v44  ;;  %v120_v9 = vld [vmem:[#allocation2 + $0x70] sm:$0xff] }
  0xeb   :  { %904 = vmatmul.f32.vlgmr.msrb.gmra.mxu1 %v1746_v30  ;;  %954 = vmatpush.msra.mxu0 %v144_v45  ;;  %v184_v10 = vld [vmem:[#allocation2 + $0x270] sm:$0xff] }
  0xec   :  { %974 = vmatpush.msra.mxu1 %v208_v46  ;;  %994 = vmatpush.msra.mxu2 %v272_v47  ;;  %v248_v11 = vld [vmem:[#allocation2 + $0x470] sm:$0xff] }
  0xed   :  { %1013 = vmatpush.msra.mxu3 %v340_v48  ;;  %955 = vmatpush.msra.mxu0 %v140_v49  ;;  %v316_v12 = vld [vmem:[#allocation2 + $0x690] sm:$0xff] }
  0xee   :  { %975 = vmatpush.msra.mxu1 %v204_v50  ;;  %995 = vmatpush.msra.mxu2 %v268_v51  ;;  %v116_v13 = vld [vmem:[#allocation2 + $0x50] sm:$0xff] }
  0xef   :  { %1014 = vmatpush.msra.mxu3 %v336_v52  ;;  %956 = vmatpush.msra.mxu0 %v136_v53  ;;  %v180_v14 = vld [vmem:[#allocation2 + $0x250] sm:$0xff] }
  0xf0   :  { %976 = vmatpush.msra.mxu1 %v200_v54  ;;  %996 = vmatpush.msra.mxu2 %v264_v55  ;;  %v244_v15 = vld [vmem:[#allocation2 + $0x450] sm:$0xff] }
  0xf1   :  { %1015 = vmatpush.msra.mxu3 %v332_v56  ;;  %957 = vmatpush.msra.mxu0 %v132_v57  ;;  %v312_v16 = vld [vmem:[#allocation2 + $0x670] sm:$0xff] }
  0xf2   :  { %977 = vmatpush.msra.mxu1 %v196_v58  ;;  %997 = vmatpush.msra.mxu2 %v260_v59  ;;  %v112_v17 = vld [vmem:[#allocation2 + $0x30] sm:$0xff] }
  0xf3   :  { %1016 = vmatpush.msra.mxu3 %v328_v60  ;;  %958 = vmatpush.msra.mxu0 %v128_v61  ;;  %v176_v18 = vld [vmem:[#allocation2 + $0x230] sm:$0xff] }
  0xf4   :  { %978 = vmatpush.msra.mxu1 %v192_v62  ;;  %998 = vmatpush.msra.mxu2 %v256_v2  ;;  %v240_v20 = vld [vmem:[#allocation2 + $0x430] sm:$0xff] }
  0xf5   :  { %1017 = vmatpush.msra.mxu3 %v324_v3  ;;  %959 = vmatpush.msra.mxu0 %v124_v4  ;;  %v308_v21 = vld [vmem:[#allocation2 + $0x650] sm:$0xff] }
  0xf6   :  { %979 = vmatpush.msra.mxu1 %v188_v5  ;;  %999 = vmatpush.msra.mxu2 %v252_v6  ;;  %v108_v22 = vld [vmem:[#allocation2 + $0x10] sm:$0xff] }
  0xf7   :  { %1018 = vmatpush.msra.mxu3 %v320_v8  ;;  %960 = vmatpush.msra.mxu0 %v120_v9  ;;  %v172_v23 = vld [vmem:[#allocation2 + $0x210] sm:$0xff] }
  0xf8   :  { %980 = vmatpush.msra.mxu1 %v184_v10  ;;  %1000 = vmatpush.msra.mxu2 %v248_v11  ;;  %v236_v26 = vld [vmem:[#allocation2 + $0x410] sm:$0xff] }
  0xf9   :  { %1019 = vmatpush.msra.mxu3 %v316_v12  ;;  %961 = vmatpush.msra.mxu0 %v116_v13  ;;  %v304_v27 = vld [vmem:[#allocation2 + $0x630] sm:$0xff] }
  0xfa   :  { %981 = vmatpush.msra.mxu1 %v180_v14  ;;  %1001 = vmatpush.msra.mxu2 %v244_v15  ;;  %v424_v28 = vld [vmem:[#allocation2 + $0x9f0] sm:$0xff] }
  0xfb   :  { %1020 = vmatpush.msra.mxu3 %v312_v16  ;;  %962 = vmatpush.msra.mxu0 %v112_v17  ;;  %v488_v29 = vld [vmem:[#allocation2 + $0xbf0] sm:$0xff] }
  0xfc   :  { %982 = vmatpush.msra.mxu1 %v176_v18  ;;  %1002 = vmatpush.msra.mxu2 %v240_v20  ;;  %v552_v31 = vld [vmem:[#allocation2 + $0xdf0] sm:$0xff] }
  0xfd   :  { %1021 = vmatpush.msra.mxu3 %v308_v21  ;;  %963 = vmatpush.msra.mxu0 %v108_v22  ;;  %v300_v32 = vld [vmem:[#allocation2 + $0x610] sm:$0xff] }
  0xfe   :  { %983 = vmatpush.msra.mxu1 %v172_v23  ;;  %1003 = vmatpush.msra.mxu2 %v236_v26  ;;  %v420_v63 = vld [vmem:[#allocation2 + $0x9d0] sm:$0xff]  ;;  %v1762_v23 = vld [vmem:[%s1877_s0] sm:$0xff] }
  0xff   :  { %1022 = vmatpush.msra.mxu3 %v304_v27  ;;  %v484_v33 = vld [vmem:[#allocation2 + $0xbd0] sm:$0xff]  ;;  %1028 = vmatpush.msrb.mxu0 %v424_v28 }
 0x100   :  { %1048 = vmatpush.msrb.mxu1 %v488_v29  ;;  %v548_v0 = vld [vmem:[#allocation2 + $0xdd0] sm:$0xff]  ;;  %1068 = vmatpush.msrb.mxu2 %v552_v31  ;;  %v1769_v31 = vld [vmem:[%s1877_s0 + $0x8] sm:$0xff] }
 0x101   :  { %v616_v34 = vld [vmem:[#allocation2 + $0xff0] sm:$0xff]  ;;  %1023 = vmatpush.msra.mxu3 %v300_v32  ;;  %1029 = vmatpush.msrb.mxu0 %v420_v63 }
 0x102   :  { %v416_v35 = vld [vmem:[#allocation2 + $0x9b0] sm:$0xff]  ;;  %1049 = vmatpush.msrb.mxu1 %v484_v33  ;;  %1069 = vmatpush.msrb.mxu2 %v548_v0  ;;  %v169_v0 = vld [vmem:[#allocation2 + $0x1f8] sm:$0xff] }
 0x103   :  { %v480_v36 = vld [vmem:[#allocation2 + $0xbb0] sm:$0xff]  ;;  %1088 = vmatpush.msrb.mxu3 %v616_v34  ;;  %1030 = vmatpush.msrb.mxu0 %v416_v35  ;;  %v233_v34 = vld [vmem:[#allocation2 + $0x3f8] sm:$0xff] }
 0x104   :  { %v544_v37 = vld [vmem:[#allocation2 + $0xdb0] sm:$0xff]  ;;  %1050 = vmatpush.msrb.mxu1 %v480_v36  ;;  %1004 = vmatmul.f32.vlgmr.msra.gmra.mxu2 %v1715_v1  ;;  %v297_v35 = vld [vmem:[#allocation2 + $0x5f8] sm:$0xff] }
 0x105   :  { %v612_v38 = vld [vmem:[#allocation2 + $0xfd0] sm:$0xff]  ;;  %1070 = vmatpush.msrb.mxu2 %v544_v37  ;;  %964 = vmatmul.f32.vlgmr.msra.gmra.mxu0 %v1762_v23  ;;  %v165_v37 = vld [vmem:[#allocation2 + $0x1d8] sm:$0xff] }
 0x106   :  { %v412_v39 = vld [vmem:[#allocation2 + $0x990] sm:$0xff]  ;;  %1089 = vmatpush.msrb.mxu3 %v612_v38  ;;  %984 = vmatmul.f32.vlgmr.msra.gmra.mxu1 %v1769_v31  ;;  %v229_v38 = vld [vmem:[#allocation2 + $0x3d8] sm:$0xff] }
 0x107   :  { %v476_v40 = vld [vmem:[#allocation2 + $0xb90] sm:$0xff]  ;;  %1031 = vmatpush.msrb.mxu0 %v412_v39  ;;  %1024 = vmatmul.f32.vlgmr.msra.gmra.mxu3 %v1723_v7  ;;  %v293_v39 = vld [vmem:[#allocation2 + $0x5d8] sm:$0xff] }
 0x108   :  { %v540_v41 = vld [vmem:[#allocation2 + $0xd90] sm:$0xff]  ;;  %1051 = vmatpush.msrb.mxu1 %v476_v40  ;;  %v361_v40 = vld [vmem:[#allocation2 + $0x7f8] sm:$0xff] }
 0x109   :  { %v608_v42 = vld [vmem:[#allocation2 + $0xfb0] sm:$0xff]  ;;  %1071 = vmatpush.msrb.mxu2 %v540_v41  ;;  %v161_v41 = vld [vmem:[#allocation2 + $0x1b8] sm:$0xff] }
 0x10a   :  { %v408_v43 = vld [vmem:[#allocation2 + $0x970] sm:$0xff]  ;;  %1090 = vmatpush.msrb.mxu3 %v608_v42  ;;  %v225_v42 = vld [vmem:[#allocation2 + $0x3b8] sm:$0xff] }
 0x10b   :  { %v472_v44 = vld [vmem:[#allocation2 + $0xb70] sm:$0xff]  ;;  %1032 = vmatpush.msrb.mxu0 %v408_v43  ;;  %v289_v43 = vld [vmem:[#allocation2 + $0x5b8] sm:$0xff] }
 0x10c   :  { %v536_v45 = vld [vmem:[#allocation2 + $0xd70] sm:$0xff]  ;;  %1052 = vmatpush.msrb.mxu1 %v472_v44  ;;  %v357_v44 = vld [vmem:[#allocation2 + $0x7d8] sm:$0xff] }
 0x10d   :  { %v604_v46 = vld [vmem:[#allocation2 + $0xf90] sm:$0xff]  ;;  %1072 = vmatpush.msrb.mxu2 %v536_v45  ;;  %v221_v45 = vld [vmem:[#allocation2 + $0x398] sm:$0xff] }
 0x10e   :  { %v404_v47 = vld [vmem:[#allocation2 + $0x950] sm:$0xff]  ;;  %1091 = vmatpush.msrb.mxu3 %v604_v46  ;;  %v285_v46 = vld [vmem:[#allocation2 + $0x598] sm:$0xff] }
 0x10f   :  { %v468_v48 = vld [vmem:[#allocation2 + $0xb50] sm:$0xff]  ;;  %1033 = vmatpush.msrb.mxu0 %v404_v47  ;;  %v353_v47 = vld [vmem:[#allocation2 + $0x7b8] sm:$0xff] }
 0x110   :  { %v532_v49 = vld [vmem:[#allocation2 + $0xd50] sm:$0xff]  ;;  %1053 = vmatpush.msrb.mxu1 %v468_v48  ;;  %v281_v48 = vld [vmem:[#allocation2 + $0x578] sm:$0xff] }
 0x111   :  { %v600_v50 = vld [vmem:[#allocation2 + $0xf70] sm:$0xff]  ;;  %1073 = vmatpush.msrb.mxu2 %v532_v49  ;;  %v349_v49 = vld [vmem:[#allocation2 + $0x798] sm:$0xff] }
 0x112   :  { %v400_v51 = vld [vmem:[#allocation2 + $0x930] sm:$0xff]  ;;  %1092 = vmatpush.msrb.mxu3 %v600_v50  ;;  %v149_v50 = vld [vmem:[#allocation2 + $0x158] sm:$0xff] }
 0x113   :  { %v464_v52 = vld [vmem:[#allocation2 + $0xb30] sm:$0xff]  ;;  %1034 = vmatpush.msrb.mxu0 %v400_v51  ;;  %v213_v51 = vld [vmem:[#allocation2 + $0x358] sm:$0xff] }
 0x114   :  { %v528_v53 = vld [vmem:[#allocation2 + $0xd30] sm:$0xff]  ;;  %1054 = vmatpush.msrb.mxu1 %v464_v52  ;;  %v345_v52 = vld [vmem:[#allocation2 + $0x778] sm:$0xff] }
 0x115   :  { %v596_v54 = vld [vmem:[#allocation2 + $0xf50] sm:$0xff]  ;;  %1074 = vmatpush.msrb.mxu2 %v528_v53  ;;  %v145_v53 = vld [vmem:[#allocation2 + $0x138] sm:$0xff] }
 0x116   :  { %v396_v55 = vld [vmem:[#allocation2 + $0x910] sm:$0xff]  ;;  %1093 = vmatpush.msrb.mxu3 %v596_v54  ;;  %v209_v54 = vld [vmem:[#allocation2 + $0x338] sm:$0xff] }
 0x117   :  { %v460_v56 = vld [vmem:[#allocation2 + $0xb10] sm:$0xff]  ;;  %1035 = vmatpush.msrb.mxu0 %v396_v55  ;;  %v273_v55 = vld [vmem:[#allocation2 + $0x538] sm:$0xff] }
 0x118   :  { %v524_v57 = vld [vmem:[#allocation2 + $0xd10] sm:$0xff]  ;;  %1055 = vmatpush.msrb.mxu1 %v460_v56  ;;  %v341_v56 = vld [vmem:[#allocation2 + $0x758] sm:$0xff] }
 0x119   :  { %v592_v58 = vld [vmem:[#allocation2 + $0xf30] sm:$0xff]  ;;  %1075 = vmatpush.msrb.mxu2 %v524_v57  ;;  %v141_v57 = vld [vmem:[#allocation2 + $0x118] sm:$0xff] }
 0x11a   :  { %v392_v59 = vld [vmem:[#allocation2 + $0x8f0] sm:$0xff]  ;;  %1094 = vmatpush.msrb.mxu3 %v592_v58  ;;  %v205_v58 = vld [vmem:[#allocation2 + $0x318] sm:$0xff] }
 0x11b   :  { %v456_v60 = vld [vmem:[#allocation2 + $0xaf0] sm:$0xff]  ;;  %1036 = vmatpush.msrb.mxu0 %v392_v59  ;;  %v269_v59 = vld [vmem:[#allocation2 + $0x518] sm:$0xff] }
 0x11c   :  { %v520_v61 = vld [vmem:[#allocation2 + $0xcf0] sm:$0xff]  ;;  %1056 = vmatpush.msrb.mxu1 %v456_v60  ;;  %v337_v60 = vld [vmem:[#allocation2 + $0x738] sm:$0xff] }
 0x11d   :  { %v588_v62 = vld [vmem:[#allocation2 + $0xf10] sm:$0xff]  ;;  %1076 = vmatpush.msrb.mxu2 %v520_v61  ;;  %v137_v61 = vld [vmem:[#allocation2 + $0xf8] sm:$0xff] }
 0x11e   :  { %v388_v2 = vld [vmem:[#allocation2 + $0x8d0] sm:$0xff]  ;;  %1095 = vmatpush.msrb.mxu3 %v588_v62  ;;  %v201_v62 = vld [vmem:[#allocation2 + $0x2f8] sm:$0xff] }
 0x11f   :  { %v452_v3 = vld [vmem:[#allocation2 + $0xad0] sm:$0xff]  ;;  %1037 = vmatpush.msrb.mxu0 %v388_v2  ;;  %v265_v2 = vld [vmem:[#allocation2 + $0x4f8] sm:$0xff] }
 0x120   :  { %v516_v4 = vld [vmem:[#allocation2 + $0xcd0] sm:$0xff]  ;;  %1057 = vmatpush.msrb.mxu1 %v452_v3  ;;  %v333_v3 = vld [vmem:[#allocation2 + $0x718] sm:$0xff] }
 0x121   :  { %v584_v5 = vld [vmem:[#allocation2 + $0xef0] sm:$0xff]  ;;  %1077 = vmatpush.msrb.mxu2 %v516_v4  ;;  %v133_v4 = vld [vmem:[#allocation2 + $0xd8] sm:$0xff] }
 0x122   :  { %v384_v6 = vld [vmem:[#allocation2 + $0x8b0] sm:$0xff]  ;;  %1096 = vmatpush.msrb.mxu3 %v584_v5  ;;  %v197_v5 = vld [vmem:[#allocation2 + $0x2d8] sm:$0xff] }
 0x123   :  { %v448_v8 = vld [vmem:[#allocation2 + $0xab0] sm:$0xff]  ;;  %1038 = vmatpush.msrb.mxu0 %v384_v6  ;;  %v261_v6 = vld [vmem:[#allocation2 + $0x4d8] sm:$0xff] }
 0x124   :  { %v512_v9 = vld [vmem:[#allocation2 + $0xcb0] sm:$0xff]  ;;  %1058 = vmatpush.msrb.mxu1 %v448_v8  ;;  %v329_v8 = vld [vmem:[#allocation2 + $0x6f8] sm:$0xff] }
 0x125   :  { %v580_v10 = vld [vmem:[#allocation2 + $0xed0] sm:$0xff]  ;;  %1078 = vmatpush.msrb.mxu2 %v512_v9  ;;  %v129_v9 = vld [vmem:[#allocation2 + $0xb8] sm:$0xff] }
 0x126   :  { %v380_v11 = vld [vmem:[#allocation2 + $0x890] sm:$0xff]  ;;  %1097 = vmatpush.msrb.mxu3 %v580_v10  ;;  %v193_v10 = vld [vmem:[#allocation2 + $0x2b8] sm:$0xff] }
 0x127   :  { %v444_v12 = vld [vmem:[#allocation2 + $0xa90] sm:$0xff]  ;;  %1039 = vmatpush.msrb.mxu0 %v380_v11  ;;  %v257_v11 = vld [vmem:[#allocation2 + $0x4b8] sm:$0xff] }
 0x128   :  { %v508_v13 = vld [vmem:[#allocation2 + $0xc90] sm:$0xff]  ;;  %1059 = vmatpush.msrb.mxu1 %v444_v12  ;;  %v325_v12 = vld [vmem:[#allocation2 + $0x6d8] sm:$0xff] }
 0x129   :  { %v576_v14 = vld [vmem:[#allocation2 + $0xeb0] sm:$0xff]  ;;  %1079 = vmatpush.msrb.mxu2 %v508_v13  ;;  %v125_v13 = vld [vmem:[#allocation2 + $0x98] sm:$0xff] }
 0x12a   :  { %v376_v15 = vld [vmem:[#allocation2 + $0x870] sm:$0xff]  ;;  %1098 = vmatpush.msrb.mxu3 %v576_v14  ;;  %v189_v14 = vld [vmem:[#allocation2 + $0x298] sm:$0xff] }
 0x12b   :  { %v440_v16 = vld [vmem:[#allocation2 + $0xa70] sm:$0xff]  ;;  %1040 = vmatpush.msrb.mxu0 %v376_v15  ;;  %v253_v15 = vld [vmem:[#allocation2 + $0x498] sm:$0xff] }
 0x12c   :  { %v504_v17 = vld [vmem:[#allocation2 + $0xc70] sm:$0xff]  ;;  %1060 = vmatpush.msrb.mxu1 %v440_v16  ;;  %v321_v16 = vld [vmem:[#allocation2 + $0x6b8] sm:$0xff] }
 0x12d   :  { %v572_v18 = vld [vmem:[#allocation2 + $0xe90] sm:$0xff]  ;;  %1080 = vmatpush.msrb.mxu2 %v504_v17  ;;  %v121_v17 = vld [vmem:[#allocation2 + $0x78] sm:$0xff] }
 0x12e   :  { %v372_v20 = vld [vmem:[#allocation2 + $0x850] sm:$0xff]  ;;  %1099 = vmatpush.msrb.mxu3 %v572_v18  ;;  %v185_v18 = vld [vmem:[#allocation2 + $0x278] sm:$0xff] }
 0x12f   :  { %v436_v21 = vld [vmem:[#allocation2 + $0xa50] sm:$0xff]  ;;  %1041 = vmatpush.msrb.mxu0 %v372_v20  ;;  %v249_v20 = vld [vmem:[#allocation2 + $0x478] sm:$0xff] }
 0x130   :  { %v500_v22 = vld [vmem:[#allocation2 + $0xc50] sm:$0xff]  ;;  %1061 = vmatpush.msrb.mxu1 %v436_v21  ;;  %v317_v21 = vld [vmem:[#allocation2 + $0x698] sm:$0xff] }
 0x131   :  { %v568_v26 = vld [vmem:[#allocation2 + $0xe70] sm:$0xff]  ;;  %1081 = vmatpush.msrb.mxu2 %v500_v22  ;;  %v117_v22 = vld [vmem:[#allocation2 + $0x58] sm:$0xff] }
 0x132   :  { %v368_v27 = vld [vmem:[#allocation2 + $0x830] sm:$0xff]  ;;  %1100 = vmatpush.msrb.mxu3 %v568_v26  ;;  %v181_v26 = vld [vmem:[#allocation2 + $0x258] sm:$0xff] }
 0x133   :  { %v432_v1 = vld [vmem:[#allocation2 + $0xa30] sm:$0xff]  ;;  %1042 = vmatpush.msrb.mxu0 %v368_v27  ;;  %v245_v27 = vld [vmem:[#allocation2 + $0x458] sm:$0xff] }
 0x134   :  { %v496_v28 = vld [vmem:[#allocation2 + $0xc30] sm:$0xff]  ;;  %1062 = vmatpush.msrb.mxu1 %v432_v1  ;;  %v313_v1 = vld [vmem:[#allocation2 + $0x678] sm:$0xff] }
 0x135   :  { %v564_v29 = vld [vmem:[#allocation2 + $0xe50] sm:$0xff]  ;;  %1082 = vmatpush.msrb.mxu2 %v496_v28  ;;  %v113_v28 = vld [vmem:[#allocation2 + $0x38] sm:$0xff] }
 0x136   :  { %v364_v32 = vld [vmem:[#allocation2 + $0x810] sm:$0xff]  ;;  %1101 = vmatpush.msrb.mxu3 %v564_v29  ;;  %v177_v29 = vld [vmem:[#allocation2 + $0x238] sm:$0xff] }
 0x137   :  { %v428_v63 = vld [vmem:[#allocation2 + $0xa10] sm:$0xff]  ;;  %1043 = vmatpush.msrb.mxu0 %v364_v32  ;;  %v241_v32 = vld [vmem:[#allocation2 + $0x438] sm:$0xff] }
 0x138   :  { %v492_v7 = vld [vmem:[#allocation2 + $0xc10] sm:$0xff]  ;;  %1063 = vmatpush.msrb.mxu1 %v428_v63  ;;  %1044 = vmatmul.f32.vlgmr.msrb.gmra.mxu0 %v1734_v24  ;;  %v153_v24 = vld [vmem:[#allocation2 + $0x178] sm:$0xff] }
 0x139   :  { %v560_v33 = vld [vmem:[#allocation2 + $0xe30] sm:$0xff]  ;;  %1083 = vmatpush.msrb.mxu2 %v492_v7  ;;  %1108 = vmatpush.msra.mxu0 %v169_v0  ;;  %v309_v63 = vld [vmem:[#allocation2 + $0x658] sm:$0xff] }
 0x13a   :  { %1102 = vmatpush.msrb.mxu3 %v560_v33  ;;  %v556_v36 = vld [vmem:[#allocation2 + $0xe10] sm:$0xff]  ;;  %1084 = vmatmul.f32.vlgmr.msrb.gmra.mxu2 %v1729_v19  ;;  %v157_v19 = vld [vmem:[#allocation2 + $0x198] sm:$0xff] }
 0x13b   :  { %1128 = vmatpush.msra.mxu1 %v233_v34  ;;  %1148 = vmatpush.msra.mxu2 %v297_v35  ;;  %v109_v7 = vld [vmem:[#allocation2 + $0x18] sm:$0xff] }
 0x13c   :  { %1103 = vmatpush.msrb.mxu3 %v556_v36  ;;  %1109 = vmatpush.msra.mxu0 %v165_v37  ;;  %v173_v33 = vld [vmem:[#allocation2 + $0x218] sm:$0xff] }
 0x13d   :  { %1104 = vmatmul.f32.vlgmr.msrb.gmra.mxu3 %v1740_v25  ;;  %1129 = vmatpush.msra.mxu1 %v229_v38  ;;  %v217_v25 = vld [vmem:[#allocation2 + $0x378] sm:$0xff] }
 0x13e   :  { %1149 = vmatpush.msra.mxu2 %v293_v39  ;;  %1168 = vmatpush.msra.mxu3 %v361_v40  ;;  %v237_v0 = vld [vmem:[#allocation2 + $0x418] sm:$0xff] }
 0x13f   :  { %1064 = vmatmul.f32.vlgmr.msrb.gmra.mxu1 %v1746_v30  ;;  %1110 = vmatpush.msra.mxu0 %v161_v41  ;;  %v277_v30 = vld [vmem:[#allocation2 + $0x558] sm:$0xff] }
 0x140   :  { %1130 = vmatpush.msra.mxu1 %v225_v42  ;;  %1150 = vmatpush.msra.mxu2 %v289_v43  ;;  %v305_v34 = vld [vmem:[#allocation2 + $0x638] sm:$0xff] }
 0x141   :  { %1169 = vmatpush.msra.mxu3 %v357_v44  ;;  %1111 = vmatpush.msra.mxu0 %v157_v19  ;;  %v425_v35 = vld [vmem:[#allocation2 + $0x9f8] sm:$0xff] }
 0x142   :  { %1131 = vmatpush.msra.mxu1 %v221_v45  ;;  %1151 = vmatpush.msra.mxu2 %v285_v46  ;;  %v489_v36 = vld [vmem:[#allocation2 + $0xbf8] sm:$0xff] }
 0x143   :  { %1170 = vmatpush.msra.mxu3 %v353_v47  ;;  %1112 = vmatpush.msra.mxu0 %v153_v24  ;;  %v553_v37 = vld [vmem:[#allocation2 + $0xdf8] sm:$0xff] }
 0x144   :  { %1132 = vmatpush.msra.mxu1 %v217_v25  ;;  %1152 = vmatpush.msra.mxu2 %v281_v48  ;;  %v301_v38 = vld [vmem:[#allocation2 + $0x618] sm:$0xff] }
 0x145   :  { %1171 = vmatpush.msra.mxu3 %v349_v49  ;;  %1113 = vmatpush.msra.mxu0 %v149_v50  ;;  %v421_v39 = vld [vmem:[#allocation2 + $0x9d8] sm:$0xff] }
 0x146   :  { %1133 = vmatpush.msra.mxu1 %v213_v51  ;;  %1153 = vmatpush.msra.mxu2 %v277_v30  ;;  %v485_v40 = vld [vmem:[#allocation2 + $0xbd8] sm:$0xff] }
 0x147   :  { %1172 = vmatpush.msra.mxu3 %v345_v52  ;;  %1114 = vmatpush.msra.mxu0 %v145_v53  ;;  %v549_v41 = vld [vmem:[#allocation2 + $0xdd8] sm:$0xff] }
 0x148   :  { %1134 = vmatpush.msra.mxu1 %v209_v54  ;;  %1154 = vmatpush.msra.mxu2 %v273_v55  ;;  %v617_v42 = vld [vmem:[#allocation2 + $0xff8] sm:$0xff] }
 0x149   :  { %1173 = vmatpush.msra.mxu3 %v341_v56  ;;  %1115 = vmatpush.msra.mxu0 %v141_v57  ;;  %v417_v43 = vld [vmem:[#allocation2 + $0x9b8] sm:$0xff] }
 0x14a   :  { %1135 = vmatpush.msra.mxu1 %v205_v58  ;;  %1155 = vmatpush.msra.mxu2 %v269_v59  ;;  %v481_v44 = vld [vmem:[#allocation2 + $0xbb8] sm:$0xff]  ;;  %v1776_v59 = vpop.f32.mrf.mxu0 }
 0x14b   :  { %1174 = vmatpush.msra.mxu3 %v337_v60  ;;  %1116 = vmatpush.msra.mxu0 %v137_v61  ;;  %v545_v19 = vld [vmem:[#allocation2 + $0xdb8] sm:$0xff] }
 0x14c   :  { %1136 = vmatpush.msra.mxu1 %v201_v62  ;;  %1156 = vmatpush.msra.mxu2 %v265_v2  ;;  %v613_v45 = vld [vmem:[#allocation2 + $0xfd8] sm:$0xff] }
 0x14d   :  { %1175 = vmatpush.msra.mxu3 %v333_v3  ;;  %1117 = vmatpush.msra.mxu0 %v133_v4  ;;  %v413_v46 = vld [vmem:[#allocation2 + $0x998] sm:$0xff] }
 0x14e   :  { %1137 = vmatpush.msra.mxu1 %v197_v5  ;;  %1157 = vmatpush.msra.mxu2 %v261_v6  ;;  %v477_v47 = vld [vmem:[#allocation2 + $0xb98] sm:$0xff] }
 0x14f   :  { %1176 = vmatpush.msra.mxu3 %v329_v8  ;;  %1118 = vmatpush.msra.mxu0 %v129_v9  ;;  %v541_v24 = vld [vmem:[#allocation2 + $0xd98] sm:$0xff]  ;;  %v1778_v8 = vpop.f32.mrf.mxu1 }
 0x150   :  { %1138 = vmatpush.msra.mxu1 %v193_v10  ;;  %1158 = vmatpush.msra.mxu2 %v257_v11  ;;  %v609_v25 = vld [vmem:[#allocation2 + $0xfb8] sm:$0xff] }
 0x151   :  { %1177 = vmatpush.msra.mxu3 %v325_v12  ;;  %1119 = vmatpush.msra.mxu0 %v125_v13  ;;  %v409_v48 = vld [vmem:[#allocation2 + $0x978] sm:$0xff] }
 0x152   :  { %1139 = vmatpush.msra.mxu1 %v189_v14  ;;  %1159 = vmatpush.msra.mxu2 %v253_v15  ;;  %v473_v49 = vld [vmem:[#allocation2 + $0xb78] sm:$0xff] }
 0x153   :  { %1178 = vmatpush.msra.mxu3 %v321_v16  ;;  %1120 = vmatpush.msra.mxu0 %v121_v17  ;;  %v537_v50 = vld [vmem:[#allocation2 + $0xd78] sm:$0xff]  ;;  %v1780_v17 = vpop.f32.mrf.mxu2 }
 0x154   :  { %1140 = vmatpush.msra.mxu1 %v185_v18  ;;  %1160 = vmatpush.msra.mxu2 %v249_v20  ;;  %v605_v51 = vld [vmem:[#allocation2 + $0xf98] sm:$0xff] }
 0x155   :  { %1179 = vmatpush.msra.mxu3 %v317_v21  ;;  %1121 = vmatpush.msra.mxu0 %v117_v22  ;;  %v405_v30 = vld [vmem:[#allocation2 + $0x958] sm:$0xff] }
 0x156   :  { %1141 = vmatpush.msra.mxu1 %v181_v26  ;;  %1161 = vmatpush.msra.mxu2 %v245_v27  ;;  %v469_v52 = vld [vmem:[#allocation2 + $0xb58] sm:$0xff]  ;;  %v1782_v26 = vpop.f32.mrf.mxu0 }
 0x157   :  { %1180 = vmatpush.msra.mxu3 %v313_v1  ;;  %1122 = vmatpush.msra.mxu0 %v113_v28  ;;  %v533_v53 = vld [vmem:[#allocation2 + $0xd58] sm:$0xff] }
 0x158   :  { %1142 = vmatpush.msra.mxu1 %v177_v29  ;;  %1162 = vmatpush.msra.mxu2 %v241_v32  ;;  %v601_v54 = vld [vmem:[#allocation2 + $0xf78] sm:$0xff]  ;;  %v1784_v29 = vpop.f32.mrf.mxu3 }
 0x159   :  { %1181 = vmatpush.msra.mxu3 %v309_v63  ;;  %1123 = vmatpush.msra.mxu0 %v109_v7  ;;  %v401_v55 = vld [vmem:[#allocation2 + $0x938] sm:$0xff]  ;;  %v1506_v63 = vld [vmem:[%s1877_s0 + $0x10] sm:$0xff] }
 0x15a   :  { %1143 = vmatpush.msra.mxu1 %v173_v33  ;;  %1163 = vmatpush.msra.mxu2 %v237_v0  ;;  %v465_v56 = vld [vmem:[#allocation2 + $0xb38] sm:$0xff]  ;;  %v1789_v33 = vld [vmem:[#allocation4] sm:$0xf]  ;;  %v1791_v0 = vpop.f32.mrf.mxu1 }
 0x15b   :  { %1182 = vmatpush.msra.mxu3 %v305_v34  ;;  %1188 = vmatpush.msrb.mxu0 %v425_v35  ;;  %v529_v57 = vld [vmem:[#allocation2 + $0xd38] sm:$0xff] }
 0x15c   :  { %1208 = vmatpush.msrb.mxu1 %v489_v36  ;;  %1228 = vmatpush.msrb.mxu2 %v553_v37  ;;  %v597_v58 = vld [vmem:[#allocation2 + $0xf58] sm:$0xff] }
 0x15d   :  { %1183 = vmatpush.msra.mxu3 %v301_v38  ;;  %1189 = vmatpush.msrb.mxu0 %v421_v39  ;;  %v397_v60 = vld [vmem:[#allocation2 + $0x918] sm:$0xff] }
 0x15e   :  { %1209 = vmatpush.msrb.mxu1 %v485_v40  ;;  %1229 = vmatpush.msrb.mxu2 %v549_v41  ;;  %v461_v61 = vld [vmem:[#allocation2 + $0xb18] sm:$0xff]  ;;  %v620_v40 = vperm.slane %v1789_v33, 0 }
 0x15f   :  { %1248 = vmatpush.msrb.mxu3 %v617_v42  ;;  %1190 = vmatpush.msrb.mxu0 %v417_v43  ;;  %v525_v62 = vld [vmem:[#allocation2 + $0xd18] sm:$0xff]  ;;  %v621_v43 = vperm.slane %v1789_v33, 1 }
 0x160   :  { %1210 = vmatpush.msrb.mxu1 %v481_v44  ;;  %1230 = vmatpush.msrb.mxu2 %v545_v19  ;;  %v593_v2 = vld [vmem:[#allocation2 + $0xf38] sm:$0xff]  ;;  %v1799_v44 = vpop.f32.mrf.mxu2 }
 0x161   :  { %1249 = vmatpush.msrb.mxu3 %v613_v45  ;;  %1191 = vmatpush.msrb.mxu0 %v413_v46  ;;  %v393_v3 = vld [vmem:[#allocation2 + $0x8f8] sm:$0xff]  ;;  %v805_v45 = vpop.f32.mrf.mxu0 }
 0x162   :  { %1211 = vmatpush.msrb.mxu1 %v477_v47  ;;  %1231 = vmatpush.msrb.mxu2 %v541_v24  ;;  %v457_v4 = vld [vmem:[#allocation2 + $0xaf8] sm:$0xff] }
 0x163   :  { %1250 = vmatpush.msrb.mxu3 %v609_v25  ;;  %1192 = vmatpush.msrb.mxu0 %v409_v48  ;;  %v521_v5 = vld [vmem:[#allocation2 + $0xcf8] sm:$0xff]  ;;  %v646_v25 = vadd.f32 %v1776_v59, %v620_v40  ;;  %v1301_v59 = vld [vmem:[#allocation6 + $0xe8] sm:$0xff] }
 0x164   :  { %1212 = vmatpush.msrb.mxu1 %v473_v49  ;;  %1232 = vmatpush.msrb.mxu2 %v537_v50  ;;  %v589_v6 = vld [vmem:[#allocation2 + $0xf18] sm:$0xff]  ;;  %v806_v50 = vadd.f32 %v805_v45, %v621_v43  ;;  %v1313_v40 = vld [vmem:[#allocation6 + $0x148] sm:$0xff]  ;;  %v1312_v43 = vld [vmem:[#allocation6 + $0x140] sm:$0xff] }
 0x165   :  { %1251 = vmatpush.msrb.mxu3 %v605_v51  ;;  %1193 = vmatpush.msrb.mxu0 %v405_v30  ;;  %v389_v9 = vld [vmem:[#allocation2 + $0x8d8] sm:$0xff]  ;;  %v1803_v51 = vpop.f32.mrf.mxu3  ;;  %v1508_v30 = vld [vmem:[%s1877_s0 + $0x30] sm:$0xff] }
 0x166   :  { %1213 = vmatpush.msrb.mxu1 %v469_v52  ;;  %1233 = vmatpush.msrb.mxu2 %v533_v53  ;;  %v453_v10 = vld [vmem:[#allocation2 + $0xad8] sm:$0xff] }
 0x167   :  { %1252 = vmatpush.msrb.mxu3 %v601_v54  ;;  %1194 = vmatpush.msrb.mxu0 %v401_v55  ;;  %v517_v11 = vld [vmem:[#allocation2 + $0xcd8] sm:$0xff]  ;;  %v666_v55 = vadd.f32 %v1778_v8, %v646_v25 }
 0x168   :  { %1214 = vmatpush.msrb.mxu1 %v465_v56  ;;  %1234 = vmatpush.msrb.mxu2 %v529_v57  ;;  %v585_v12 = vld [vmem:[#allocation2 + $0xef8] sm:$0xff]  ;;  %v1509_v56 = vld [vmem:[%s1877_s0 + $0x20] sm:$0xff] }
 0x169   :  { %1253 = vmatpush.msrb.mxu3 %v597_v58  ;;  %1195 = vmatpush.msrb.mxu0 %v397_v60  ;;  %v385_v13 = vld [vmem:[#allocation2 + $0x8b8] sm:$0xff]  ;;  %v1285_v58 = vld [vmem:[#allocation6 + $0x68] sm:$0xff] }
 0x16a   :  { %1215 = vmatpush.msrb.mxu1 %v461_v61  ;;  %1235 = vmatpush.msrb.mxu2 %v525_v62  ;;  %v449_v14 = vld [vmem:[#allocation2 + $0xab8] sm:$0xff]  ;;  %v845_v61 = vpop.f32.mrf.mxu2 }
 0x16b   :  { %1254 = vmatpush.msrb.mxu3 %v593_v2  ;;  %1196 = vmatpush.msrb.mxu0 %v393_v3  ;;  %v513_v15 = vld [vmem:[#allocation2 + $0xcb8] sm:$0xff]  ;;  %v1511_v2 = vld [vmem:[%s1877_s0 + $0x28] sm:$0xff] }
 0x16c   :  { %1216 = vmatpush.msrb.mxu1 %v457_v4  ;;  %1236 = vmatpush.msrb.mxu2 %v521_v5  ;;  %v581_v16 = vld [vmem:[#allocation2 + $0xed8] sm:$0xff]  ;;  %v1284_v3 = vld [vmem:[#allocation6 + $0x60] sm:$0xff]  ;;  %v1317_v5 = vld [vmem:[#allocation6 + $0x168] sm:$0xff] }
 0x16d   :  { %1255 = vmatpush.msrb.mxu3 %v589_v6  ;;  %1197 = vmatpush.msrb.mxu0 %v389_v9  ;;  %v381_v18 = vld [vmem:[#allocation2 + $0x898] sm:$0xff]  ;;  %v1300_v4 = vld [vmem:[#allocation6 + $0xe0] sm:$0xff]  ;;  %v686_v6 = vadd.f32 %v1780_v17, %v666_v55  ;;  %v885_v17 = vpop.f32.mrf.mxu0 }
 0x16e   :  { %1217 = vmatpush.msrb.mxu1 %v453_v10  ;;  %1237 = vmatpush.msrb.mxu2 %v517_v11  ;;  %v445_v20 = vld [vmem:[#allocation2 + $0xa98] sm:$0xff]  ;;  %v865_v11 = vpop.f32.mrf.mxu3 }
 0x16f   :  { %1256 = vmatpush.msrb.mxu3 %v585_v12  ;;  %1198 = vmatpush.msrb.mxu0 %v385_v13  ;;  %v509_v21 = vld [vmem:[#allocation2 + $0xc98] sm:$0xff]  ;;  %v1316_v12 = vld [vmem:[#allocation6 + $0x160] sm:$0xff] }
 0x170   :  { %1218 = vmatpush.msrb.mxu1 %v449_v14  ;;  %v577_v22 = vld [vmem:[#allocation2 + $0xeb8] sm:$0xff]  ;;  %1238 = vmatpush.msrb.mxu2 %v513_v15 }
 0x171   :  { %1257 = vmatpush.msrb.mxu3 %v581_v16  ;;  %v377_v27 = vld [vmem:[#allocation2 + $0x878] sm:$0xff]  ;;  %1199 = vmatpush.msrb.mxu0 %v381_v18  ;;  %v706_v16 = vadd.f32 %v1784_v29, %v686_v6 }
 0x172   :  { %1219 = vmatpush.msrb.mxu1 %v445_v20  ;;  %v441_v1 = vld [vmem:[#allocation2 + $0xa78] sm:$0xff]  ;;  %1239 = vmatpush.msrb.mxu2 %v509_v21  ;;  %v1281_v20 = vld [vmem:[#allocation6 + $0x48] sm:$0xff] }
 0x173   :  { %v505_v28 = vld [vmem:[#allocation2 + $0xc78] sm:$0xff]  ;;  %1258 = vmatpush.msrb.mxu3 %v577_v22  ;;  %1164 = vmatmul.f32.vlgmr.msra.gmra.mxu2 %v1506_v63  ;;  %v1297_v21 = vld [vmem:[#allocation6 + $0xc8] sm:$0xff] }
 0x174   :  { %v573_v32 = vld [vmem:[#allocation2 + $0xe98] sm:$0xff]  ;;  %1200 = vmatpush.msrb.mxu0 %v377_v27  ;;  %1220 = vmatpush.msrb.mxu1 %v441_v1  ;;  %v1280_v27 = vld [vmem:[#allocation6 + $0x40] sm:$0xff] }
 0x175   :  { %v373_v7 = vld [vmem:[#allocation2 + $0x858] sm:$0xff]  ;;  %1240 = vmatpush.msrb.mxu2 %v505_v28  ;;  %1259 = vmatpush.msrb.mxu3 %v573_v32  ;;  %v1296_v1 = vld [vmem:[#allocation6 + $0xc0] sm:$0xff]  ;;  %v726_v28 = vadd.f32 %v1782_v26, %v706_v16 }
 0x176   :  { %v437_v34 = vld [vmem:[#allocation2 + $0xa58] sm:$0xff]  ;;  %1124 = vmatmul.f32.vlgmr.msra.gmra.mxu0 %v1762_v23  ;;  %1144 = vmatmul.f32.vlgmr.msra.gmra.mxu1 %v1769_v31  ;;  %v825_v31 = vpop.f32.mrf.mxu1  ;;  %v1276_v26 = vld [vmem:[#allocation6 + $0x20] sm:$0xff] }
 0x177   :  { %v501_v35 = vld [vmem:[#allocation2 + $0xc58] sm:$0xff]  ;;  %1201 = vmatpush.msrb.mxu0 %v373_v7  ;;  %1221 = vmatpush.msrb.mxu1 %v437_v34  ;;  %v826_v60 = vadd.f32 %v825_v31, %v806_v50  ;;  %v1273_v31 = vld [vmem:[#allocation6 + $0x8] sm:$0xff] }
 0x178   :  { %v569_v36 = vld [vmem:[#allocation2 + $0xe78] sm:$0xff]  ;;  %1241 = vmatpush.msrb.mxu2 %v501_v35 }
 0x179   :  { %v1507_v37 = vld [vmem:[%s1877_s0 + $0x18] sm:$0xff]  ;;  %1260 = vmatpush.msrb.mxu3 %v569_v36  ;;  %v846_v8 = vadd.f32 %v845_v61, %v826_v60  ;;  %v746_v36 = vadd.f32 %v1791_v0, %v726_v28  ;;  %v945_v0 = vpop.f32.mrf.mxu3  ;;  %v1329_v28 = vld [vmem:[#allocation6 + $0x1c8] sm:$0xff] }
 0x17a   :  { %1184 = vmatmul.f32.vlgmr.msra.gmra.mxu3 %v1507_v37  ;;  %v369_v38 = vld [vmem:[#allocation2 + $0x838] sm:$0xff] }
 0x17b   :  { %v433_v39 = vld [vmem:[#allocation2 + $0xa38] sm:$0xff]  ;;  %1202 = vmatpush.msrb.mxu0 %v369_v38  ;;  %v866_v18 = vadd.f32 %v865_v11, %v846_v8  ;;  %v1277_v38 = vld [vmem:[#allocation6 + $0x28] sm:$0xff] }
 0x17c   :  { %v497_v41 = vld [vmem:[#allocation2 + $0xc38] sm:$0xff]  ;;  %1222 = vmatpush.msrb.mxu1 %v433_v39  ;;  %v1293_v39 = vld [vmem:[#allocation6 + $0xa8] sm:$0xff] }
 0x17d   :  { %v565_v42 = vld [vmem:[#allocation2 + $0xe58] sm:$0xff]  ;;  %1242 = vmatpush.msrb.mxu2 %v497_v41  ;;  %v886_v32 = vadd.f32 %v885_v17, %v866_v18  ;;  %v925_v41 = vpop.f32.mrf.mxu2 }
 0x17e   :  { %v365_v23 = vld [vmem:[#allocation2 + $0x818] sm:$0xff]  ;;  %1261 = vmatpush.msrb.mxu3 %v565_v42  ;;  %v905_v29 = vpop.f32.mrf.mxu1  ;;  %v1292_v42 = vld [vmem:[#allocation6 + $0xa0] sm:$0xff] }
 0x17f   :  { %v429_v19 = vld [vmem:[#allocation2 + $0xa18] sm:$0xff]  ;;  %1203 = vmatpush.msrb.mxu0 %v365_v23  ;;  %v906_v37 = vadd.f32 %v905_v29, %v886_v32  ;;  %v766_v23 = vadd.f32 %v1799_v44, %v746_v36  ;;  %v1272_v44 = vld [vmem:[#allocation6] sm:$0xff]  ;;  %v1325_v29 = vld [vmem:[#allocation6 + $0x1a8] sm:$0xff] }
 0x180   :  { %v493_v46 = vld [vmem:[#allocation2 + $0xc18] sm:$0xff]  ;;  %1223 = vmatpush.msrb.mxu1 %v429_v19  ;;  %1204 = vmatmul.f32.vlgmr.msrb.gmra.mxu0 %v1509_v56  ;;  %v1308_v56 = vld [vmem:[#allocation6 + $0x120] sm:$0xff] }
 0x181   :  { %v561_v47 = vld [vmem:[#allocation2 + $0xe38] sm:$0xff]  ;;  %1243 = vmatpush.msrb.mxu2 %v493_v46  ;;  %1224 = vmatmul.f32.vlgmr.msrb.gmra.mxu1 %v1511_v2  ;;  %v926_v19 = vadd.f32 %v925_v41, %v906_v37  ;;  %v1332_v2 = vld [vmem:[#allocation6 + $0x1e0] sm:$0xff]  ;;  %v1321_v37 = vld [vmem:[#allocation6 + $0x188] sm:$0xff] }
 0x182   :  { %v1287_v24 = vld [vmem:[#allocation6 + $0x78] sm:$0xff]  ;;  %1262 = vmatpush.msrb.mxu3 %v561_v47  ;;  %1244 = vmatmul.f32.vlgmr.msrb.gmra.mxu2 %v1508_v30  ;;  %v1286_v52 = vld [vmem:[#allocation6 + $0x70] sm:$0xff]  ;;  %v1289_v30 = vld [vmem:[#allocation6 + $0x88] sm:$0xff]  ;;  %v965_v6 = vpop.f32.mrf.mxu0 }
 0x183   :  { %v1303_v48 = vld [vmem:[#allocation6 + $0xf8] sm:$0xff]  ;;  %1340 = vmatpush.msra.mxu0 %v1287_v24  ;;  %v1302_v53 = vld [vmem:[#allocation6 + $0xf0] sm:$0xff]  ;;  %v946_v50 = vadd.f32 %v945_v0, %v926_v19  ;;  %v1328_v32 = vld [vmem:[#allocation6 + $0x1c0] sm:$0xff] }
 0x184   :  { %v557_v49 = vld [vmem:[#allocation2 + $0xe18] sm:$0xff]  ;;  %1360 = vmatpush.msra.mxu1 %v1303_v48 }
 0x185   :  { %1263 = vmatpush.msrb.mxu3 %v557_v49  ;;  %v1319_v54 = vld [vmem:[#allocation6 + $0x178] sm:$0xff]  ;;  %1341 = vmatpush.msra.mxu0 %v1286_v52  ;;  %v1318_v62 = vld [vmem:[#allocation6 + $0x170] sm:$0xff]  ;;  %v786_v49 = vadd.f32 %v1803_v51, %v766_v23  ;;  %v1288_v52 = vld [vmem:[#allocation6 + $0x80] sm:$0xff]  ;;  %v1269_v55 = vmax.f32 %v946_v50, 0.0 }
 0x186   :  { %v1510_v57 = vld [vmem:[%s1877_s0 + $0x38] sm:$0xff]  ;;  %1361 = vmatpush.msra.mxu1 %v1302_v53  ;;  %1380 = vmatpush.msra.mxu2 %v1319_v54  ;;  %v1309_v53 = vld [vmem:[#allocation6 + $0x128] sm:$0xff] }
 0x187   :  { %1264 = vmatmul.f32.vlgmr.msrb.gmra.mxu3 %v1510_v57  ;;  %1342 = vmatpush.msra.mxu0 %v1285_v58  ;;  %v1283_v9 = vld [vmem:[#allocation6 + $0x58] sm:$0xff]  ;;  %v1282_v13 = vld [vmem:[#allocation6 + $0x50] sm:$0xff]  ;;  %v1268_v54 = vmax.f32 %v786_v49, 0.0  ;;  %v1305_v58 = vld [vmem:[#allocation6 + $0x108] sm:$0xff]  ;;  %v1005_v11 = vpop.f32.mrf.mxu2 }
 0x188   :  { %1362 = vmatpush.msra.mxu1 %v1301_v59  ;;  %v1299_v10 = vld [vmem:[#allocation6 + $0xd8] sm:$0xff]  ;;  %1381 = vmatpush.msra.mxu2 %v1318_v62  ;;  %v1298_v14 = vld [vmem:[#allocation6 + $0xd0] sm:$0xff]  ;;  %v1304_v59 = vld [vmem:[#allocation6 + $0x100] sm:$0xff] }
 0x189   :  { %1343 = vmatpush.msra.mxu0 %v1284_v3  ;;  %v1315_v15 = vld [vmem:[#allocation6 + $0x158] sm:$0xff]  ;;  %v1314_v22 = vld [vmem:[#allocation6 + $0x150] sm:$0xff]  ;;  %v1333_v62 = vld [vmem:[#allocation6 + $0x1e8] sm:$0xff] }
 0x18a   :  { %1363 = vmatpush.msra.mxu1 %v1300_v4  ;;  %1382 = vmatpush.msra.mxu2 %v1317_v5  ;;  %v1279_v63 = vld [vmem:[#allocation6 + $0x38] sm:$0xff]  ;;  %v1278_v34 = vld [vmem:[#allocation6 + $0x30] sm:$0xff]  ;;  %v622_v4 = vperm.slane %v1789_v33, 2 }
 0x18b   :  { %1344 = vmatpush.msra.mxu0 %v1283_v9  ;;  %v1295_v7 = vld [vmem:[#allocation6 + $0xb8] sm:$0xff]  ;;  %v1294_v35 = vld [vmem:[#allocation6 + $0xb0] sm:$0xff]  ;;  %v985_v9 = vpop.f32.mrf.mxu1 }
 0x18c   :  { %1364 = vmatpush.msra.mxu1 %v1299_v10  ;;  %1383 = vmatpush.msra.mxu2 %v1316_v12  ;;  %v1275_v45 = vld [vmem:[#allocation6 + $0x18] sm:$0xff]  ;;  %v1274_v24 = vld [vmem:[#allocation6 + $0x10] sm:$0xff]  ;;  %v966_v8 = vadd.f32 %v965_v6, %v622_v4  ;;  %v1440_v4 = vld [vmem:[%s1882_s5 + $0x8] sm:$0xff] }
 0x18d   :  { %1345 = vmatpush.msra.mxu0 %v1282_v13  ;;  %v1291_v46 = vld [vmem:[#allocation6 + $0x98] sm:$0xff]  ;;  %v1290_v25 = vld [vmem:[#allocation6 + $0x90] sm:$0xff]  ;;  %v1025_v13 = vpop.f32.mrf.mxu3 }
 0x18e   :  { %1365 = vmatpush.msra.mxu1 %v1298_v14  ;;  %1384 = vmatpush.msra.mxu2 %v1315_v15  ;;  %v1311_v47 = vld [vmem:[#allocation6 + $0x138] sm:$0xff]  ;;  %v1310_v48 = vld [vmem:[#allocation6 + $0x130] sm:$0xff]  ;;  %v986_v10 = vadd.f32 %v985_v9, %v966_v8 }
 0x18f   :  { %1346 = vmatpush.msra.mxu0 %v1281_v20  ;;  %v1307_v51 = vld [vmem:[#allocation6 + $0x118] sm:$0xff]  ;;  %v1306_v57 = vld [vmem:[#allocation6 + $0x110] sm:$0xff] }
 0x190   :  { %1366 = vmatpush.msra.mxu1 %v1297_v21  ;;  %1385 = vmatpush.msra.mxu2 %v1314_v22  ;;  %v1335_v60 = vld [vmem:[#allocation6 + $0x1f8] sm:$0xff]  ;;  %v1334_v61 = vld [vmem:[#allocation6 + $0x1f0] sm:$0xff]  ;;  %v1006_v12 = vadd.f32 %v1005_v11, %v986_v10 }
 0x191   :  { %1347 = vmatpush.msra.mxu0 %v1280_v27  ;;  %1400 = vmatpush.msra.mxu3 %v1335_v60  ;;  %v1331_v3 = vld [vmem:[#allocation6 + $0x1d8] sm:$0xff]  ;;  %v1330_v5 = vld [vmem:[#allocation6 + $0x1d0] sm:$0xff]  ;;  %v1498_v60 = vld [vmem:[#allocation7] ss:$0 sm:$0xff] }
 0x192   :  { %1367 = vmatpush.msra.mxu1 %v1296_v1  ;;  %1386 = vmatpush.msra.mxu2 %v1313_v40  ;;  %v1026_v14 = vadd.f32 %v1025_v13, %v1006_v12  ;;  %v1322_v36 = vld [vmem:[#allocation6 + $0x190] sm:$0xff]  ;;  %v1439_v8 = vld [vmem:[%s1882_s5] sm:$0xff] }
 0x193   :  { %1348 = vmatpush.msra.mxu0 %v1279_v63  ;;  %1401 = vmatpush.msra.mxu3 %v1334_v61  ;;  %v1327_v63 = vld [vmem:[#allocation6 + $0x1b8] sm:$0xff] }
 0x194   :  { %1368 = vmatpush.msra.mxu1 %v1295_v7  ;;  %1387 = vmatpush.msra.mxu2 %v1312_v43  ;;  %v1326_v7 = vld [vmem:[#allocation6 + $0x1b0] sm:$0xff] }
 0x195   :  { %1349 = vmatpush.msra.mxu0 %v1278_v34  ;;  %1402 = vmatpush.msra.mxu3 %v1333_v62  ;;  %v1324_v34 = vld [vmem:[#allocation6 + $0x1a0] sm:$0xff]  ;;  %v1442_v62 = vld [vmem:[%s1882_s5 + $0x18] sm:$0xff] }
 0x196   :  { %1369 = vmatpush.msra.mxu1 %v1294_v35  ;;  %1388 = vmatpush.msra.mxu2 %v1311_v47  ;;  %v1323_v35 = vld [vmem:[#allocation6 + $0x198] sm:$0xff] }
 0x197   :  { %1350 = vmatpush.msra.mxu0 %v1277_v38  ;;  %1403 = vmatpush.msra.mxu3 %v1332_v2  ;;  %v1320_v38 = vld [vmem:[#allocation6 + $0x180] sm:$0xff]  ;;  %v1441_v2 = vld [vmem:[%s1882_s5 + $0x10] sm:$0xff] }
 0x198   :  { %1370 = vmatpush.msra.mxu1 %v1293_v39  ;;  %1389 = vmatpush.msra.mxu2 %v1310_v48  ;;  %v623_v39 = vperm.slane %v1789_v33, 3  ;;  %v1454_v33 = vld [vmem:[%s1882_s5 + $0x78] sm:$0xff] }
 0x199   :  { %1351 = vmatpush.msra.mxu0 %v1276_v26  ;;  %1404 = vmatpush.msra.mxu3 %v1331_v3 }
 0x19a   :  { %1371 = vmatpush.msra.mxu1 %v1292_v42  ;;  %1390 = vmatpush.msra.mxu2 %v1309_v53  ;;  %v1450_v53 = vld [vmem:[%s1882_s5 + $0x58] sm:$0xff] }
 0x19b   :  { %1352 = vmatpush.msra.mxu0 %v1275_v45  ;;  %1405 = vmatpush.msra.mxu3 %v1330_v5 }
 0x19c   :  { %1372 = vmatpush.msra.mxu1 %v1291_v46  ;;  %1391 = vmatpush.msra.mxu2 %v1308_v56  ;;  %v1447_v56 = vld [vmem:[%s1882_s5 + $0x40] sm:$0xff] }
 0x19d   :  { %1353 = vmatpush.msra.mxu0 %v1274_v24  ;;  %1406 = vmatpush.msra.mxu3 %v1329_v28 }
 0x19e   :  { %1373 = vmatpush.msra.mxu1 %v1290_v25  ;;  %1392 = vmatpush.msra.mxu2 %v1307_v51  ;;  %v1446_v51 = vld [vmem:[%s1882_s5 + $0x38] sm:$0xff] }
 0x19f   :  { %1354 = vmatpush.msra.mxu0 %v1273_v31  ;;  %1407 = vmatpush.msra.mxu3 %v1328_v32 }
 0x1a0   :  { %1374 = vmatpush.msra.mxu1 %v1289_v30  ;;  %1393 = vmatpush.msra.mxu2 %v1306_v57  ;;  %v1453_v30 = vld [vmem:[%s1882_s5 + $0x70] sm:$0xff] }
 0x1a1   :  { %1355 = vmatpush.msra.mxu0 %v1272_v44  ;;  %1408 = vmatpush.msra.mxu3 %v1327_v63  ;;  %v1452_v44 = vld [vmem:[%s1882_s5 + $0x68] sm:$0xff]  ;;  %v1445_v57 = vld [vmem:[%s1882_s5 + $0x30] sm:$0xff]  ;;  %v1499_v63 = vld [vmem:[#allocation9] ss:$0 sm:$0xff] }
 0x1a2   :  { %1375 = vmatpush.msra.mxu1 %v1288_v52  ;;  %1356 = vmatmul.f32.vlgmr.msra.gmra.mxu0 %v1268_v54  ;;  %v1451_v52 = vld [vmem:[%s1882_s5 + $0x60] sm:$0xff]  ;;  %v1449_v54 = vld [vmem:[%s1882_s5 + $0x50] sm:$0xff] }
 0x1a3   :  { %1376 = vmatmul.f32.vlgmr.msra.gmra.mxu1 %v1269_v55  ;;  %1394 = vmatpush.msra.mxu2 %v1305_v58  ;;  %v1448_v55 = vld [vmem:[%s1882_s5 + $0x48] sm:$0xff] }
 0x1a4   :  { %1409 = vmatpush.msra.mxu3 %v1326_v7  ;;  %1459 = vmatpush.msrb.mxu0 %v1454_v33  ;;  %v1444_v58 = vld [vmem:[%s1882_s5 + $0x28] sm:$0xff] }
 0x1a5   :  { %1395 = vmatpush.msra.mxu2 %v1304_v59  ;;  %v1443_v59 = vld [vmem:[%s1882_s5 + $0x20] sm:$0xff] }
 0x1a6   :  { %1410 = vmatpush.msra.mxu3 %v1325_v29  ;;  %1460 = vmatpush.msrb.mxu0 %v1453_v30 }
 0x1a8   :  { %1411 = vmatpush.msra.mxu3 %v1324_v34  ;;  %1461 = vmatpush.msrb.mxu0 %v1452_v44 }
 0x1aa   :  { %1412 = vmatpush.msra.mxu3 %v1323_v35  ;;  %1462 = vmatpush.msrb.mxu0 %v1451_v52 }
 0x1ac   :  { %1413 = vmatpush.msra.mxu3 %v1322_v36  ;;  %1463 = vmatpush.msrb.mxu0 %v1450_v53 }
 0x1ae   :  { %1414 = vmatpush.msra.mxu3 %v1321_v37  ;;  %1464 = vmatpush.msrb.mxu0 %v1449_v54 }
 0x1b0   :  { %1415 = vmatpush.msra.mxu3 %v1320_v38  ;;  %1465 = vmatpush.msrb.mxu0 %v1448_v55 }
 0x1b2   :  { %1466 = vmatpush.msrb.mxu0 %v1447_v56 }
 0x1b4   :  { %1467 = vmatpush.msrb.mxu0 %v1446_v51 }
 0x1b5   :  { %v1045_v15 = vpop.f32.mrf.mxu0 }
 0x1b6   :  { %v1046_v16 = vadd.f32 %v1045_v15, %v1026_v14  ;;  %1468 = vmatpush.msrb.mxu0 %v1445_v57 }
 0x1b8   :  { %1469 = vmatpush.msrb.mxu0 %v1444_v58 }
 0x1ba   :  { %1470 = vmatpush.msrb.mxu0 %v1443_v59 }
 0x1bc   :  { %v1065_v18 = vpop.f32.mrf.mxu1  ;;  %1471 = vmatpush.msrb.mxu0 %v1442_v62 }
 0x1bd   :  { %v1066_v20 = vadd.f32 %v1065_v18, %v1046_v16  ;;  %v1085_v21 = vpop.f32.mrf.mxu2 }
 0x1be   :  { %1472 = vmatpush.msrb.mxu0 %v1441_v2 }
 0x1bf   :  { %v1086_v17 = vadd.f32 %v1085_v21, %v1066_v20 }
 0x1c0   :  { %v1105_v22 = vpop.f32.mrf.mxu3  ;;  %1473 = vmatpush.msrb.mxu0 %v1440_v4 }
 0x1c1   :  { %v1106_v27 = vadd.f32 %v1105_v22, %v1086_v17 }
 0x1c2   :  { %1474 = vmatpush.msrb.mxu0 %v1439_v8 }
 0x1c3   :  { %v1270_v1 = vmax.f32 %v1106_v27, 0.0 }
 0x1c5   :  { %1396 = vmatmul.f32.vlgmr.msra.gmra.mxu2 %v1270_v1 }
 0x1f3   :  { %v1125_v40 = vpop.f32.mrf.mxu0  ;;  %v1145_v26 = vpop.f32.mrf.mxu1 }
 0x1f4   :  { %v1126_v41 = vadd.f32 %v1125_v40, %v623_v39 }
 0x1f6   :  { %v1146_v42 = vadd.f32 %v1145_v26, %v1126_v41  ;;  %v1165_v43 = vpop.f32.mrf.mxu2 }
 0x1f8   :  { %v1166_v23 = vadd.f32 %v1165_v43, %v1146_v42 }
 0x1fd   :  { %v1185_v19 = vpop.f32.mrf.mxu3  ;;  %v1205_v46 = vpop.f32.mrf.mxu0 }
 0x1fe   :  { %v1186_v45 = vadd.f32 %v1185_v19, %v1166_v23  ;;  %v1225_v47 = vpop.f32.mrf.mxu1 }
 0x200   :  { %v1206_v0 = vadd.f32 %v1205_v46, %v1186_v45 }
 0x202   :  { %v1226_v24 = vadd.f32 %v1225_v47, %v1206_v0 }
 0x205   :  { %v1245_v25 = vpop.f32.mrf.mxu2 }
 0x206   :  { %v1246_v48 = vadd.f32 %v1245_v25, %v1226_v24 }
 0x20a   :  { %v1265_v49 = vpop.f32.mrf.mxu3 }
 0x20b   :  { %v1266_v50 = vadd.f32 %v1265_v49, %v1246_v48 }
 0x20d   :  { %v1271_v31 = vmax.f32 %v1266_v50, 0.0 }
 0x20f   :  { %1416 = vmatmul.f32.vlgmr.msra.gmra.mxu3 %v1271_v31 }
 0x21f   :  { %v1357_v61 = vpop.f32.mrf.mxu0 }
 0x220   :  { %v1358_v3 = vadd.f32 %v1498_v60, %v1357_v61  ;;  %v1377_v5 = vpop.f32.mrf.mxu1 }
 0x222   :  { %v1378_v9 = vadd.f32 %v1377_v5, %v1358_v3 }
 0x248   :  { %v1397_v6 = vpop.f32.mrf.mxu2 }
 0x249   :  { %v1398_v10 = vadd.f32 %v1397_v6, %v1378_v9 }
 0x292   :  { %v1417_v11 = vpop.f32.mrf.mxu3 }
 0x293   :  { %v1418_v12 = vadd.f32 %v1417_v11, %v1398_v10 }
 0x295   :  { %v1488_v13 = vmul.f32 -1.442695, %v1418_v12 }
 0x297   :  { %1500 = vpow2.f32 %v1488_v13 }
 0x29d   :  { %v1501_v14 = vpop.eup %1500 }
 0x29e   :  { %v1423_v15 = vadd.f32 1.0, %v1501_v14 }
 0x2a0   :  { %1502 = vrcp.f32 %v1423_v15  ;;  %v1435_v21 = vand.u32 2147483648, %v1423_v15  ;;  %v1433_v22 = vand.u32 2147483647, %v1423_v15  ;;  %vm1429_vm1 = vweird.f32 %v1423_v15 }
 0x2a2   :  { %v1436_v1 = vor.u32 1.1754944e-38, %v1435_v21  ;;  %vm1434_vm3 = vcmp.eq.f32.partialorder %v1433_v22, 8.507059e+37 }
 0x2a6   :  { %v1503_v16 = vpop.eup %1502 }
 0x2a7   :  { %v1425_v18 = vmul.f32 %v1503_v16, %v1423_v15  ;;  %vm1430_vm0 = vweird.f32 %v1503_v16 }
 0x2a8   :  { %vm1431_vm2 = vmor %vm1429_vm1, %vm1430_vm0 }
 0x2a9   :  { %v1426_v20 = vsub.f32 1.0, %v1425_v18 }
 0x2ab   :  { %v1427_v17 = vmul.f32 %v1503_v16, %v1426_v20 }
 0x2ad   :  { %v1428_v27 = vadd.f32 %v1503_v16, %v1427_v17 }
 0x2af   :  { %v1432_v28 = vsel %vm1431_vm2, %v1503_v16, %v1428_v27 }
 0x2b0   :  { %v1437_v32 = vsel %vm1434_vm3, %v1436_v1, %v1432_v28 }
 0x2b1   :  { %1475 = vmatmul.f32.vlgmr.msrb.gmra.mxu0 %v1437_v32 }
 0x32e   :  { %v1476_v7 = vpop.f32.mrf.mxu0 }
 0x32f   :  { %v1477_v29 = vadd.f32 %v1499_v63, %v1476_v7 }
 0x331   :  { %1480 = vst.msk [vmem:[%s1884_s7] sm:$0xff] %vm1479_vm4, %v1477_v29 }
 0x332   :  { %1485 = vsyncpa [#allocation3], 1 }
 0x333   :  { %1486 = vsyncpa [#allocation5], 1 }
 0x334   :  { %1487 = vsyncpa [#allocation8], 1 }

// kernel: siamese_forward_pallas.2
= control target key start
LH: loop header
LB: loop body
LE: loop exit
PB: predicated region body
PF: predicated region fallthrough
CT: control target
= control target key end

     0   :  { %s4616_s0 = inlined_call_operand.vmem [shape: f32[8,8704], index: 0, kind: input, shape index: {}]   ;;  %s4617_s1 = inlined_call_operand.hbm [shape: f32[8704,1024], index: 1, kind: input, shape index: {}]   ;;  %s4618_s2 = inlined_call_operand.hbm [shape: f32[1,1024], index: 2, kind: input, shape index: {}]   ;;  %s4619_s3 = inlined_call_operand.vmem [shape: f32[8,1024], index: 3, kind: output, shape index: {}]  }
   0x1   :  { %4622 = sst [smem:[#allocation11_spill]] %s4617_s1 }
   0x2   :  { %8 = vsyncpa [#allocation4], 0 }
   0x3   :  { %10 = vsyncpa [#allocation4 + $0x1], 0 }
   0x4   :  { %11 = vsyncpa [#allocation6], 0 }
   0x5   :  { %13 = vsyncpa [#allocation6 + $0x1], 0  ;;  %s3263_s12 = smov 0   ;;  %s3265_s13 = smov 0  }
   0x6   :  { %s3267_s14 = smov 0   ;;  %s3269_s15 = smov 0  }
   0x7   :  { %s3271_s16 = smov 0   ;;  %s3273_s17 = smov 0  }
   0x8   :  { %s3275_s18 = smov 0   ;;  %s3277_s19 = smov 0  }
   0x9   :  { %s3279_s20 = smov 0   ;;  %s3281_s21 = smov 0  }
   0xa   :  { %s3283_s22 = smov 0  }
   0xb LB: > { %s28_s23 = sadd.s32 1, %s3229_s20  ;;  %s31_s24 = sadd.s32 1, %s3233_s21  ;;  %s3237_s22 = sphi %s3283_s22, %s19_s22   ;;  %s3233_s21 = sphi %s3281_s21, %s4641_s21   ;;  %s3229_s20 = sphi %s3279_s20, %s4640_s20   ;;  %s3225_s19 = sphi %s3277_s19, %s4639_s19   ;;  %s3221_s18 = sphi %s3275_s18, %s4638_s18   ;;  %s3217_s17 = sphi %s3273_s17, %s4637_s17   ;;  %s3213_s16 = sphi %s3271_s16, %s4636_s16   ;;  %s3209_s15 = sphi %s3269_s15, %s4635_s15   ;;  %s3205_s14 = sphi %s3267_s14, %s4634_s14   ;;  %s3201_s13 = sphi %s3265_s13, %s4633_s13   ;;  %s3197_s12 = sphi %s3263_s12, %s4632_s12  }
   0xc   : > { %p29_p0 = scmp.ge.s32.totalorder %s28_s23, 4  ;;  %p73_p1 = scmp.ne.s32.totalorder %s3217_s17, %s3213_s16 }
   0xd   : > { %p74_p2 = scmp.eq.s32.totalorder %s3237_s22, 0  ;;  %p2939_p4 = scmp.lt.s32.totalorder %s3237_s22, 8 }
   0xe   : > { %s4643_s23 = smov (%p29_p0, %s28_s23), 0  ;;  %s4645_s24 = smov (!%p29_p0, %s31_s24), %s3233_s21 }
   0xf   : > { %4623 = sst [smem:[#allocation9_spill]] %s4643_s23  ;;  %p75_p3 = por %p74_p2, %p73_p1 }
  0x10   : > { %s164_s26 = sand.u32 1, %s3217_s17   ;;  %s2911_s27 = sshll.u32 %s3233_s21, 2 }
  0x11   : > { %s2926_s28 = smul.u32 8704, %s164_s26  ;;  %p2933_p5 = pnand %p2939_p4, %p75_p3 }
  0x12   : > { %s2925_s29 = smul.u32 2176, %s3229_s20  ;;  %s4624_s1 = sld [smem:[#allocation11_spill]] }
  0x13   : > { %s168_s4 = scalar_lea.vmem [#allocation3], %s2926_s28  ;;  %s165_s11 = scalar_lea.sflag [#allocation4], %s164_s26 }
  0x14   : > { %s174_s30 = sadd.s32 %s2925_s29, %s2911_s27  ;;  %s179_s5 = sshll.u32 %s168_s4, 4  ;;  %s180_s5 = int_to_ptr.vmem [resolvable:$true] %s179_s5 }
  0x15   : > { %s2913_s6 = sshll.u32 %s174_s30, 3  ;;  %s3239_s25 = smov 1024  }
  0x16   : > { %s3240_s28 = smov 512   ;;  %s3241_s29 = smov 32  }
  0x17   : > { %p2916_p6 = scmp.ge.s32.totalorder %s3237_s22, 1  ;;  %p206_p7 = scmp.lt.s32.totalorder %s3237_s22, 9 }
  0x18   : > { %s176_s9 = scalar_lea.hbm %s4624_s1, %s2913_s6  ;;  %s61_s30 = ssub.s32 %s3229_s20, %s4643_s23 }
  0x19   : > { %s177_s10 = sshll.u32 %s176_s9, 4  ;;  %p3346_p8 = pnand %p2916_p6, %p206_p7  ;;  %s178_s10 = int_to_ptr.hbm [resolvable:$true] %s177_s10 }
  0x1a   : > { %2935 = dma.hbm_to_vmem [thread:$0]  (!%p2933_p5), %s178_s10, 139264, %s180_s5, %s165_s11, %s3239_s25, %s3240_s28, %s3241_s29  }
  0x1b   : > { %s2907_s26 = sadd.s32 4294967295, %s3237_s22   ;;  %p33_p9 = scmp.ge.s32.totalorder %s4645_s24, 2 }
  0x1c   : > { %p79_p10 = scmp.ne.s32.totalorder %s3213_s16, %s3209_s15  ;;  %p80_p11 = scmp.eq.s32.totalorder %s2907_s26, 0 }
  0x1d   : > { %s4647_s24 = smov (%p33_p9, %s4645_s24), 0  ;;  %s92_s5 = sadd.s32 1, %s3205_s14 }
  0x1e   : > { %4626 = sst [smem:[#allocation10_spill]] %s4647_s24  ;;  %p3357_p12 = por %p80_p11, %p79_p10 }
  0x1f   : > { %s62_s6 = ssub.s32 %s3233_s21, %s4647_s24  ;;  %p105_p13 = scmp.ne.s32.totalorder %s3201_s13, %s3197_s12 }
  0x20   : > { %s63_s7 = sor.u32 %s62_s6, %s61_s30  ;;  %p90_p0 = scmp.eq.s32.totalorder %s62_s6, 0 }
  0x21   : > { %p64_p1 = scmp.eq.s32.totalorder %s63_s7, 0  ;;  %p99_p3 = scmp.ne.s32.totalorder %s3205_s14, %s3201_s13 }
  0x22   : > { %s3369_s8 = scalar_select %p90_p0, %s3205_s14, %s92_s5  }
  0x23   : > { %s4628_s15 = sadd.s32 1, %s3217_s17  ;;  %p3376_p5 = por %p105_p13, %p80_p11 }
  0x24   : > { %s3374_s9 = scalar_select %p64_p1, %s3217_s17, %s4628_s15  }
  0x25   : > { %s189_s11 = sand.u32 1, %s3205_s14   ;;  %p101_p6 = por %p99_p3, %p74_p2 }
  0x26   : > { %s2914_s28 = sshll.u32 %s189_s11, 2  ;;  %s197_s30 = scalar_lea.hbm %s4618_s2, %s2911_s27 }
  0x27   : > { %s199_s26 = sshll.u32 %s197_s30, 4  ;;  %s193_s6 = scalar_lea.vmem [#allocation5], %s2914_s28  ;;  %s200_s26 = int_to_ptr.hbm [resolvable:$true] %s199_s26 }
  0x28   : > { %s201_s5 = sshll.u32 %s193_s6, 4  ;;  %p2936_p7 = pnand %p2939_p4, %p101_p6  ;;  %s202_s5 = int_to_ptr.vmem [resolvable:$true] %s201_s5 }
  0x29   : > { %s190_s7 = scalar_lea.sflag [#allocation6], %s189_s11  ;;  %210 = sbr.rel (%p3346_p8) target bundleno = 1129 (0x469), region = 32 }
  0x2a   : > { %2938 = dma.hbm_to_vmem [thread:$0]  (!%p2936_p7), %s200_s26, 64, %s202_s5, %s190_s7  }
  0x2b   : > { %s212_s15 = sand.u32 (!%p3346_p8), 1, %s3213_s16  }
  0x2c   : > { %s2927_s1 = smul.u32 (!%p3346_p8), 8704, %s212_s15  ;;  %s213_s24 = scalar_lea.sflag (!%p3346_p8), [#allocation4], %s212_s15 }
  0x2e   : > { %s3393_s23 = scalar_lea.vmem [#allocation3], %s2927_s1 }
  0x2f   : > { %3188 = dma.done.wait (%p3357_p12), %s213_s24, 139264  }
  0x30   : > { %3190 = vsyncadd (%p3357_p12), %s213_s24, 4294828032  ;;  %s222_s27 = sand.u32 1, %s3201_s13  }
  0x31   : > { %s3400_s11 = sshll.u32 %s222_s27, 2  ;;  %s223_s4 = scalar_lea.sflag [#allocation6], %s222_s27 }
  0x32   : > { %s226_s28 = scalar_lea.vmem [#allocation5], %s3400_s11 }
  0x33   : > { %3192 = dma.done.wait (%p3376_p5), %s223_s4, 64  }
  0x34   : > { %3194 = vsyncadd (%p3376_p5), %s223_s4, 4294967232  ;;  %s260_s1 = smul.u32 17, %s3221_s18  ;;  %s2919_s12 = sshll.u32 %s3225_s19, 2 }
  0x35   : > { %p270_p2 = scmp.lt.s32.totalorder %s2919_s12, 7  ;;  %p2921_p8 = scmp.ne.s32.totalorder %s3221_s18, 0 }
  0x36   : > { %p261_p4 = scmp.lt.s32.totalorder %s260_s1, 67 }
  0x37   : > { %s4649_s12 = smov (!%p270_p2, %s2919_s12), 7  ;;  %278 = sbr.rel (%p2921_p8) target bundleno = 65 (0x41), region = 44 }
  0x38   : > { %s4651_s1 = smov (!%p261_p4, %s260_s1), 67  ;;  %s2920_s24 = sshll.u32 %s4649_s12, 3 }
  0x39   : > { %s2918_s25 = sshll.u32 %s4651_s1, 3  ;;  %s3412_s26 = scalar_lea.vmem %s4619_s3, %s2920_s24 }
  0x3a   : > { %s3417_s10 = scalar_lea.vmem %s4616_s0, %s2918_s25 }
  0x3c   : > { %v3242_v0 = vmov 0.0  }
  0x3d   : > { %279 = vst [vmem:[#allocation2 + $0x10] sm:$0xff] %v3242_v0 }
  0x3e   : > { %280 = vst [vmem:[#allocation2] sm:$0xff] %v3242_v0 }
  0x3f   : > { %281 = vst [vmem:[#allocation2 + $0x18] sm:$0xff] %v3242_v0 }
  0x40   : > { %282 = vst [vmem:[#allocation2 + $0x8] sm:$0xff] %v3242_v0 }
  0x41 PF: > { %v364_v1 = vld [vmem:[%s3393_s23 + $0x1e0] sm:$0xff]  ;;  %p2922_p9 = scmp.ne.s32.totalorder %s3221_s18, 3 }
  0x42   : > { %v492_v2 = vld [vmem:[%s3393_s23 + $0x5e0] sm:$0xff]  ;;  %1392 = vmatpush.msra.mxu0 %v364_v1 }
  0x43   : > { %v360_v3 = vld [vmem:[%s3393_s23 + $0x1c0] sm:$0xff]  ;;  %1432 = vmatpush.msra.mxu2 %v492_v2 }
  0x44   : > { %v428_v4 = vld [vmem:[%s3393_s23 + $0x3e0] sm:$0xff]  ;;  %1393 = vmatpush.msra.mxu0 %v360_v3 }
  0x45   : > { %v488_v5 = vld [vmem:[%s3393_s23 + $0x5c0] sm:$0xff]  ;;  %1412 = vmatpush.msra.mxu1 %v428_v4 }
  0x46   : > { %v556_v6 = vld [vmem:[%s3393_s23 + $0x7e0] sm:$0xff]  ;;  %1433 = vmatpush.msra.mxu2 %v488_v5 }
  0x47   : > { %1452 = vmatpush.msra.mxu3 %v556_v6  ;;  %v356_v7 = vld [vmem:[%s3393_s23 + $0x1a0] sm:$0xff] }
  0x48   : > { %v424_v8 = vld [vmem:[%s3393_s23 + $0x3c0] sm:$0xff]  ;;  %1394 = vmatpush.msra.mxu0 %v356_v7 }
  0x49   : > { %v484_v9 = vld [vmem:[%s3393_s23 + $0x5a0] sm:$0xff]  ;;  %1413 = vmatpush.msra.mxu1 %v424_v8 }
  0x4a   : > { %v552_v10 = vld [vmem:[%s3393_s23 + $0x7c0] sm:$0xff]  ;;  %1434 = vmatpush.msra.mxu2 %v484_v9 }
  0x4b   : > { %v420_v11 = vld [vmem:[%s3393_s23 + $0x3a0] sm:$0xff]  ;;  %1453 = vmatpush.msra.mxu3 %v552_v10 }
  0x4c   : > { %v352_v12 = vld [vmem:[%s3393_s23 + $0x180] sm:$0xff]  ;;  %1414 = vmatpush.msra.mxu1 %v420_v11 }
  0x4d   : > { %v480_v13 = vld [vmem:[%s3393_s23 + $0x580] sm:$0xff]  ;;  %1395 = vmatpush.msra.mxu0 %v352_v12 }
  0x4e   : > { %v548_v14 = vld [vmem:[%s3393_s23 + $0x7a0] sm:$0xff]  ;;  %1435 = vmatpush.msra.mxu2 %v480_v13 }
  0x4f   : > { %v416_v15 = vld [vmem:[%s3393_s23 + $0x380] sm:$0xff]  ;;  %1454 = vmatpush.msra.mxu3 %v548_v14 }
  0x50   : > { %v544_v16 = vld [vmem:[%s3393_s23 + $0x780] sm:$0xff]  ;;  %1415 = vmatpush.msra.mxu1 %v416_v15 }
  0x51   : > { %v348_v17 = vld [vmem:[%s3393_s23 + $0x160] sm:$0xff]  ;;  %1455 = vmatpush.msra.mxu3 %v544_v16 }
  0x52   : > { %v476_v18 = vld [vmem:[%s3393_s23 + $0x560] sm:$0xff]  ;;  %1396 = vmatpush.msra.mxu0 %v348_v17 }
  0x53   : > { %v412_v19 = vld [vmem:[%s3393_s23 + $0x360] sm:$0xff]  ;;  %1436 = vmatpush.msra.mxu2 %v476_v18 }
  0x54   : > { %v540_v20 = vld [vmem:[%s3393_s23 + $0x760] sm:$0xff]  ;;  %1416 = vmatpush.msra.mxu1 %v412_v19 }
  0x55   : > { %v344_v21 = vld [vmem:[%s3393_s23 + $0x140] sm:$0xff]  ;;  %1456 = vmatpush.msra.mxu3 %v540_v20 }
  0x56   : > { %v472_v22 = vld [vmem:[%s3393_s23 + $0x540] sm:$0xff]  ;;  %1397 = vmatpush.msra.mxu0 %v344_v21 }
  0x57   : > { %v408_v23 = vld [vmem:[%s3393_s23 + $0x340] sm:$0xff]  ;;  %1437 = vmatpush.msra.mxu2 %v472_v22 }
  0x58   : > { %v536_v24 = vld [vmem:[%s3393_s23 + $0x740] sm:$0xff]  ;;  %1417 = vmatpush.msra.mxu1 %v408_v23 }
  0x59   : > { %v340_v25 = vld [vmem:[%s3393_s23 + $0x120] sm:$0xff]  ;;  %1457 = vmatpush.msra.mxu3 %v536_v24 }
  0x5a   : > { %v468_v26 = vld [vmem:[%s3393_s23 + $0x520] sm:$0xff]  ;;  %1398 = vmatpush.msra.mxu0 %v340_v25 }
  0x5b   : > { %v404_v27 = vld [vmem:[%s3393_s23 + $0x320] sm:$0xff]  ;;  %1438 = vmatpush.msra.mxu2 %v468_v26 }
  0x5c   : > { %v532_v28 = vld [vmem:[%s3393_s23 + $0x720] sm:$0xff]  ;;  %1418 = vmatpush.msra.mxu1 %v404_v27 }
  0x5d   : > { %v336_v29 = vld [vmem:[%s3393_s23 + $0x100] sm:$0xff]  ;;  %1458 = vmatpush.msra.mxu3 %v532_v28 }
  0x5e   : > { %v464_v30 = vld [vmem:[%s3393_s23 + $0x500] sm:$0xff]  ;;  %1399 = vmatpush.msra.mxu0 %v336_v29 }
  0x5f   : > { %v400_v31 = vld [vmem:[%s3393_s23 + $0x300] sm:$0xff]  ;;  %1439 = vmatpush.msra.mxu2 %v464_v30 }
  0x60   : > { %v528_v32 = vld [vmem:[%s3393_s23 + $0x700] sm:$0xff]  ;;  %1419 = vmatpush.msra.mxu1 %v400_v31 }
  0x61   : > { %v332_v33 = vld [vmem:[%s3393_s23 + $0xe0] sm:$0xff]  ;;  %1459 = vmatpush.msra.mxu3 %v528_v32 }
  0x62   : > { %v460_v34 = vld [vmem:[%s3393_s23 + $0x4e0] sm:$0xff]  ;;  %1400 = vmatpush.msra.mxu0 %v332_v33 }
  0x63   : > { %v396_v35 = vld [vmem:[%s3393_s23 + $0x2e0] sm:$0xff]  ;;  %1440 = vmatpush.msra.mxu2 %v460_v34 }
  0x64   : > { %v524_v36 = vld [vmem:[%s3393_s23 + $0x6e0] sm:$0xff]  ;;  %1420 = vmatpush.msra.mxu1 %v396_v35 }
  0x65   : > { %v328_v37 = vld [vmem:[%s3393_s23 + $0xc0] sm:$0xff]  ;;  %1460 = vmatpush.msra.mxu3 %v524_v36 }
  0x66   : > { %v456_v38 = vld [vmem:[%s3393_s23 + $0x4c0] sm:$0xff]  ;;  %1401 = vmatpush.msra.mxu0 %v328_v37 }
  0x67   : > { %v392_v39 = vld [vmem:[%s3393_s23 + $0x2c0] sm:$0xff]  ;;  %1441 = vmatpush.msra.mxu2 %v456_v38 }
  0x68   : > { %v520_v40 = vld [vmem:[%s3393_s23 + $0x6c0] sm:$0xff]  ;;  %1421 = vmatpush.msra.mxu1 %v392_v39 }
  0x69   : > { %v324_v41 = vld [vmem:[%s3393_s23 + $0xa0] sm:$0xff]  ;;  %1461 = vmatpush.msra.mxu3 %v520_v40 }
  0x6a   : > { %v452_v42 = vld [vmem:[%s3393_s23 + $0x4a0] sm:$0xff]  ;;  %1402 = vmatpush.msra.mxu0 %v324_v41 }
  0x6b   : > { %v388_v43 = vld [vmem:[%s3393_s23 + $0x2a0] sm:$0xff]  ;;  %1442 = vmatpush.msra.mxu2 %v452_v42 }
  0x6c   : > { %v516_v44 = vld [vmem:[%s3393_s23 + $0x6a0] sm:$0xff]  ;;  %1422 = vmatpush.msra.mxu1 %v388_v43 }
  0x6d   : > { %v320_v45 = vld [vmem:[%s3393_s23 + $0x80] sm:$0xff]  ;;  %1462 = vmatpush.msra.mxu3 %v516_v44 }
  0x6e   : > { %v448_v46 = vld [vmem:[%s3393_s23 + $0x480] sm:$0xff]  ;;  %1403 = vmatpush.msra.mxu0 %v320_v45 }
  0x6f   : > { %v384_v47 = vld [vmem:[%s3393_s23 + $0x280] sm:$0xff]  ;;  %1443 = vmatpush.msra.mxu2 %v448_v46 }
  0x70   : > { %v512_v48 = vld [vmem:[%s3393_s23 + $0x680] sm:$0xff]  ;;  %1423 = vmatpush.msra.mxu1 %v384_v47 }
  0x71   : > { %v316_v49 = vld [vmem:[%s3393_s23 + $0x60] sm:$0xff]  ;;  %1463 = vmatpush.msra.mxu3 %v512_v48 }
  0x72   : > { %v444_v50 = vld [vmem:[%s3393_s23 + $0x460] sm:$0xff]  ;;  %1404 = vmatpush.msra.mxu0 %v316_v49 }
  0x73   : > { %v380_v51 = vld [vmem:[%s3393_s23 + $0x260] sm:$0xff]  ;;  %1444 = vmatpush.msra.mxu2 %v444_v50 }
  0x74   : > { %v508_v52 = vld [vmem:[%s3393_s23 + $0x660] sm:$0xff]  ;;  %1424 = vmatpush.msra.mxu1 %v380_v51 }
  0x75   : > { %v312_v53 = vld [vmem:[%s3393_s23 + $0x40] sm:$0xff]  ;;  %1464 = vmatpush.msra.mxu3 %v508_v52 }
  0x76   : > { %v440_v54 = vld [vmem:[%s3393_s23 + $0x440] sm:$0xff]  ;;  %1405 = vmatpush.msra.mxu0 %v312_v53 }
  0x77   : > { %v376_v55 = vld [vmem:[%s3393_s23 + $0x240] sm:$0xff]  ;;  %1445 = vmatpush.msra.mxu2 %v440_v54 }
  0x78   : > { %v504_v56 = vld [vmem:[%s3393_s23 + $0x640] sm:$0xff]  ;;  %1425 = vmatpush.msra.mxu1 %v376_v55 }
  0x79   : > { %v308_v57 = vld [vmem:[%s3393_s23 + $0x20] sm:$0xff]  ;;  %1465 = vmatpush.msra.mxu3 %v504_v56 }
  0x7a   : > { %v436_v58 = vld [vmem:[%s3393_s23 + $0x420] sm:$0xff]  ;;  %1406 = vmatpush.msra.mxu0 %v308_v57 }
  0x7b   : > { %v372_v59 = vld [vmem:[%s3393_s23 + $0x220] sm:$0xff]  ;;  %1446 = vmatpush.msra.mxu2 %v436_v58 }
  0x7c   : > { %v500_v60 = vld [vmem:[%s3393_s23 + $0x620] sm:$0xff]  ;;  %1426 = vmatpush.msra.mxu1 %v372_v59  ;;  %v289_v59 = vld [vmem:[%s3417_s10 + $0x10] sm:$0xff] }
  0x7d   : > { %v304_v61 = vld [vmem:[%s3393_s23] sm:$0xff]  ;;  %1466 = vmatpush.msra.mxu3 %v500_v60 }
  0x7e   : > { %v432_v62 = vld [vmem:[%s3393_s23 + $0x400] sm:$0xff]  ;;  %1407 = vmatpush.msra.mxu0 %v304_v61 }
  0x7f   : > { %v620_v63 = vld [vmem:[%s3393_s23 + $0x9e0] sm:$0xff]  ;;  %1447 = vmatpush.msra.mxu2 %v432_v62 }
  0x80   : > { %v748_v0 = vld [vmem:[%s3393_s23 + $0xde0] sm:$0xff]  ;;  %1472 = vmatpush.msrb.mxu0 %v620_v63  ;;  %1448 = vmatmul.f32.vlgmr.msra.gmra.mxu2 %v289_v59 }
  0x81   : > { %v368_v1 = vld [vmem:[%s3393_s23 + $0x200] sm:$0xff]  ;;  %1512 = vmatpush.msrb.mxu2 %v748_v0 }
  0x82   : > { %v496_v2 = vld [vmem:[%s3393_s23 + $0x600] sm:$0xff]  ;;  %1427 = vmatpush.msra.mxu1 %v368_v1  ;;  %v290_v1 = vld [vmem:[%s3417_s10 + $0x18] sm:$0xff] }
  0x83   : > { %v616_v3 = vld [vmem:[%s3393_s23 + $0x9c0] sm:$0xff]  ;;  %1467 = vmatpush.msra.mxu3 %v496_v2 }
  0x84   : > { %v684_v4 = vld [vmem:[%s3393_s23 + $0xbe0] sm:$0xff]  ;;  %1473 = vmatpush.msrb.mxu0 %v616_v3  ;;  %1468 = vmatmul.f32.vlgmr.msra.gmra.mxu3 %v290_v1 }
  0x85   : > { %v744_v5 = vld [vmem:[%s3393_s23 + $0xdc0] sm:$0xff]  ;;  %1492 = vmatpush.msrb.mxu1 %v684_v4 }
  0x86   : > { %v812_v6 = vld [vmem:[%s3393_s23 + $0xfe0] sm:$0xff]  ;;  %1513 = vmatpush.msrb.mxu2 %v744_v5 }
  0x87   : > { %v612_v7 = vld [vmem:[%s3393_s23 + $0x9a0] sm:$0xff]  ;;  %1532 = vmatpush.msrb.mxu3 %v812_v6  ;;  %v288_v6 = vld [vmem:[%s3417_s10 + $0x8] sm:$0xff] }
  0x88   : > { %v680_v8 = vld [vmem:[%s3393_s23 + $0xbc0] sm:$0xff]  ;;  %1474 = vmatpush.msrb.mxu0 %v612_v7  ;;  %1428 = vmatmul.f32.vlgmr.msra.gmra.mxu1 %v288_v6 }
  0x89   : > { %v740_v9 = vld [vmem:[%s3393_s23 + $0xda0] sm:$0xff]  ;;  %1493 = vmatpush.msrb.mxu1 %v680_v8 }
  0x8a   : > { %v808_v10 = vld [vmem:[%s3393_s23 + $0xfc0] sm:$0xff]  ;;  %1514 = vmatpush.msrb.mxu2 %v740_v9 }
  0x8b   : > { %v608_v11 = vld [vmem:[%s3393_s23 + $0x980] sm:$0xff]  ;;  %1533 = vmatpush.msrb.mxu3 %v808_v10 }
  0x8c   : > { %v676_v12 = vld [vmem:[%s3393_s23 + $0xba0] sm:$0xff]  ;;  %1475 = vmatpush.msrb.mxu0 %v608_v11 }
  0x8d   : > { %v736_v13 = vld [vmem:[%s3393_s23 + $0xd80] sm:$0xff]  ;;  %1494 = vmatpush.msrb.mxu1 %v676_v12 }
  0x8e   : > { %v804_v14 = vld [vmem:[%s3393_s23 + $0xfa0] sm:$0xff]  ;;  %1515 = vmatpush.msrb.mxu2 %v736_v13 }
  0x8f   : > { %v604_v15 = vld [vmem:[%s3393_s23 + $0x960] sm:$0xff]  ;;  %1534 = vmatpush.msrb.mxu3 %v804_v14 }
  0x90   : > { %v672_v16 = vld [vmem:[%s3393_s23 + $0xb80] sm:$0xff]  ;;  %1476 = vmatpush.msrb.mxu0 %v604_v15  ;;  %v293_v15 = vld [vmem:[%s3417_s10 + $0x30] sm:$0xff] }
  0x91   : > { %v732_v17 = vld [vmem:[%s3393_s23 + $0xd60] sm:$0xff]  ;;  %1495 = vmatpush.msrb.mxu1 %v672_v16 }
  0x92   : > { %v800_v18 = vld [vmem:[%s3393_s23 + $0xf80] sm:$0xff]  ;;  %1516 = vmatpush.msrb.mxu2 %v732_v17 }
  0x93   : > { %v600_v19 = vld [vmem:[%s3393_s23 + $0x940] sm:$0xff]  ;;  %1535 = vmatpush.msrb.mxu3 %v800_v18 }
  0x94   : > { %v668_v20 = vld [vmem:[%s3393_s23 + $0xb60] sm:$0xff]  ;;  %1477 = vmatpush.msrb.mxu0 %v600_v19 }
  0x95   : > { %v728_v21 = vld [vmem:[%s3393_s23 + $0xd40] sm:$0xff]  ;;  %1496 = vmatpush.msrb.mxu1 %v668_v20 }
  0x96   : > { %v796_v22 = vld [vmem:[%s3393_s23 + $0xf60] sm:$0xff]  ;;  %1517 = vmatpush.msrb.mxu2 %v728_v21  ;;  %v294_v21 = vld [vmem:[%s3417_s10 + $0x38] sm:$0xff] }
  0x97   : > { %v596_v23 = vld [vmem:[%s3393_s23 + $0x920] sm:$0xff]  ;;  %1536 = vmatpush.msrb.mxu3 %v796_v22 }
  0x98   : > { %v664_v24 = vld [vmem:[%s3393_s23 + $0xb40] sm:$0xff]  ;;  %1478 = vmatpush.msrb.mxu0 %v596_v23 }
  0x99   : > { %v724_v25 = vld [vmem:[%s3393_s23 + $0xd20] sm:$0xff]  ;;  %1497 = vmatpush.msrb.mxu1 %v664_v24 }
  0x9a   : > { %v792_v26 = vld [vmem:[%s3393_s23 + $0xf40] sm:$0xff]  ;;  %1518 = vmatpush.msrb.mxu2 %v724_v25 }
  0x9b   : > { %v592_v27 = vld [vmem:[%s3393_s23 + $0x900] sm:$0xff]  ;;  %1537 = vmatpush.msrb.mxu3 %v792_v26  ;;  %v292_v26 = vld [vmem:[%s3417_s10 + $0x28] sm:$0xff] }
  0x9c   : > { %v660_v28 = vld [vmem:[%s3393_s23 + $0xb20] sm:$0xff]  ;;  %1479 = vmatpush.msrb.mxu0 %v592_v27 }
  0x9d   : > { %v720_v29 = vld [vmem:[%s3393_s23 + $0xd00] sm:$0xff]  ;;  %1498 = vmatpush.msrb.mxu1 %v660_v28 }
  0x9e   : > { %v788_v30 = vld [vmem:[%s3393_s23 + $0xf20] sm:$0xff]  ;;  %1519 = vmatpush.msrb.mxu2 %v720_v29 }
  0x9f   : > { %v588_v31 = vld [vmem:[%s3393_s23 + $0x8e0] sm:$0xff]  ;;  %1538 = vmatpush.msrb.mxu3 %v788_v30 }
  0xa0   : > { %v656_v32 = vld [vmem:[%s3393_s23 + $0xb00] sm:$0xff]  ;;  %1480 = vmatpush.msrb.mxu0 %v588_v31 }
  0xa1   : > { %v716_v33 = vld [vmem:[%s3393_s23 + $0xce0] sm:$0xff]  ;;  %1499 = vmatpush.msrb.mxu1 %v656_v32 }
  0xa2   : > { %v784_v34 = vld [vmem:[%s3393_s23 + $0xf00] sm:$0xff]  ;;  %1520 = vmatpush.msrb.mxu2 %v716_v33 }
  0xa3   : > { %v584_v35 = vld [vmem:[%s3393_s23 + $0x8c0] sm:$0xff]  ;;  %1539 = vmatpush.msrb.mxu3 %v784_v34 }
  0xa4   : > { %v652_v36 = vld [vmem:[%s3393_s23 + $0xae0] sm:$0xff]  ;;  %1481 = vmatpush.msrb.mxu0 %v584_v35 }
  0xa5   : > { %v712_v37 = vld [vmem:[%s3393_s23 + $0xcc0] sm:$0xff]  ;;  %1500 = vmatpush.msrb.mxu1 %v652_v36 }
  0xa6   : > { %v780_v38 = vld [vmem:[%s3393_s23 + $0xee0] sm:$0xff]  ;;  %1521 = vmatpush.msrb.mxu2 %v712_v37 }
  0xa7   : > { %v580_v39 = vld [vmem:[%s3393_s23 + $0x8a0] sm:$0xff]  ;;  %1540 = vmatpush.msrb.mxu3 %v780_v38 }
  0xa8   : > { %v648_v40 = vld [vmem:[%s3393_s23 + $0xac0] sm:$0xff]  ;;  %1482 = vmatpush.msrb.mxu0 %v580_v39 }
  0xa9   : > { %v708_v41 = vld [vmem:[%s3393_s23 + $0xca0] sm:$0xff]  ;;  %1501 = vmatpush.msrb.mxu1 %v648_v40 }
  0xaa   : > { %v776_v42 = vld [vmem:[%s3393_s23 + $0xec0] sm:$0xff]  ;;  %1522 = vmatpush.msrb.mxu2 %v708_v41 }
  0xab   : > { %v576_v43 = vld [vmem:[%s3393_s23 + $0x880] sm:$0xff]  ;;  %1541 = vmatpush.msrb.mxu3 %v776_v42 }
  0xac   : > { %v644_v44 = vld [vmem:[%s3393_s23 + $0xaa0] sm:$0xff]  ;;  %1483 = vmatpush.msrb.mxu0 %v576_v43 }
  0xad   : > { %v704_v45 = vld [vmem:[%s3393_s23 + $0xc80] sm:$0xff]  ;;  %1502 = vmatpush.msrb.mxu1 %v644_v44 }
  0xae   : > { %v772_v46 = vld [vmem:[%s3393_s23 + $0xea0] sm:$0xff]  ;;  %1523 = vmatpush.msrb.mxu2 %v704_v45 }
  0xaf   : > { %v572_v47 = vld [vmem:[%s3393_s23 + $0x860] sm:$0xff]  ;;  %1542 = vmatpush.msrb.mxu3 %v772_v46 }
  0xb0   : > { %v640_v48 = vld [vmem:[%s3393_s23 + $0xa80] sm:$0xff]  ;;  %1484 = vmatpush.msrb.mxu0 %v572_v47 }
  0xb1   : > { %v700_v49 = vld [vmem:[%s3393_s23 + $0xc60] sm:$0xff]  ;;  %1503 = vmatpush.msrb.mxu1 %v640_v48 }
  0xb2   : > { %v768_v50 = vld [vmem:[%s3393_s23 + $0xe80] sm:$0xff]  ;;  %1524 = vmatpush.msrb.mxu2 %v700_v49 }
  0xb3   : > { %v568_v51 = vld [vmem:[%s3393_s23 + $0x840] sm:$0xff]  ;;  %1543 = vmatpush.msrb.mxu3 %v768_v50 }
  0xb4   : > { %v636_v52 = vld [vmem:[%s3393_s23 + $0xa60] sm:$0xff]  ;;  %1485 = vmatpush.msrb.mxu0 %v568_v51 }
  0xb5   : > { %v696_v53 = vld [vmem:[%s3393_s23 + $0xc40] sm:$0xff]  ;;  %1504 = vmatpush.msrb.mxu1 %v636_v52 }
  0xb6   : > { %v764_v54 = vld [vmem:[%s3393_s23 + $0xe60] sm:$0xff]  ;;  %1525 = vmatpush.msrb.mxu2 %v696_v53 }
  0xb7   : > { %v564_v55 = vld [vmem:[%s3393_s23 + $0x820] sm:$0xff]  ;;  %1544 = vmatpush.msrb.mxu3 %v764_v54 }
  0xb8   : > { %v632_v56 = vld [vmem:[%s3393_s23 + $0xa40] sm:$0xff]  ;;  %1486 = vmatpush.msrb.mxu0 %v564_v55 }
  0xb9   : > { %v692_v57 = vld [vmem:[%s3393_s23 + $0xc20] sm:$0xff]  ;;  %1505 = vmatpush.msrb.mxu1 %v632_v56 }
  0xba   : > { %v760_v58 = vld [vmem:[%s3393_s23 + $0xe40] sm:$0xff]  ;;  %1526 = vmatpush.msrb.mxu2 %v692_v57 }
  0xbb   : > { %v560_v60 = vld [vmem:[%s3393_s23 + $0x800] sm:$0xff]  ;;  %1545 = vmatpush.msrb.mxu3 %v760_v58 }
  0xbc   : > { %v628_v61 = vld [vmem:[%s3393_s23 + $0xa20] sm:$0xff]  ;;  %1487 = vmatpush.msrb.mxu0 %v560_v60 }
  0xbd   : > { %v688_v62 = vld [vmem:[%s3393_s23 + $0xc00] sm:$0xff]  ;;  %1506 = vmatpush.msrb.mxu1 %v628_v61 }
  0xbe   : > { %v756_v63 = vld [vmem:[%s3393_s23 + $0xe20] sm:$0xff]  ;;  %1527 = vmatpush.msrb.mxu2 %v688_v62 }
  0xbf   : > { %v287_v0 = vld [vmem:[%s3417_s10] sm:$0xff]  ;;  %1546 = vmatpush.msrb.mxu3 %v756_v63  ;;  %1528 = vmatmul.f32.vlgmr.msrb.gmra.mxu2 %v293_v15 }
  0xc0   : > { %v876_v2 = vld [vmem:[%s3393_s23 + $0x11e0] sm:$0xff]  ;;  %1408 = vmatmul.f32.vlgmr.msra.gmra.mxu0 %v287_v0 }
  0xc1   : > { %v1004_v3 = vld [vmem:[%s3393_s23 + $0x15e0] sm:$0xff]  ;;  %1552 = vmatpush.msra.mxu0 %v876_v2 }
  0xc2   : > { %v624_v4 = vld [vmem:[%s3393_s23 + $0xa00] sm:$0xff]  ;;  %1592 = vmatpush.msra.mxu2 %v1004_v3 }
  0xc3   : > { %v752_v5 = vld [vmem:[%s3393_s23 + $0xe00] sm:$0xff]  ;;  %1507 = vmatpush.msrb.mxu1 %v624_v4 }
  0xc4   : > { %v872_v7 = vld [vmem:[%s3393_s23 + $0x11c0] sm:$0xff]  ;;  %1547 = vmatpush.msrb.mxu3 %v752_v5  ;;  %1508 = vmatmul.f32.vlgmr.msrb.gmra.mxu1 %v292_v26 }
  0xc5   : > { %v940_v8 = vld [vmem:[%s3393_s23 + $0x13e0] sm:$0xff]  ;;  %1553 = vmatpush.msra.mxu0 %v872_v7  ;;  %1548 = vmatmul.f32.vlgmr.msrb.gmra.mxu3 %v294_v21 }
  0xc6   : > { %v1000_v9 = vld [vmem:[%s3393_s23 + $0x15c0] sm:$0xff]  ;;  %1572 = vmatpush.msra.mxu1 %v940_v8  ;;  %v297_v8 = vld [vmem:[%s3417_s10 + $0x50] sm:$0xff] }
  0xc7   : > { %v1068_v10 = vld [vmem:[%s3393_s23 + $0x17e0] sm:$0xff]  ;;  %1593 = vmatpush.msra.mxu2 %v1000_v9 }
  0xc8   : > { %v868_v11 = vld [vmem:[%s3393_s23 + $0x11a0] sm:$0xff]  ;;  %1612 = vmatpush.msra.mxu3 %v1068_v10 }
  0xc9   : > { %v936_v12 = vld [vmem:[%s3393_s23 + $0x13c0] sm:$0xff]  ;;  %1554 = vmatpush.msra.mxu0 %v868_v11 }
  0xca   : > { %v996_v13 = vld [vmem:[%s3393_s23 + $0x15a0] sm:$0xff]  ;;  %1573 = vmatpush.msra.mxu1 %v936_v12 }
  0xcb   : > { %v1064_v14 = vld [vmem:[%s3393_s23 + $0x17c0] sm:$0xff]  ;;  %1594 = vmatpush.msra.mxu2 %v996_v13  ;;  %v296_v13 = vld [vmem:[%s3417_s10 + $0x48] sm:$0xff] }
  0xcc   : > { %v864_v16 = vld [vmem:[%s3393_s23 + $0x1180] sm:$0xff]  ;;  %1613 = vmatpush.msra.mxu3 %v1064_v14  ;;  %v298_v14 = vld [vmem:[%s3417_s10 + $0x58] sm:$0xff] }
  0xcd   : > { %v932_v17 = vld [vmem:[%s3393_s23 + $0x13a0] sm:$0xff]  ;;  %1555 = vmatpush.msra.mxu0 %v864_v16 }
  0xce   : > { %v992_v18 = vld [vmem:[%s3393_s23 + $0x1580] sm:$0xff]  ;;  %1574 = vmatpush.msra.mxu1 %v932_v17 }
  0xcf   : > { %v1060_v19 = vld [vmem:[%s3393_s23 + $0x17a0] sm:$0xff]  ;;  %1595 = vmatpush.msra.mxu2 %v992_v18 }
  0xd0   : > { %v291_v20 = vld [vmem:[%s3417_s10 + $0x20] sm:$0xff]  ;;  %1614 = vmatpush.msra.mxu3 %v1060_v19 }
  0xd1   : > { %v860_v22 = vld [vmem:[%s3393_s23 + $0x1160] sm:$0xff]  ;;  %1488 = vmatmul.f32.vlgmr.msrb.gmra.mxu0 %v291_v20 }
  0xd2   : > { %v928_v23 = vld [vmem:[%s3393_s23 + $0x1380] sm:$0xff]  ;;  %1556 = vmatpush.msra.mxu0 %v860_v22 }
  0xd3   : > { %v988_v24 = vld [vmem:[%s3393_s23 + $0x1560] sm:$0xff]  ;;  %1575 = vmatpush.msra.mxu1 %v928_v23 }
  0xd4   : > { %v1056_v25 = vld [vmem:[%s3393_s23 + $0x1780] sm:$0xff]  ;;  %1596 = vmatpush.msra.mxu2 %v988_v24 }
  0xd5   : > { %v856_v27 = vld [vmem:[%s3393_s23 + $0x1140] sm:$0xff]  ;;  %1615 = vmatpush.msra.mxu3 %v1056_v25 }
  0xd6   : > { %v924_v28 = vld [vmem:[%s3393_s23 + $0x1360] sm:$0xff]  ;;  %1557 = vmatpush.msra.mxu0 %v856_v27 }
  0xd7   : > { %v984_v29 = vld [vmem:[%s3393_s23 + $0x1540] sm:$0xff]  ;;  %1576 = vmatpush.msra.mxu1 %v924_v28 }
  0xd8   : > { %v1052_v30 = vld [vmem:[%s3393_s23 + $0x1760] sm:$0xff]  ;;  %1597 = vmatpush.msra.mxu2 %v984_v29 }
  0xd9   : > { %v852_v31 = vld [vmem:[%s3393_s23 + $0x1120] sm:$0xff]  ;;  %1616 = vmatpush.msra.mxu3 %v1052_v30 }
  0xda   : > { %v920_v32 = vld [vmem:[%s3393_s23 + $0x1340] sm:$0xff]  ;;  %1558 = vmatpush.msra.mxu0 %v852_v31 }
  0xdb   : > { %v980_v33 = vld [vmem:[%s3393_s23 + $0x1520] sm:$0xff]  ;;  %1577 = vmatpush.msra.mxu1 %v920_v32 }
  0xdc   : > { %v1048_v34 = vld [vmem:[%s3393_s23 + $0x1740] sm:$0xff]  ;;  %1598 = vmatpush.msra.mxu2 %v980_v33 }
  0xdd   : > { %v848_v35 = vld [vmem:[%s3393_s23 + $0x1100] sm:$0xff]  ;;  %1617 = vmatpush.msra.mxu3 %v1048_v34 }
  0xde   : > { %v916_v36 = vld [vmem:[%s3393_s23 + $0x1320] sm:$0xff]  ;;  %1559 = vmatpush.msra.mxu0 %v848_v35 }
  0xdf   : > { %v976_v37 = vld [vmem:[%s3393_s23 + $0x1500] sm:$0xff]  ;;  %1578 = vmatpush.msra.mxu1 %v916_v36 }
  0xe0   : > { %v1044_v38 = vld [vmem:[%s3393_s23 + $0x1720] sm:$0xff]  ;;  %1599 = vmatpush.msra.mxu2 %v976_v37 }
  0xe1   : > { %v844_v39 = vld [vmem:[%s3393_s23 + $0x10e0] sm:$0xff]  ;;  %1618 = vmatpush.msra.mxu3 %v1044_v38 }
  0xe2   : > { %v912_v40 = vld [vmem:[%s3393_s23 + $0x1300] sm:$0xff]  ;;  %1560 = vmatpush.msra.mxu0 %v844_v39 }
  0xe3   : > { %v972_v41 = vld [vmem:[%s3393_s23 + $0x14e0] sm:$0xff]  ;;  %1579 = vmatpush.msra.mxu1 %v912_v40 }
  0xe4   : > { %v1040_v42 = vld [vmem:[%s3393_s23 + $0x1700] sm:$0xff]  ;;  %1600 = vmatpush.msra.mxu2 %v972_v41 }
  0xe5   : > { %v840_v43 = vld [vmem:[%s3393_s23 + $0x10c0] sm:$0xff]  ;;  %1619 = vmatpush.msra.mxu3 %v1040_v42 }
  0xe6   : > { %v908_v44 = vld [vmem:[%s3393_s23 + $0x12e0] sm:$0xff]  ;;  %1561 = vmatpush.msra.mxu0 %v840_v43 }
  0xe7   : > { %v968_v45 = vld [vmem:[%s3393_s23 + $0x14c0] sm:$0xff]  ;;  %1580 = vmatpush.msra.mxu1 %v908_v44 }
  0xe8   : > { %v1036_v46 = vld [vmem:[%s3393_s23 + $0x16e0] sm:$0xff]  ;;  %1601 = vmatpush.msra.mxu2 %v968_v45 }
  0xe9   : > { %v836_v47 = vld [vmem:[%s3393_s23 + $0x10a0] sm:$0xff]  ;;  %1620 = vmatpush.msra.mxu3 %v1036_v46 }
  0xea   : > { %v904_v48 = vld [vmem:[%s3393_s23 + $0x12c0] sm:$0xff]  ;;  %1562 = vmatpush.msra.mxu0 %v836_v47 }
  0xeb   : > { %v964_v49 = vld [vmem:[%s3393_s23 + $0x14a0] sm:$0xff]  ;;  %1581 = vmatpush.msra.mxu1 %v904_v48 }
  0xec   : > { %v1032_v50 = vld [vmem:[%s3393_s23 + $0x16c0] sm:$0xff]  ;;  %1602 = vmatpush.msra.mxu2 %v964_v49 }
  0xed   : > { %v832_v51 = vld [vmem:[%s3393_s23 + $0x1080] sm:$0xff]  ;;  %1621 = vmatpush.msra.mxu3 %v1032_v50 }
  0xee   : > { %v900_v52 = vld [vmem:[%s3393_s23 + $0x12a0] sm:$0xff]  ;;  %1563 = vmatpush.msra.mxu0 %v832_v51 }
  0xef   : > { %v960_v53 = vld [vmem:[%s3393_s23 + $0x1480] sm:$0xff]  ;;  %1582 = vmatpush.msra.mxu1 %v900_v52 }
  0xf0   : > { %v1028_v54 = vld [vmem:[%s3393_s23 + $0x16a0] sm:$0xff]  ;;  %1603 = vmatpush.msra.mxu2 %v960_v53 }
  0xf1   : > { %v828_v55 = vld [vmem:[%s3393_s23 + $0x1060] sm:$0xff]  ;;  %1622 = vmatpush.msra.mxu3 %v1028_v54 }
  0xf2   : > { %v896_v56 = vld [vmem:[%s3393_s23 + $0x1280] sm:$0xff]  ;;  %1564 = vmatpush.msra.mxu0 %v828_v55 }
  0xf3   : > { %v956_v57 = vld [vmem:[%s3393_s23 + $0x1460] sm:$0xff]  ;;  %1583 = vmatpush.msra.mxu1 %v896_v56 }
  0xf4   : > { %v1024_v58 = vld [vmem:[%s3393_s23 + $0x1680] sm:$0xff]  ;;  %1604 = vmatpush.msra.mxu2 %v956_v57 }
  0xf5   : > { %v824_v59 = vld [vmem:[%s3393_s23 + $0x1040] sm:$0xff]  ;;  %1623 = vmatpush.msra.mxu3 %v1024_v58 }
  0xf6   : > { %v892_v60 = vld [vmem:[%s3393_s23 + $0x1260] sm:$0xff]  ;;  %1565 = vmatpush.msra.mxu0 %v824_v59 }
  0xf7   : > { %v952_v61 = vld [vmem:[%s3393_s23 + $0x1440] sm:$0xff]  ;;  %1584 = vmatpush.msra.mxu1 %v892_v60 }
  0xf8   : > { %v1020_v62 = vld [vmem:[%s3393_s23 + $0x1660] sm:$0xff]  ;;  %1605 = vmatpush.msra.mxu2 %v952_v61 }
  0xf9   : > { %v820_v63 = vld [vmem:[%s3393_s23 + $0x1020] sm:$0xff]  ;;  %1624 = vmatpush.msra.mxu3 %v1020_v62 }
  0xfa   : > { %v888_v0 = vld [vmem:[%s3393_s23 + $0x1240] sm:$0xff]  ;;  %1566 = vmatpush.msra.mxu0 %v820_v63 }
  0xfb   : > { %v948_v1 = vld [vmem:[%s3393_s23 + $0x1420] sm:$0xff]  ;;  %1585 = vmatpush.msra.mxu1 %v888_v0 }
  0xfc   : > { %v1016_v2 = vld [vmem:[%s3393_s23 + $0x1640] sm:$0xff]  ;;  %1606 = vmatpush.msra.mxu2 %v948_v1 }
  0xfd   : > { %v816_v3 = vld [vmem:[%s3393_s23 + $0x1000] sm:$0xff]  ;;  %1625 = vmatpush.msra.mxu3 %v1016_v2 }
  0xfe   : > { %v884_v4 = vld [vmem:[%s3393_s23 + $0x1220] sm:$0xff]  ;;  %1567 = vmatpush.msra.mxu0 %v816_v3 }
  0xff   : > { %v944_v5 = vld [vmem:[%s3393_s23 + $0x1400] sm:$0xff]  ;;  %1586 = vmatpush.msra.mxu1 %v884_v4 }
 0x100   : > { %v1012_v6 = vld [vmem:[%s3393_s23 + $0x1620] sm:$0xff]  ;;  %1607 = vmatpush.msra.mxu2 %v944_v5 }
 0x101   : > { %v295_v7 = vld [vmem:[%s3417_s10 + $0x40] sm:$0xff]  ;;  %1626 = vmatpush.msra.mxu3 %v1012_v6  ;;  %1608 = vmatmul.f32.vlgmr.msra.gmra.mxu2 %v297_v8 }
 0x102   : > { %v1132_v9 = vld [vmem:[%s3393_s23 + $0x19e0] sm:$0xff]  ;;  %1568 = vmatmul.f32.vlgmr.msra.gmra.mxu0 %v295_v7 }
 0x103   : > { %v1260_v10 = vld [vmem:[%s3393_s23 + $0x1de0] sm:$0xff]  ;;  %1632 = vmatpush.msrb.mxu0 %v1132_v9 }
 0x104   : > { %v880_v11 = vld [vmem:[%s3393_s23 + $0x1200] sm:$0xff]  ;;  %1672 = vmatpush.msrb.mxu2 %v1260_v10 }
 0x105   : > { %v1008_v12 = vld [vmem:[%s3393_s23 + $0x1600] sm:$0xff]  ;;  %1587 = vmatpush.msra.mxu1 %v880_v11 }
 0x106   : > { %v1128_v15 = vld [vmem:[%s3393_s23 + $0x19c0] sm:$0xff]  ;;  %1627 = vmatpush.msra.mxu3 %v1008_v12  ;;  %1588 = vmatmul.f32.vlgmr.msra.gmra.mxu1 %v296_v13  ;;  %v301_v12 = vld [vmem:[%s3417_s10 + $0x70] sm:$0xff] }
 0x107   : > { %v1196_v16 = vld [vmem:[%s3393_s23 + $0x1be0] sm:$0xff]  ;;  %1628 = vmatmul.f32.vlgmr.msra.gmra.mxu3 %v298_v14  ;;  %1633 = vmatpush.msrb.mxu0 %v1128_v15  ;;  %v429_v14 = vld [vmem:[%s3393_s23 + $0x3e8] sm:$0xff] }
 0x108   : > { %v1256_v17 = vld [vmem:[%s3393_s23 + $0x1dc0] sm:$0xff]  ;;  %1652 = vmatpush.msrb.mxu1 %v1196_v16 }
 0x109   : > { %v1324_v18 = vld [vmem:[%s3393_s23 + $0x1fe0] sm:$0xff]  ;;  %1673 = vmatpush.msrb.mxu2 %v1256_v17  ;;  %v300_v17 = vld [vmem:[%s3417_s10 + $0x68] sm:$0xff] }
 0x10a   : > { %v1124_v19 = vld [vmem:[%s3393_s23 + $0x19a0] sm:$0xff]  ;;  %1692 = vmatpush.msrb.mxu3 %v1324_v18  ;;  %v302_v18 = vld [vmem:[%s3417_s10 + $0x78] sm:$0xff] }
 0x10b   : > { %v1192_v20 = vld [vmem:[%s3393_s23 + $0x1bc0] sm:$0xff]  ;;  %1634 = vmatpush.msrb.mxu0 %v1124_v19 }
 0x10c   : > { %v1252_v21 = vld [vmem:[%s3393_s23 + $0x1da0] sm:$0xff]  ;;  %1653 = vmatpush.msrb.mxu1 %v1192_v20  ;;  %v365_v20 = vld [vmem:[%s3393_s23 + $0x1e8] sm:$0xff] }
 0x10d   : > { %v1320_v22 = vld [vmem:[%s3393_s23 + $0x1fc0] sm:$0xff]  ;;  %1674 = vmatpush.msrb.mxu2 %v1252_v21  ;;  %v425_v21 = vld [vmem:[%s3393_s23 + $0x3c8] sm:$0xff] }
 0x10e   : > { %v1120_v23 = vld [vmem:[%s3393_s23 + $0x1980] sm:$0xff]  ;;  %1693 = vmatpush.msrb.mxu3 %v1320_v22  ;;  %v493_v22 = vld [vmem:[%s3393_s23 + $0x5e8] sm:$0xff] }
 0x10f   : > { %v1188_v24 = vld [vmem:[%s3393_s23 + $0x1ba0] sm:$0xff]  ;;  %1635 = vmatpush.msrb.mxu0 %v1120_v23 }
 0x110   : > { %v1248_v25 = vld [vmem:[%s3393_s23 + $0x1d80] sm:$0xff]  ;;  %1654 = vmatpush.msrb.mxu1 %v1188_v24  ;;  %v361_v24 = vld [vmem:[%s3393_s23 + $0x1c8] sm:$0xff] }
 0x111   : > { %v1316_v26 = vld [vmem:[%s3393_s23 + $0x1fa0] sm:$0xff]  ;;  %1675 = vmatpush.msrb.mxu2 %v1248_v25  ;;  %v421_v25 = vld [vmem:[%s3393_s23 + $0x3a8] sm:$0xff] }
 0x112   : > { %v1116_v27 = vld [vmem:[%s3393_s23 + $0x1960] sm:$0xff]  ;;  %1694 = vmatpush.msrb.mxu3 %v1316_v26  ;;  %v489_v26 = vld [vmem:[%s3393_s23 + $0x5c8] sm:$0xff] }
 0x113   : > { %v1184_v28 = vld [vmem:[%s3393_s23 + $0x1b80] sm:$0xff]  ;;  %1636 = vmatpush.msrb.mxu0 %v1116_v27 }
 0x114   : > { %v1244_v29 = vld [vmem:[%s3393_s23 + $0x1d60] sm:$0xff]  ;;  %1655 = vmatpush.msrb.mxu1 %v1184_v28  ;;  %v357_v28 = vld [vmem:[%s3393_s23 + $0x1a8] sm:$0xff] }
 0x115   : > { %v1312_v30 = vld [vmem:[%s3393_s23 + $0x1f80] sm:$0xff]  ;;  %1676 = vmatpush.msrb.mxu2 %v1244_v29  ;;  %v417_v29 = vld [vmem:[%s3393_s23 + $0x388] sm:$0xff] }
 0x116   : > { %v1112_v31 = vld [vmem:[%s3393_s23 + $0x1940] sm:$0xff]  ;;  %1695 = vmatpush.msrb.mxu3 %v1312_v30  ;;  %v485_v30 = vld [vmem:[%s3393_s23 + $0x5a8] sm:$0xff] }
 0x117   : > { %v1180_v32 = vld [vmem:[%s3393_s23 + $0x1b60] sm:$0xff]  ;;  %1637 = vmatpush.msrb.mxu0 %v1112_v31 }
 0x118   : > { %v1240_v33 = vld [vmem:[%s3393_s23 + $0x1d40] sm:$0xff]  ;;  %1656 = vmatpush.msrb.mxu1 %v1180_v32  ;;  %v353_v32 = vld [vmem:[%s3393_s23 + $0x188] sm:$0xff] }
 0x119   : > { %v1308_v34 = vld [vmem:[%s3393_s23 + $0x1f60] sm:$0xff]  ;;  %1677 = vmatpush.msrb.mxu2 %v1240_v33  ;;  %v413_v33 = vld [vmem:[%s3393_s23 + $0x368] sm:$0xff] }
 0x11a   : > { %v1108_v35 = vld [vmem:[%s3393_s23 + $0x1920] sm:$0xff]  ;;  %1696 = vmatpush.msrb.mxu3 %v1308_v34  ;;  %v481_v34 = vld [vmem:[%s3393_s23 + $0x588] sm:$0xff] }
 0x11b   : > { %v1176_v36 = vld [vmem:[%s3393_s23 + $0x1b40] sm:$0xff]  ;;  %1638 = vmatpush.msrb.mxu0 %v1108_v35 }
 0x11c   : > { %v1236_v37 = vld [vmem:[%s3393_s23 + $0x1d20] sm:$0xff]  ;;  %1657 = vmatpush.msrb.mxu1 %v1176_v36  ;;  %v349_v36 = vld [vmem:[%s3393_s23 + $0x168] sm:$0xff] }
 0x11d   : > { %v1304_v38 = vld [vmem:[%s3393_s23 + $0x1f40] sm:$0xff]  ;;  %1678 = vmatpush.msrb.mxu2 %v1236_v37  ;;  %v409_v37 = vld [vmem:[%s3393_s23 + $0x348] sm:$0xff] }
 0x11e   : > { %v1104_v39 = vld [vmem:[%s3393_s23 + $0x1900] sm:$0xff]  ;;  %1697 = vmatpush.msrb.mxu3 %v1304_v38  ;;  %v477_v38 = vld [vmem:[%s3393_s23 + $0x568] sm:$0xff] }
 0x11f   : > { %v1172_v40 = vld [vmem:[%s3393_s23 + $0x1b20] sm:$0xff]  ;;  %1639 = vmatpush.msrb.mxu0 %v1104_v39 }
 0x120   : > { %v1232_v41 = vld [vmem:[%s3393_s23 + $0x1d00] sm:$0xff]  ;;  %1658 = vmatpush.msrb.mxu1 %v1172_v40  ;;  %v345_v40 = vld [vmem:[%s3393_s23 + $0x148] sm:$0xff] }
 0x121   : > { %v1300_v42 = vld [vmem:[%s3393_s23 + $0x1f20] sm:$0xff]  ;;  %1679 = vmatpush.msrb.mxu2 %v1232_v41  ;;  %v405_v41 = vld [vmem:[%s3393_s23 + $0x328] sm:$0xff] }
 0x122   : > { %v1100_v43 = vld [vmem:[%s3393_s23 + $0x18e0] sm:$0xff]  ;;  %1698 = vmatpush.msrb.mxu3 %v1300_v42  ;;  %v473_v42 = vld [vmem:[%s3393_s23 + $0x548] sm:$0xff] }
 0x123   : > { %v1168_v44 = vld [vmem:[%s3393_s23 + $0x1b00] sm:$0xff]  ;;  %1640 = vmatpush.msrb.mxu0 %v1100_v43 }
 0x124   : > { %v1228_v45 = vld [vmem:[%s3393_s23 + $0x1ce0] sm:$0xff]  ;;  %1659 = vmatpush.msrb.mxu1 %v1168_v44  ;;  %v341_v44 = vld [vmem:[%s3393_s23 + $0x128] sm:$0xff] }
 0x125   : > { %v1296_v46 = vld [vmem:[%s3393_s23 + $0x1f00] sm:$0xff]  ;;  %1680 = vmatpush.msrb.mxu2 %v1228_v45  ;;  %v401_v45 = vld [vmem:[%s3393_s23 + $0x308] sm:$0xff] }
 0x126   : > { %v1096_v47 = vld [vmem:[%s3393_s23 + $0x18c0] sm:$0xff]  ;;  %1699 = vmatpush.msrb.mxu3 %v1296_v46  ;;  %v469_v46 = vld [vmem:[%s3393_s23 + $0x528] sm:$0xff] }
 0x127   : > { %v1164_v48 = vld [vmem:[%s3393_s23 + $0x1ae0] sm:$0xff]  ;;  %1641 = vmatpush.msrb.mxu0 %v1096_v47 }
 0x128   : > { %v1224_v49 = vld [vmem:[%s3393_s23 + $0x1cc0] sm:$0xff]  ;;  %1660 = vmatpush.msrb.mxu1 %v1164_v48  ;;  %v337_v48 = vld [vmem:[%s3393_s23 + $0x108] sm:$0xff] }
 0x129   : > { %v1292_v50 = vld [vmem:[%s3393_s23 + $0x1ee0] sm:$0xff]  ;;  %1681 = vmatpush.msrb.mxu2 %v1224_v49  ;;  %v397_v49 = vld [vmem:[%s3393_s23 + $0x2e8] sm:$0xff] }
 0x12a   : > { %v1092_v51 = vld [vmem:[%s3393_s23 + $0x18a0] sm:$0xff]  ;;  %1700 = vmatpush.msrb.mxu3 %v1292_v50  ;;  %v465_v50 = vld [vmem:[%s3393_s23 + $0x508] sm:$0xff] }
 0x12b   : > { %v1160_v52 = vld [vmem:[%s3393_s23 + $0x1ac0] sm:$0xff]  ;;  %1642 = vmatpush.msrb.mxu0 %v1092_v51 }
 0x12c   : > { %v1220_v53 = vld [vmem:[%s3393_s23 + $0x1ca0] sm:$0xff]  ;;  %1661 = vmatpush.msrb.mxu1 %v1160_v52  ;;  %v333_v52 = vld [vmem:[%s3393_s23 + $0xe8] sm:$0xff] }
 0x12d   : > { %v1288_v54 = vld [vmem:[%s3393_s23 + $0x1ec0] sm:$0xff]  ;;  %1682 = vmatpush.msrb.mxu2 %v1220_v53  ;;  %v393_v53 = vld [vmem:[%s3393_s23 + $0x2c8] sm:$0xff] }
 0x12e   : > { %v1088_v55 = vld [vmem:[%s3393_s23 + $0x1880] sm:$0xff]  ;;  %1701 = vmatpush.msrb.mxu3 %v1288_v54  ;;  %v461_v54 = vld [vmem:[%s3393_s23 + $0x4e8] sm:$0xff] }
 0x12f   : > { %v1156_v56 = vld [vmem:[%s3393_s23 + $0x1aa0] sm:$0xff]  ;;  %1643 = vmatpush.msrb.mxu0 %v1088_v55 }
 0x130   : > { %v1216_v57 = vld [vmem:[%s3393_s23 + $0x1c80] sm:$0xff]  ;;  %1662 = vmatpush.msrb.mxu1 %v1156_v56  ;;  %v329_v56 = vld [vmem:[%s3393_s23 + $0xc8] sm:$0xff] }
 0x131   : > { %v1284_v58 = vld [vmem:[%s3393_s23 + $0x1ea0] sm:$0xff]  ;;  %1683 = vmatpush.msrb.mxu2 %v1216_v57  ;;  %v389_v57 = vld [vmem:[%s3393_s23 + $0x2a8] sm:$0xff] }
 0x132   : > { %v1084_v59 = vld [vmem:[%s3393_s23 + $0x1860] sm:$0xff]  ;;  %1702 = vmatpush.msrb.mxu3 %v1284_v58  ;;  %v457_v58 = vld [vmem:[%s3393_s23 + $0x4c8] sm:$0xff] }
 0x133   : > { %v1152_v60 = vld [vmem:[%s3393_s23 + $0x1a80] sm:$0xff]  ;;  %1644 = vmatpush.msrb.mxu0 %v1084_v59 }
 0x134   : > { %v1212_v61 = vld [vmem:[%s3393_s23 + $0x1c60] sm:$0xff]  ;;  %1663 = vmatpush.msrb.mxu1 %v1152_v60  ;;  %v325_v60 = vld [vmem:[%s3393_s23 + $0xa8] sm:$0xff] }
 0x135   : > { %v1280_v62 = vld [vmem:[%s3393_s23 + $0x1e80] sm:$0xff]  ;;  %1684 = vmatpush.msrb.mxu2 %v1212_v61  ;;  %v385_v61 = vld [vmem:[%s3393_s23 + $0x288] sm:$0xff] }
 0x136   : > { %v1080_v63 = vld [vmem:[%s3393_s23 + $0x1840] sm:$0xff]  ;;  %1703 = vmatpush.msrb.mxu3 %v1280_v62  ;;  %v453_v62 = vld [vmem:[%s3393_s23 + $0x4a8] sm:$0xff] }
 0x137   : > { %v1148_v0 = vld [vmem:[%s3393_s23 + $0x1a60] sm:$0xff]  ;;  %1645 = vmatpush.msrb.mxu0 %v1080_v63 }
 0x138   : > { %v1208_v1 = vld [vmem:[%s3393_s23 + $0x1c40] sm:$0xff]  ;;  %1664 = vmatpush.msrb.mxu1 %v1148_v0  ;;  %v321_v0 = vld [vmem:[%s3393_s23 + $0x88] sm:$0xff] }
 0x139   : > { %v1276_v2 = vld [vmem:[%s3393_s23 + $0x1e60] sm:$0xff]  ;;  %1685 = vmatpush.msrb.mxu2 %v1208_v1  ;;  %v381_v1 = vld [vmem:[%s3393_s23 + $0x268] sm:$0xff] }
 0x13a   : > { %v1076_v3 = vld [vmem:[%s3393_s23 + $0x1820] sm:$0xff]  ;;  %1704 = vmatpush.msrb.mxu3 %v1276_v2  ;;  %v449_v2 = vld [vmem:[%s3393_s23 + $0x488] sm:$0xff] }
 0x13b   : > { %v1144_v4 = vld [vmem:[%s3393_s23 + $0x1a40] sm:$0xff]  ;;  %1646 = vmatpush.msrb.mxu0 %v1076_v3 }
 0x13c   : > { %v1204_v5 = vld [vmem:[%s3393_s23 + $0x1c20] sm:$0xff]  ;;  %1665 = vmatpush.msrb.mxu1 %v1144_v4  ;;  %v317_v4 = vld [vmem:[%s3393_s23 + $0x68] sm:$0xff] }
 0x13d   : > { %v1272_v6 = vld [vmem:[%s3393_s23 + $0x1e40] sm:$0xff]  ;;  %1686 = vmatpush.msrb.mxu2 %v1204_v5  ;;  %v377_v5 = vld [vmem:[%s3393_s23 + $0x248] sm:$0xff] }
 0x13e   : > { %v1072_v7 = vld [vmem:[%s3393_s23 + $0x1800] sm:$0xff]  ;;  %1705 = vmatpush.msrb.mxu3 %v1272_v6  ;;  %v445_v6 = vld [vmem:[%s3393_s23 + $0x468] sm:$0xff] }
 0x13f   : > { %v1140_v8 = vld [vmem:[%s3393_s23 + $0x1a20] sm:$0xff]  ;;  %1647 = vmatpush.msrb.mxu0 %v1072_v7 }
 0x140   : > { %v1200_v9 = vld [vmem:[%s3393_s23 + $0x1c00] sm:$0xff]  ;;  %1666 = vmatpush.msrb.mxu1 %v1140_v8  ;;  %v313_v8 = vld [vmem:[%s3393_s23 + $0x48] sm:$0xff] }
 0x141   : > { %v1268_v10 = vld [vmem:[%s3393_s23 + $0x1e20] sm:$0xff]  ;;  %1687 = vmatpush.msrb.mxu2 %v1200_v9  ;;  %v373_v9 = vld [vmem:[%s3393_s23 + $0x228] sm:$0xff] }
 0x142   : > { %v299_v11 = vld [vmem:[%s3417_s10 + $0x60] sm:$0xff]  ;;  %1706 = vmatpush.msrb.mxu3 %v1268_v10  ;;  %1688 = vmatmul.f32.vlgmr.msrb.gmra.mxu2 %v301_v12  ;;  %v441_v10 = vld [vmem:[%s3393_s23 + $0x448] sm:$0xff] }
 0x143   : > { %v1388_v13 = vld [vmem:[%s3393_s23 + $0x21e0] sm:$0xff]  ;;  %1648 = vmatmul.f32.vlgmr.msrb.gmra.mxu0 %v299_v11  ;;  %1752 = vmatpush.msra.mxu2 %v429_v14  ;;  %v309_v12 = vld [vmem:[%s3393_s23 + $0x28] sm:$0xff] }
 0x144   : > { %v1136_v15 = vld [vmem:[%s3393_s23 + $0x1a00] sm:$0xff]  ;;  %1712 = vmatpush.msra.mxu0 %v1388_v13  ;;  %v369_v13 = vld [vmem:[%s3393_s23 + $0x208] sm:$0xff] }
 0x145   : > { %v1264_v16 = vld [vmem:[%s3393_s23 + $0x1e00] sm:$0xff]  ;;  %1667 = vmatpush.msrb.mxu1 %v1136_v15  ;;  %1753 = vmatpush.msra.mxu2 %v425_v21  ;;  %v437_v14 = vld [vmem:[%s3393_s23 + $0x428] sm:$0xff] }
 0x146   : > { %v1384_v19 = vld [vmem:[%s3393_s23 + $0x21c0] sm:$0xff]  ;;  %1707 = vmatpush.msrb.mxu3 %v1264_v16  ;;  %1668 = vmatmul.f32.vlgmr.msrb.gmra.mxu1 %v300_v17  ;;  %v685_v16 = vld [vmem:[%s3393_s23 + $0xbe8] sm:$0xff] }
 0x147   : > { %1708 = vmatmul.f32.vlgmr.msrb.gmra.mxu3 %v302_v18  ;;  %v1380_v23 = vld [vmem:[%s3393_s23 + $0x21a0] sm:$0xff]  ;;  %1713 = vmatpush.msra.mxu0 %v1384_v19  ;;  %v557_v17 = vld [vmem:[%s3393_s23 + $0x7e8] sm:$0xff] }
 0x148   : > { %1732 = vmatpush.msra.mxu1 %v365_v20  ;;  %1772 = vmatpush.msra.mxu3 %v493_v22  ;;  %v1376_v27 = vld [vmem:[%s3393_s23 + $0x2180] sm:$0xff]  ;;  %v305_v18 = vld [vmem:[%s3393_s23 + $0x8] sm:$0xff] }
 0x149   : > { %1714 = vmatpush.msra.mxu0 %v1380_v23  ;;  %1754 = vmatpush.msra.mxu2 %v421_v25  ;;  %v1372_v31 = vld [vmem:[%s3393_s23 + $0x2160] sm:$0xff]  ;;  %v433_v19 = vld [vmem:[%s3393_s23 + $0x408] sm:$0xff] }
 0x14a   : > { %1733 = vmatpush.msra.mxu1 %v361_v24  ;;  %1773 = vmatpush.msra.mxu3 %v489_v26  ;;  %v1368_v35 = vld [vmem:[%s3393_s23 + $0x2140] sm:$0xff]  ;;  %v621_v20 = vld [vmem:[%s3393_s23 + $0x9e8] sm:$0xff] }
 0x14b   : > { %1715 = vmatpush.msra.mxu0 %v1376_v27  ;;  %1755 = vmatpush.msra.mxu2 %v417_v29  ;;  %v1364_v39 = vld [vmem:[%s3393_s23 + $0x2120] sm:$0xff]  ;;  %v553_v21 = vld [vmem:[%s3393_s23 + $0x7c8] sm:$0xff] }
 0x14c   : > { %1734 = vmatpush.msra.mxu1 %v357_v28  ;;  %1774 = vmatpush.msra.mxu3 %v485_v30  ;;  %v1360_v43 = vld [vmem:[%s3393_s23 + $0x2100] sm:$0xff]  ;;  %v681_v22 = vld [vmem:[%s3393_s23 + $0xbc8] sm:$0xff] }
 0x14d   : > { %1716 = vmatpush.msra.mxu0 %v1372_v31  ;;  %1756 = vmatpush.msra.mxu2 %v413_v33  ;;  %v1356_v47 = vld [vmem:[%s3393_s23 + $0x20e0] sm:$0xff]  ;;  %v749_v23 = vld [vmem:[%s3393_s23 + $0xde8] sm:$0xff] }
 0x14e   : > { %1735 = vmatpush.msra.mxu1 %v353_v32  ;;  %1775 = vmatpush.msra.mxu3 %v481_v34  ;;  %v1352_v51 = vld [vmem:[%s3393_s23 + $0x20c0] sm:$0xff]  ;;  %v617_v24 = vld [vmem:[%s3393_s23 + $0x9c8] sm:$0xff] }
 0x14f   : > { %1717 = vmatpush.msra.mxu0 %v1368_v35  ;;  %1757 = vmatpush.msra.mxu2 %v409_v37  ;;  %v1348_v55 = vld [vmem:[%s3393_s23 + $0x20a0] sm:$0xff]  ;;  %v549_v25 = vld [vmem:[%s3393_s23 + $0x7a8] sm:$0xff] }
 0x150   : > { %1736 = vmatpush.msra.mxu1 %v349_v36  ;;  %1776 = vmatpush.msra.mxu3 %v477_v38  ;;  %v1344_v59 = vld [vmem:[%s3393_s23 + $0x2080] sm:$0xff]  ;;  %v677_v26 = vld [vmem:[%s3393_s23 + $0xba8] sm:$0xff] }
 0x151   : > { %1718 = vmatpush.msra.mxu0 %v1364_v39  ;;  %1758 = vmatpush.msra.mxu2 %v405_v41  ;;  %v1340_v63 = vld [vmem:[%s3393_s23 + $0x2060] sm:$0xff]  ;;  %v745_v27 = vld [vmem:[%s3393_s23 + $0xdc8] sm:$0xff] }
 0x152   : > { %1737 = vmatpush.msra.mxu1 %v345_v40  ;;  %1777 = vmatpush.msra.mxu3 %v473_v42  ;;  %v1336_v3 = vld [vmem:[%s3393_s23 + $0x2040] sm:$0xff]  ;;  %v613_v28 = vld [vmem:[%s3393_s23 + $0x9a8] sm:$0xff] }
 0x153   : > { %1719 = vmatpush.msra.mxu0 %v1360_v43  ;;  %1759 = vmatpush.msra.mxu2 %v401_v45  ;;  %v1332_v7 = vld [vmem:[%s3393_s23 + $0x2020] sm:$0xff]  ;;  %v545_v29 = vld [vmem:[%s3393_s23 + $0x788] sm:$0xff] }
 0x154   : > { %1738 = vmatpush.msra.mxu1 %v341_v44  ;;  %1778 = vmatpush.msra.mxu3 %v469_v46  ;;  %v1328_v11 = vld [vmem:[%s3393_s23 + $0x2000] sm:$0xff]  ;;  %v673_v30 = vld [vmem:[%s3393_s23 + $0xb88] sm:$0xff] }
 0x155   : > { %1720 = vmatpush.msra.mxu0 %v1356_v47  ;;  %1760 = vmatpush.msra.mxu2 %v397_v49  ;;  %v303_v15 = vld [vmem:[%s3417_s10 + $0x80] sm:$0xff]  ;;  %v741_v31 = vld [vmem:[%s3393_s23 + $0xda8] sm:$0xff] }
 0x156   : > { %1739 = vmatpush.msra.mxu1 %v337_v48  ;;  %1779 = vmatpush.msra.mxu3 %v465_v50  ;;  %v609_v32 = vld [vmem:[%s3393_s23 + $0x988] sm:$0xff] }
 0x157   : > { %1721 = vmatpush.msra.mxu0 %v1352_v51  ;;  %1761 = vmatpush.msra.mxu2 %v393_v53  ;;  %v541_v33 = vld [vmem:[%s3393_s23 + $0x768] sm:$0xff] }
 0x158   : > { %1740 = vmatpush.msra.mxu1 %v333_v52  ;;  %1780 = vmatpush.msra.mxu3 %v461_v54  ;;  %v669_v34 = vld [vmem:[%s3393_s23 + $0xb68] sm:$0xff] }
 0x159   : > { %1722 = vmatpush.msra.mxu0 %v1348_v55  ;;  %1762 = vmatpush.msra.mxu2 %v389_v57  ;;  %v737_v35 = vld [vmem:[%s3393_s23 + $0xd88] sm:$0xff] }
 0x15a   : > { %1741 = vmatpush.msra.mxu1 %v329_v56  ;;  %1781 = vmatpush.msra.mxu3 %v457_v58  ;;  %v605_v36 = vld [vmem:[%s3393_s23 + $0x968] sm:$0xff] }
 0x15b   : > { %1723 = vmatpush.msra.mxu0 %v1344_v59  ;;  %1763 = vmatpush.msra.mxu2 %v385_v61  ;;  %v537_v37 = vld [vmem:[%s3393_s23 + $0x748] sm:$0xff] }
 0x15c   : > { %1742 = vmatpush.msra.mxu1 %v325_v60  ;;  %1782 = vmatpush.msra.mxu3 %v453_v62  ;;  %v665_v38 = vld [vmem:[%s3393_s23 + $0xb48] sm:$0xff] }
 0x15d   : > { %1724 = vmatpush.msra.mxu0 %v1340_v63  ;;  %1764 = vmatpush.msra.mxu2 %v381_v1  ;;  %v733_v39 = vld [vmem:[%s3393_s23 + $0xd68] sm:$0xff] }
 0x15e   : > { %1743 = vmatpush.msra.mxu1 %v321_v0  ;;  %1783 = vmatpush.msra.mxu3 %v449_v2  ;;  %v601_v40 = vld [vmem:[%s3393_s23 + $0x948] sm:$0xff] }
 0x15f   : > { %1725 = vmatpush.msra.mxu0 %v1336_v3  ;;  %1765 = vmatpush.msra.mxu2 %v377_v5  ;;  %v533_v41 = vld [vmem:[%s3393_s23 + $0x728] sm:$0xff] }
 0x160   : > { %1744 = vmatpush.msra.mxu1 %v317_v4  ;;  %1784 = vmatpush.msra.mxu3 %v445_v6  ;;  %v661_v42 = vld [vmem:[%s3393_s23 + $0xb28] sm:$0xff] }
 0x161   : > { %1726 = vmatpush.msra.mxu0 %v1332_v7  ;;  %1766 = vmatpush.msra.mxu2 %v373_v9  ;;  %v729_v43 = vld [vmem:[%s3393_s23 + $0xd48] sm:$0xff] }
 0x162   : > { %1745 = vmatpush.msra.mxu1 %v313_v8  ;;  %1785 = vmatpush.msra.mxu3 %v441_v10  ;;  %v597_v44 = vld [vmem:[%s3393_s23 + $0x928] sm:$0xff] }
 0x163   : > { %1727 = vmatpush.msra.mxu0 %v1328_v11  ;;  %1767 = vmatpush.msra.mxu2 %v369_v13  ;;  %v529_v45 = vld [vmem:[%s3393_s23 + $0x708] sm:$0xff] }
 0x164   : > { %1746 = vmatpush.msra.mxu1 %v309_v12  ;;  %1786 = vmatpush.msra.mxu3 %v437_v14  ;;  %v657_v46 = vld [vmem:[%s3393_s23 + $0xb08] sm:$0xff] }
 0x165   : > { %1728 = vmatmul.f32.vlgmr.msra.gmra.mxu0 %v303_v15  ;;  %1832 = vmatpush.msrb.mxu2 %v685_v16  ;;  %v725_v47 = vld [vmem:[%s3393_s23 + $0xd28] sm:$0xff] }
 0x166   : > { %1792 = vmatpush.msrb.mxu0 %v557_v17  ;;  %1747 = vmatpush.msra.mxu1 %v305_v18  ;;  %v593_v48 = vld [vmem:[%s3393_s23 + $0x908] sm:$0xff] }
 0x167   : > { %1787 = vmatpush.msra.mxu3 %v433_v19  ;;  %1833 = vmatpush.msrb.mxu2 %v681_v22  ;;  %v525_v49 = vld [vmem:[%s3393_s23 + $0x6e8] sm:$0xff] }
 0x168   : > { %1812 = vmatpush.msrb.mxu1 %v621_v20  ;;  %1793 = vmatpush.msrb.mxu0 %v553_v21  ;;  %v653_v50 = vld [vmem:[%s3393_s23 + $0xae8] sm:$0xff]  ;;  %v3033_v21 = vld [vmem:[%s3417_s10 + $0x10] sm:$0xff] }
 0x169   : > { %1852 = vmatpush.msrb.mxu3 %v749_v23  ;;  %1834 = vmatpush.msrb.mxu2 %v677_v26  ;;  %v721_v51 = vld [vmem:[%s3393_s23 + $0xd08] sm:$0xff]  ;;  %v3034_v26 = vld [vmem:[%s3417_s10] sm:$0xff] }
 0x16a   : > { %1813 = vmatpush.msrb.mxu1 %v617_v24  ;;  %1794 = vmatpush.msrb.mxu0 %v549_v25  ;;  %v589_v52 = vld [vmem:[%s3393_s23 + $0x8e8] sm:$0xff] }
 0x16b   : > { %1853 = vmatpush.msrb.mxu3 %v745_v27  ;;  %1835 = vmatpush.msrb.mxu2 %v673_v30  ;;  %v521_v53 = vld [vmem:[%s3393_s23 + $0x6c8] sm:$0xff] }
 0x16c   : > { %1814 = vmatpush.msrb.mxu1 %v613_v28  ;;  %1795 = vmatpush.msrb.mxu0 %v545_v29  ;;  %v649_v54 = vld [vmem:[%s3393_s23 + $0xac8] sm:$0xff] }
 0x16d   : > { %1854 = vmatpush.msrb.mxu3 %v741_v31  ;;  %1836 = vmatpush.msrb.mxu2 %v669_v34  ;;  %v717_v55 = vld [vmem:[%s3393_s23 + $0xce8] sm:$0xff] }
 0x16e   : > { %1815 = vmatpush.msrb.mxu1 %v609_v32  ;;  %1796 = vmatpush.msrb.mxu0 %v541_v33  ;;  %v585_v56 = vld [vmem:[%s3393_s23 + $0x8c8] sm:$0xff] }
 0x16f   : > { %1855 = vmatpush.msrb.mxu3 %v737_v35  ;;  %1837 = vmatpush.msrb.mxu2 %v665_v38  ;;  %v517_v57 = vld [vmem:[%s3393_s23 + $0x6a8] sm:$0xff] }
 0x170   : > { %1816 = vmatpush.msrb.mxu1 %v605_v36  ;;  %1797 = vmatpush.msrb.mxu0 %v537_v37  ;;  %v645_v58 = vld [vmem:[%s3393_s23 + $0xaa8] sm:$0xff] }
 0x171   : > { %1856 = vmatpush.msrb.mxu3 %v733_v39  ;;  %1838 = vmatpush.msrb.mxu2 %v661_v42  ;;  %v713_v59 = vld [vmem:[%s3393_s23 + $0xcc8] sm:$0xff]  ;;  %v3036_v39 = vld [vmem:[%s3417_s10 + $0x18] sm:$0xff] }
 0x172   : > { %1817 = vmatpush.msrb.mxu1 %v601_v40  ;;  %1798 = vmatpush.msrb.mxu0 %v533_v41  ;;  %v581_v60 = vld [vmem:[%s3393_s23 + $0x8a8] sm:$0xff]  ;;  %v3037_v41 = vld [vmem:[%s3417_s10 + $0x30] sm:$0xff] }
 0x173   : > { %1857 = vmatpush.msrb.mxu3 %v729_v43  ;;  %1839 = vmatpush.msrb.mxu2 %v657_v46  ;;  %v513_v61 = vld [vmem:[%s3393_s23 + $0x688] sm:$0xff]  ;;  %v3038_v46 = vld [vmem:[%s3417_s10 + $0x20] sm:$0xff] }
 0x174   : > { %1818 = vmatpush.msrb.mxu1 %v597_v44  ;;  %1799 = vmatpush.msrb.mxu0 %v529_v45  ;;  %v641_v62 = vld [vmem:[%s3393_s23 + $0xa88] sm:$0xff] }
 0x175   : > { %1858 = vmatpush.msrb.mxu3 %v725_v47  ;;  %1840 = vmatpush.msrb.mxu2 %v653_v50  ;;  %v709_v63 = vld [vmem:[%s3393_s23 + $0xca8] sm:$0xff] }
 0x176   : > { %1819 = vmatpush.msrb.mxu1 %v593_v48  ;;  %1800 = vmatpush.msrb.mxu0 %v525_v49  ;;  %v577_v0 = vld [vmem:[%s3393_s23 + $0x888] sm:$0xff] }
 0x177   : > { %1859 = vmatpush.msrb.mxu3 %v721_v51  ;;  %1841 = vmatpush.msrb.mxu2 %v649_v54  ;;  %v509_v1 = vld [vmem:[%s3393_s23 + $0x668] sm:$0xff] }
 0x178   : > { %1820 = vmatpush.msrb.mxu1 %v589_v52  ;;  %1801 = vmatpush.msrb.mxu0 %v521_v53  ;;  %v637_v2 = vld [vmem:[%s3393_s23 + $0xa68] sm:$0xff] }
 0x179   : > { %1860 = vmatpush.msrb.mxu3 %v717_v55  ;;  %1842 = vmatpush.msrb.mxu2 %v645_v58  ;;  %v705_v3 = vld [vmem:[%s3393_s23 + $0xc88] sm:$0xff] }
 0x17a   : > { %1821 = vmatpush.msrb.mxu1 %v585_v56  ;;  %1802 = vmatpush.msrb.mxu0 %v517_v57  ;;  %v573_v4 = vld [vmem:[%s3393_s23 + $0x868] sm:$0xff] }
 0x17b   : > { %1861 = vmatpush.msrb.mxu3 %v713_v59  ;;  %1843 = vmatpush.msrb.mxu2 %v641_v62  ;;  %v505_v5 = vld [vmem:[%s3393_s23 + $0x648] sm:$0xff] }
 0x17c   : > { %1822 = vmatpush.msrb.mxu1 %v581_v60  ;;  %1803 = vmatpush.msrb.mxu0 %v513_v61  ;;  %v633_v6 = vld [vmem:[%s3393_s23 + $0xa48] sm:$0xff] }
 0x17d   : > { %1862 = vmatpush.msrb.mxu3 %v709_v63  ;;  %1844 = vmatpush.msrb.mxu2 %v637_v2  ;;  %v701_v7 = vld [vmem:[%s3393_s23 + $0xc68] sm:$0xff] }
 0x17e   : > { %1823 = vmatpush.msrb.mxu1 %v577_v0  ;;  %1804 = vmatpush.msrb.mxu0 %v509_v1  ;;  %v569_v8 = vld [vmem:[%s3393_s23 + $0x848] sm:$0xff] }
 0x17f   : > { %1863 = vmatpush.msrb.mxu3 %v705_v3  ;;  %v501_v9 = vld [vmem:[%s3393_s23 + $0x628] sm:$0xff]  ;;  %1845 = vmatpush.msrb.mxu2 %v633_v6 }
 0x180   : > { %1824 = vmatpush.msrb.mxu1 %v573_v4  ;;  %v629_v10 = vld [vmem:[%s3393_s23 + $0xa28] sm:$0xff]  ;;  %1805 = vmatpush.msrb.mxu0 %v505_v5 }
 0x181   : > { %v697_v11 = vld [vmem:[%s3393_s23 + $0xc48] sm:$0xff]  ;;  %1864 = vmatpush.msrb.mxu3 %v701_v7  ;;  %1846 = vmatpush.msrb.mxu2 %v629_v10 }
 0x182   : > { %1825 = vmatpush.msrb.mxu1 %v569_v8  ;;  %v497_v12 = vld [vmem:[%s3393_s23 + $0x608] sm:$0xff]  ;;  %1806 = vmatpush.msrb.mxu0 %v501_v9 }
 0x183   : > { %v565_v13 = vld [vmem:[%s3393_s23 + $0x828] sm:$0xff]  ;;  %1865 = vmatpush.msrb.mxu3 %v697_v11  ;;  %1748 = vmatmul.f32.vlgmr.msra.gmra.mxu1 %v3034_v26 }
 0x184   : > { %v625_v14 = vld [vmem:[%s3393_s23 + $0xa08] sm:$0xff]  ;;  %1807 = vmatpush.msrb.mxu0 %v497_v12  ;;  %1826 = vmatpush.msrb.mxu1 %v565_v13 }
 0x185   : > { %v693_v15 = vld [vmem:[%s3393_s23 + $0xc28] sm:$0xff]  ;;  %1847 = vmatpush.msrb.mxu2 %v625_v14  ;;  %1788 = vmatmul.f32.vlgmr.msra.gmra.mxu3 %v3033_v21 }
 0x186   : > { %v3032_v16 = vld [vmem:[%s3417_s10 + $0x8] sm:$0xff]  ;;  %1866 = vmatpush.msrb.mxu3 %v693_v15  ;;  %1808 = vmatmul.f32.vlgmr.msrb.gmra.mxu0 %v3036_v39  ;;  %v1429_v39 = vpop.f32.mrf.mxu1 }
 0x187   : > { %1768 = vmatmul.f32.vlgmr.msra.gmra.mxu2 %v3032_v16  ;;  %v813_v17 = vld [vmem:[%s3393_s23 + $0xfe8] sm:$0xff] }
 0x188   : > { %v941_v18 = vld [vmem:[%s3393_s23 + $0x13e8] sm:$0xff]  ;;  %1872 = vmatpush.msra.mxu0 %v813_v17 }
 0x189   : > { %v561_v19 = vld [vmem:[%s3393_s23 + $0x808] sm:$0xff]  ;;  %1912 = vmatpush.msra.mxu2 %v941_v18 }
 0x18a   : > { %v689_v20 = vld [vmem:[%s3393_s23 + $0xc08] sm:$0xff]  ;;  %1827 = vmatpush.msrb.mxu1 %v561_v19 }
 0x18b   : > { %v809_v22 = vld [vmem:[%s3393_s23 + $0xfc8] sm:$0xff]  ;;  %1867 = vmatpush.msrb.mxu3 %v689_v20  ;;  %1828 = vmatmul.f32.vlgmr.msrb.gmra.mxu1 %v3038_v46 }
 0x18c   : > { %v877_v23 = vld [vmem:[%s3393_s23 + $0x11e8] sm:$0xff]  ;;  %1873 = vmatpush.msra.mxu0 %v809_v22 }
 0x18d   : > { %v937_v24 = vld [vmem:[%s3393_s23 + $0x13c8] sm:$0xff]  ;;  %1892 = vmatpush.msra.mxu1 %v877_v23  ;;  %1868 = vmatmul.f32.vlgmr.msrb.gmra.mxu3 %v3037_v41 }
 0x18e   : > { %v1005_v25 = vld [vmem:[%s3393_s23 + $0x15e8] sm:$0xff]  ;;  %1913 = vmatpush.msra.mxu2 %v937_v24 }
 0x18f   : > { %v805_v27 = vld [vmem:[%s3393_s23 + $0xfa8] sm:$0xff]  ;;  %1932 = vmatpush.msra.mxu3 %v1005_v25 }
 0x190   : > { %v873_v28 = vld [vmem:[%s3393_s23 + $0x11c8] sm:$0xff]  ;;  %1874 = vmatpush.msra.mxu0 %v805_v27  ;;  %v3039_v27 = vld [vmem:[%s3417_s10 + $0x38] sm:$0xff] }
 0x191   : > { %v933_v29 = vld [vmem:[%s3393_s23 + $0x13a8] sm:$0xff]  ;;  %1893 = vmatpush.msra.mxu1 %v873_v28 }
 0x192   : > { %v1001_v30 = vld [vmem:[%s3393_s23 + $0x15c8] sm:$0xff]  ;;  %1914 = vmatpush.msra.mxu2 %v933_v29 }
 0x193   : > { %v801_v31 = vld [vmem:[%s3393_s23 + $0xf88] sm:$0xff]  ;;  %1933 = vmatpush.msra.mxu3 %v1001_v30 }
 0x194   : > { %v869_v32 = vld [vmem:[%s3393_s23 + $0x11a8] sm:$0xff]  ;;  %1875 = vmatpush.msra.mxu0 %v801_v31 }
 0x195   : > { %v929_v33 = vld [vmem:[%s3393_s23 + $0x1388] sm:$0xff]  ;;  %1894 = vmatpush.msra.mxu1 %v869_v32 }
 0x196   : > { %v997_v34 = vld [vmem:[%s3393_s23 + $0x15a8] sm:$0xff]  ;;  %1915 = vmatpush.msra.mxu2 %v929_v33  ;;  %v3041_v33 = vld [vmem:[%s3417_s10 + $0x40] sm:$0xff] }
 0x197   : > { %v3035_v35 = vld [vmem:[%s3417_s10 + $0x28] sm:$0xff]  ;;  %1934 = vmatpush.msra.mxu3 %v997_v34  ;;  %v3042_v34 = vld [vmem:[%s3417_s10 + $0x50] sm:$0xff] }
 0x198   : > { %1848 = vmatmul.f32.vlgmr.msrb.gmra.mxu2 %v3035_v35  ;;  %v797_v36 = vld [vmem:[%s3393_s23 + $0xf68] sm:$0xff] }
 0x199   : > { %v865_v37 = vld [vmem:[%s3393_s23 + $0x1188] sm:$0xff]  ;;  %1876 = vmatpush.msra.mxu0 %v797_v36 }
 0x19a   : > { %v925_v38 = vld [vmem:[%s3393_s23 + $0x1368] sm:$0xff]  ;;  %1895 = vmatpush.msra.mxu1 %v865_v37 }
 0x19b   : > { %v993_v40 = vld [vmem:[%s3393_s23 + $0x1588] sm:$0xff]  ;;  %1916 = vmatpush.msra.mxu2 %v925_v38 }
 0x19c   : > { %v793_v42 = vld [vmem:[%s3393_s23 + $0xf48] sm:$0xff]  ;;  %1935 = vmatpush.msra.mxu3 %v993_v40 }
 0x19d   : > { %v861_v43 = vld [vmem:[%s3393_s23 + $0x1168] sm:$0xff]  ;;  %1877 = vmatpush.msra.mxu0 %v793_v42 }
 0x19e   : > { %v921_v44 = vld [vmem:[%s3393_s23 + $0x1348] sm:$0xff]  ;;  %1896 = vmatpush.msra.mxu1 %v861_v43 }
 0x19f   : > { %v989_v45 = vld [vmem:[%s3393_s23 + $0x1568] sm:$0xff]  ;;  %1917 = vmatpush.msra.mxu2 %v921_v44  ;;  %v1409_v44 = vpop.f32.mrf.mxu0 }
 0x1a0   : > { %v789_v47 = vld [vmem:[%s3393_s23 + $0xf28] sm:$0xff]  ;;  %1936 = vmatpush.msra.mxu3 %v989_v45 }
 0x1a1   : > { %v857_v48 = vld [vmem:[%s3393_s23 + $0x1148] sm:$0xff]  ;;  %1878 = vmatpush.msra.mxu0 %v789_v47  ;;  %v1430_v47 = vadd.f32 %v1429_v39, %v1409_v44  ;;  %v366_v44 = vld [vmem:[%s3393_s23 + $0x1f0] sm:$0xff] }
 0x1a2   : > { %v917_v49 = vld [vmem:[%s3393_s23 + $0x1328] sm:$0xff]  ;;  %1897 = vmatpush.msra.mxu1 %v857_v48 }
 0x1a3   : > { %v985_v50 = vld [vmem:[%s3393_s23 + $0x1548] sm:$0xff]  ;;  %1918 = vmatpush.msra.mxu2 %v917_v49 }
 0x1a4   : > { %v785_v51 = vld [vmem:[%s3393_s23 + $0xf08] sm:$0xff]  ;;  %1937 = vmatpush.msra.mxu3 %v985_v50  ;;  %v1449_v50 = vpop.f32.mrf.mxu2 }
 0x1a5   : > { %v853_v52 = vld [vmem:[%s3393_s23 + $0x1128] sm:$0xff]  ;;  %1879 = vmatpush.msra.mxu0 %v785_v51 }
 0x1a6   : > { %v913_v53 = vld [vmem:[%s3393_s23 + $0x1308] sm:$0xff]  ;;  %1898 = vmatpush.msra.mxu1 %v853_v52 }
 0x1a7   : > { %v981_v54 = vld [vmem:[%s3393_s23 + $0x1528] sm:$0xff]  ;;  %1919 = vmatpush.msra.mxu2 %v913_v53 }
 0x1a8   : > { %v781_v55 = vld [vmem:[%s3393_s23 + $0xee8] sm:$0xff]  ;;  %1938 = vmatpush.msra.mxu3 %v981_v54 }
 0x1a9   : > { %v849_v56 = vld [vmem:[%s3393_s23 + $0x1108] sm:$0xff]  ;;  %1880 = vmatpush.msra.mxu0 %v781_v55 }
 0x1aa   : > { %v909_v57 = vld [vmem:[%s3393_s23 + $0x12e8] sm:$0xff]  ;;  %1899 = vmatpush.msra.mxu1 %v849_v56 }
 0x1ab   : > { %v977_v58 = vld [vmem:[%s3393_s23 + $0x1508] sm:$0xff]  ;;  %1920 = vmatpush.msra.mxu2 %v909_v57  ;;  %v1450_v57 = vadd.f32 %v1449_v50, %v1430_v47 }
 0x1ac   : > { %v777_v59 = vld [vmem:[%s3393_s23 + $0xec8] sm:$0xff]  ;;  %1939 = vmatpush.msra.mxu3 %v977_v58 }
 0x1ad   : > { %v845_v60 = vld [vmem:[%s3393_s23 + $0x10e8] sm:$0xff]  ;;  %1881 = vmatpush.msra.mxu0 %v777_v59 }
 0x1ae   : > { %v905_v61 = vld [vmem:[%s3393_s23 + $0x12c8] sm:$0xff]  ;;  %1900 = vmatpush.msra.mxu1 %v845_v60  ;;  %v1469_v60 = vpop.f32.mrf.mxu3 }
 0x1af   : > { %v973_v62 = vld [vmem:[%s3393_s23 + $0x14e8] sm:$0xff]  ;;  %1921 = vmatpush.msra.mxu2 %v905_v61 }
 0x1b0   : > { %v773_v63 = vld [vmem:[%s3393_s23 + $0xea8] sm:$0xff]  ;;  %1940 = vmatpush.msra.mxu3 %v973_v62 }
 0x1b1   : > { %v841_v0 = vld [vmem:[%s3393_s23 + $0x10c8] sm:$0xff]  ;;  %1882 = vmatpush.msra.mxu0 %v773_v63 }
 0x1b2   : > { %v901_v1 = vld [vmem:[%s3393_s23 + $0x12a8] sm:$0xff]  ;;  %1901 = vmatpush.msra.mxu1 %v841_v0 }
 0x1b3   : > { %v969_v2 = vld [vmem:[%s3393_s23 + $0x14c8] sm:$0xff]  ;;  %1922 = vmatpush.msra.mxu2 %v901_v1 }
 0x1b4   : > { %v769_v3 = vld [vmem:[%s3393_s23 + $0xe88] sm:$0xff]  ;;  %1941 = vmatpush.msra.mxu3 %v969_v2 }
 0x1b5   : > { %v837_v4 = vld [vmem:[%s3393_s23 + $0x10a8] sm:$0xff]  ;;  %1883 = vmatpush.msra.mxu0 %v769_v3  ;;  %v1470_v3 = vadd.f32 %v1469_v60, %v1450_v57  ;;  %v3046_v57 = vld [vmem:[%s3417_s10 + $0x70] sm:$0xff] }
 0x1b6   : > { %v897_v5 = vld [vmem:[%s3393_s23 + $0x1288] sm:$0xff]  ;;  %1902 = vmatpush.msra.mxu1 %v837_v4 }
 0x1b7   : > { %v965_v6 = vld [vmem:[%s3393_s23 + $0x14a8] sm:$0xff]  ;;  %1923 = vmatpush.msra.mxu2 %v897_v5 }
 0x1b8   : > { %v765_v7 = vld [vmem:[%s3393_s23 + $0xe68] sm:$0xff]  ;;  %1942 = vmatpush.msra.mxu3 %v965_v6  ;;  %v1489_v6 = vpop.f32.mrf.mxu0 }
 0x1b9   : > { %v833_v8 = vld [vmem:[%s3393_s23 + $0x1088] sm:$0xff]  ;;  %1884 = vmatpush.msra.mxu0 %v765_v7 }
 0x1ba   : > { %v893_v9 = vld [vmem:[%s3393_s23 + $0x1268] sm:$0xff]  ;;  %1903 = vmatpush.msra.mxu1 %v833_v8 }
 0x1bb   : > { %v961_v10 = vld [vmem:[%s3393_s23 + $0x1488] sm:$0xff]  ;;  %1924 = vmatpush.msra.mxu2 %v893_v9 }
 0x1bc   : > { %v761_v11 = vld [vmem:[%s3393_s23 + $0xe48] sm:$0xff]  ;;  %1943 = vmatpush.msra.mxu3 %v961_v10 }
 0x1bd   : > { %v829_v12 = vld [vmem:[%s3393_s23 + $0x1068] sm:$0xff]  ;;  %1885 = vmatpush.msra.mxu0 %v761_v11 }
 0x1be   : > { %v889_v13 = vld [vmem:[%s3393_s23 + $0x1248] sm:$0xff]  ;;  %1904 = vmatpush.msra.mxu1 %v829_v12 }
 0x1bf   : > { %v957_v14 = vld [vmem:[%s3393_s23 + $0x1468] sm:$0xff]  ;;  %1925 = vmatpush.msra.mxu2 %v889_v13  ;;  %v1490_v13 = vadd.f32 %v1489_v6, %v1470_v3  ;;  %v422_v3 = vld [vmem:[%s3393_s23 + $0x3b0] sm:$0xff] }
 0x1c0   : > { %v757_v15 = vld [vmem:[%s3393_s23 + $0xe28] sm:$0xff]  ;;  %1944 = vmatpush.msra.mxu3 %v957_v14 }
 0x1c1   : > { %v825_v16 = vld [vmem:[%s3393_s23 + $0x1048] sm:$0xff]  ;;  %1886 = vmatpush.msra.mxu0 %v757_v15 }
 0x1c2   : > { %v885_v17 = vld [vmem:[%s3393_s23 + $0x1228] sm:$0xff]  ;;  %1905 = vmatpush.msra.mxu1 %v825_v16  ;;  %v1509_v16 = vpop.f32.mrf.mxu1 }
 0x1c3   : > { %v953_v18 = vld [vmem:[%s3393_s23 + $0x1448] sm:$0xff]  ;;  %1926 = vmatpush.msra.mxu2 %v885_v17 }
 0x1c4   : > { %v753_v19 = vld [vmem:[%s3393_s23 + $0xe08] sm:$0xff]  ;;  %1945 = vmatpush.msra.mxu3 %v953_v18 }
 0x1c5   : > { %v821_v20 = vld [vmem:[%s3393_s23 + $0x1028] sm:$0xff]  ;;  %1887 = vmatpush.msra.mxu0 %v753_v19 }
 0x1c6   : > { %v881_v21 = vld [vmem:[%s3393_s23 + $0x1208] sm:$0xff]  ;;  %1906 = vmatpush.msra.mxu1 %v821_v20  ;;  %1888 = vmatmul.f32.vlgmr.msra.gmra.mxu0 %v3039_v27 }
 0x1c7   : > { %v949_v22 = vld [vmem:[%s3393_s23 + $0x1428] sm:$0xff]  ;;  %1927 = vmatpush.msra.mxu2 %v881_v21 }
 0x1c8   : > { %v1069_v23 = vld [vmem:[%s3393_s23 + $0x17e8] sm:$0xff]  ;;  %1946 = vmatpush.msra.mxu3 %v949_v22 }
 0x1c9   : > { %v1197_v24 = vld [vmem:[%s3393_s23 + $0x1be8] sm:$0xff]  ;;  %1952 = vmatpush.msrb.mxu0 %v1069_v23  ;;  %v1510_v23 = vadd.f32 %v1509_v16, %v1490_v13  ;;  %v346_v13 = vld [vmem:[%s3393_s23 + $0x150] sm:$0xff] }
 0x1ca   : > { %v817_v25 = vld [vmem:[%s3393_s23 + $0x1008] sm:$0xff]  ;;  %1992 = vmatpush.msrb.mxu2 %v1197_v24  ;;  %v1589_v50 = vpop.f32.mrf.mxu1 }
 0x1cb   : > { %v945_v26 = vld [vmem:[%s3393_s23 + $0x1408] sm:$0xff]  ;;  %1907 = vmatpush.msra.mxu1 %v817_v25 }
 0x1cc   : > { %v3040_v28 = vld [vmem:[%s3417_s10 + $0x48] sm:$0xff]  ;;  %1947 = vmatpush.msra.mxu3 %v945_v26  ;;  %1908 = vmatmul.f32.vlgmr.msra.gmra.mxu1 %v3041_v33  ;;  %v1529_v26 = vpop.f32.mrf.mxu2 }
 0x1cd   : > { %1928 = vmatmul.f32.vlgmr.msra.gmra.mxu2 %v3040_v28  ;;  %v1065_v29 = vld [vmem:[%s3393_s23 + $0x17c8] sm:$0xff]  ;;  %1948 = vmatmul.f32.vlgmr.msra.gmra.mxu3 %v3042_v34  ;;  %v1530_v33 = vadd.f32 %v1529_v26, %v1510_v23  ;;  %v338_v23 = vld [vmem:[%s3393_s23 + $0x110] sm:$0xff] }
 0x1ce   : > { %v1133_v30 = vld [vmem:[%s3393_s23 + $0x19e8] sm:$0xff]  ;;  %1953 = vmatpush.msrb.mxu0 %v1065_v29 }
 0x1cf   : > { %v1193_v31 = vld [vmem:[%s3393_s23 + $0x1bc8] sm:$0xff]  ;;  %1972 = vmatpush.msrb.mxu1 %v1133_v30 }
 0x1d0   : > { %v1261_v32 = vld [vmem:[%s3393_s23 + $0x1de8] sm:$0xff]  ;;  %1993 = vmatpush.msrb.mxu2 %v1193_v31 }
 0x1d1   : > { %v1061_v35 = vld [vmem:[%s3393_s23 + $0x17a8] sm:$0xff]  ;;  %2012 = vmatpush.msrb.mxu3 %v1261_v32 }
 0x1d2   : > { %v1129_v36 = vld [vmem:[%s3393_s23 + $0x19c8] sm:$0xff]  ;;  %1954 = vmatpush.msrb.mxu0 %v1061_v35 }
 0x1d3   : > { %v1189_v37 = vld [vmem:[%s3393_s23 + $0x1ba8] sm:$0xff]  ;;  %1973 = vmatpush.msrb.mxu1 %v1129_v36  ;;  %v1549_v36 = vpop.f32.mrf.mxu3 }
 0x1d4   : > { %v1257_v38 = vld [vmem:[%s3393_s23 + $0x1dc8] sm:$0xff]  ;;  %1994 = vmatpush.msrb.mxu2 %v1189_v37 }
 0x1d5   : > { %v1057_v40 = vld [vmem:[%s3393_s23 + $0x1788] sm:$0xff]  ;;  %2013 = vmatpush.msrb.mxu3 %v1257_v38 }
 0x1d6   : > { %v1125_v41 = vld [vmem:[%s3393_s23 + $0x19a8] sm:$0xff]  ;;  %1955 = vmatpush.msrb.mxu0 %v1057_v40 }
 0x1d7   : > { %v1185_v42 = vld [vmem:[%s3393_s23 + $0x1b88] sm:$0xff]  ;;  %1974 = vmatpush.msrb.mxu1 %v1125_v41  ;;  %v1569_v41 = vpop.f32.mrf.mxu0 }
 0x1d8   : > { %v1253_v43 = vld [vmem:[%s3393_s23 + $0x1da8] sm:$0xff]  ;;  %1995 = vmatpush.msrb.mxu2 %v1185_v42  ;;  %v1550_v42 = vadd.f32 %v1549_v36, %v1530_v33 }
 0x1d9   : > { %v1053_v45 = vld [vmem:[%s3393_s23 + $0x1768] sm:$0xff]  ;;  %2014 = vmatpush.msrb.mxu3 %v1253_v43 }
 0x1da   : > { %v1121_v46 = vld [vmem:[%s3393_s23 + $0x1988] sm:$0xff]  ;;  %1956 = vmatpush.msrb.mxu0 %v1053_v45  ;;  %v1570_v47 = vadd.f32 %v1569_v41, %v1550_v42 }
 0x1db   : > { %v1181_v48 = vld [vmem:[%s3393_s23 + $0x1b68] sm:$0xff]  ;;  %1975 = vmatpush.msrb.mxu1 %v1121_v46 }
 0x1dc   : > { %v1249_v49 = vld [vmem:[%s3393_s23 + $0x1d88] sm:$0xff]  ;;  %1996 = vmatpush.msrb.mxu2 %v1181_v48  ;;  %v3043_v48 = vld [vmem:[%s3417_s10 + $0x58] sm:$0xff]  ;;  %v1590_v60 = vadd.f32 %v1589_v50, %v1570_v47  ;;  %v318_v50 = vld [vmem:[%s3393_s23 + $0x70] sm:$0xff] }
 0x1dd   : > { %v1049_v51 = vld [vmem:[%s3393_s23 + $0x1748] sm:$0xff]  ;;  %2015 = vmatpush.msrb.mxu3 %v1249_v49 }
 0x1de   : > { %v1117_v52 = vld [vmem:[%s3393_s23 + $0x1968] sm:$0xff]  ;;  %1957 = vmatpush.msrb.mxu0 %v1049_v51 }
 0x1df   : > { %v1177_v53 = vld [vmem:[%s3393_s23 + $0x1b48] sm:$0xff]  ;;  %1976 = vmatpush.msrb.mxu1 %v1117_v52 }
 0x1e0   : > { %v1245_v54 = vld [vmem:[%s3393_s23 + $0x1d68] sm:$0xff]  ;;  %1997 = vmatpush.msrb.mxu2 %v1177_v53  ;;  %v362_v53 = vld [vmem:[%s3393_s23 + $0x1d0] sm:$0xff] }
 0x1e1   : > { %v1045_v55 = vld [vmem:[%s3393_s23 + $0x1728] sm:$0xff]  ;;  %2016 = vmatpush.msrb.mxu3 %v1245_v54  ;;  %v430_v54 = vld [vmem:[%s3393_s23 + $0x3f0] sm:$0xff] }
 0x1e2   : > { %v1113_v56 = vld [vmem:[%s3393_s23 + $0x1948] sm:$0xff]  ;;  %1958 = vmatpush.msrb.mxu0 %v1045_v55  ;;  %v1609_v55 = vpop.f32.mrf.mxu2 }
 0x1e3   : > { %v1173_v58 = vld [vmem:[%s3393_s23 + $0x1b28] sm:$0xff]  ;;  %1977 = vmatpush.msrb.mxu1 %v1113_v56  ;;  %v3045_v56 = vld [vmem:[%s3417_s10 + $0x60] sm:$0xff] }
 0x1e4   : > { %v1241_v59 = vld [vmem:[%s3393_s23 + $0x1d48] sm:$0xff]  ;;  %1998 = vmatpush.msrb.mxu2 %v1173_v58 }
 0x1e5   : > { %v1041_v61 = vld [vmem:[%s3393_s23 + $0x1708] sm:$0xff]  ;;  %2017 = vmatpush.msrb.mxu3 %v1241_v59 }
 0x1e6   : > { %v1109_v62 = vld [vmem:[%s3393_s23 + $0x1928] sm:$0xff]  ;;  %1959 = vmatpush.msrb.mxu0 %v1041_v61  ;;  %v358_v61 = vld [vmem:[%s3393_s23 + $0x1b0] sm:$0xff] }
 0x1e7   : > { %v1169_v63 = vld [vmem:[%s3393_s23 + $0x1b08] sm:$0xff]  ;;  %1978 = vmatpush.msrb.mxu1 %v1109_v62  ;;  %v426_v62 = vld [vmem:[%s3393_s23 + $0x3d0] sm:$0xff] }
 0x1e8   : > { %v1237_v0 = vld [vmem:[%s3393_s23 + $0x1d28] sm:$0xff]  ;;  %1999 = vmatpush.msrb.mxu2 %v1169_v63 }
 0x1e9   : > { %v1037_v1 = vld [vmem:[%s3393_s23 + $0x16e8] sm:$0xff]  ;;  %2018 = vmatpush.msrb.mxu3 %v1237_v0 }
 0x1ea   : > { %v1105_v2 = vld [vmem:[%s3393_s23 + $0x1908] sm:$0xff]  ;;  %1960 = vmatpush.msrb.mxu0 %v1037_v1  ;;  %v1610_v1 = vadd.f32 %v1609_v55, %v1590_v60  ;;  %v314_v55 = vld [vmem:[%s3393_s23 + $0x50] sm:$0xff] }
 0x1eb   : > { %v1165_v4 = vld [vmem:[%s3393_s23 + $0x1ae8] sm:$0xff]  ;;  %1979 = vmatpush.msrb.mxu1 %v1105_v2  ;;  %v354_v2 = vld [vmem:[%s3393_s23 + $0x190] sm:$0xff] }
 0x1ec   : > { %v1233_v5 = vld [vmem:[%s3393_s23 + $0x1d08] sm:$0xff]  ;;  %2000 = vmatpush.msrb.mxu2 %v1165_v4  ;;  %v1629_v4 = vpop.f32.mrf.mxu3  ;;  %v310_v60 = vld [vmem:[%s3393_s23 + $0x30] sm:$0xff] }
 0x1ed   : > { %v1033_v7 = vld [vmem:[%s3393_s23 + $0x16c8] sm:$0xff]  ;;  %2019 = vmatpush.msrb.mxu3 %v1233_v5 }
 0x1ee   : > { %v1101_v8 = vld [vmem:[%s3393_s23 + $0x18e8] sm:$0xff]  ;;  %1961 = vmatpush.msrb.mxu0 %v1033_v7  ;;  %v350_v7 = vld [vmem:[%s3393_s23 + $0x170] sm:$0xff] }
 0x1ef   : > { %v1161_v9 = vld [vmem:[%s3393_s23 + $0x1ac8] sm:$0xff]  ;;  %1980 = vmatpush.msrb.mxu1 %v1101_v8  ;;  %v418_v8 = vld [vmem:[%s3393_s23 + $0x390] sm:$0xff] }
 0x1f0   : > { %v1229_v10 = vld [vmem:[%s3393_s23 + $0x1ce8] sm:$0xff]  ;;  %2001 = vmatpush.msrb.mxu2 %v1161_v9  ;;  %v1649_v9 = vpop.f32.mrf.mxu0 }
 0x1f1   : > { %v1029_v11 = vld [vmem:[%s3393_s23 + $0x16a8] sm:$0xff]  ;;  %2020 = vmatpush.msrb.mxu3 %v1229_v10 }
 0x1f2   : > { %v1097_v12 = vld [vmem:[%s3393_s23 + $0x18c8] sm:$0xff]  ;;  %1962 = vmatpush.msrb.mxu0 %v1029_v11 }
 0x1f3   : > { %v1157_v14 = vld [vmem:[%s3393_s23 + $0x1aa8] sm:$0xff]  ;;  %1981 = vmatpush.msrb.mxu1 %v1097_v12  ;;  %v1630_v12 = vadd.f32 %v1629_v4, %v1610_v1  ;;  %v374_v1 = vld [vmem:[%s3393_s23 + $0x230] sm:$0xff] }
 0x1f4   : > { %v1225_v15 = vld [vmem:[%s3393_s23 + $0x1cc8] sm:$0xff]  ;;  %2002 = vmatpush.msrb.mxu2 %v1157_v14  ;;  %v414_v14 = vld [vmem:[%s3393_s23 + $0x370] sm:$0xff]  ;;  %v1709_v36 = vpop.f32.mrf.mxu3 }
 0x1f5   : > { %v1025_v17 = vld [vmem:[%s3393_s23 + $0x1688] sm:$0xff]  ;;  %2021 = vmatpush.msrb.mxu3 %v1225_v15 }
 0x1f6   : > { %v1093_v18 = vld [vmem:[%s3393_s23 + $0x18a8] sm:$0xff]  ;;  %1963 = vmatpush.msrb.mxu0 %v1025_v17  ;;  %v1650_v17 = vadd.f32 %v1649_v9, %v1630_v12  ;;  %v618_v9 = vld [vmem:[%s3393_s23 + $0x9d0] sm:$0xff] }
 0x1f7   : > { %v1153_v19 = vld [vmem:[%s3393_s23 + $0x1a88] sm:$0xff]  ;;  %1982 = vmatpush.msrb.mxu1 %v1093_v18  ;;  %v342_v18 = vld [vmem:[%s3393_s23 + $0x130] sm:$0xff] }
 0x1f8   : > { %v1221_v20 = vld [vmem:[%s3393_s23 + $0x1ca8] sm:$0xff]  ;;  %2003 = vmatpush.msrb.mxu2 %v1153_v19  ;;  %v410_v19 = vld [vmem:[%s3393_s23 + $0x350] sm:$0xff] }
 0x1f9   : > { %v1021_v21 = vld [vmem:[%s3393_s23 + $0x1668] sm:$0xff]  ;;  %2022 = vmatpush.msrb.mxu3 %v1221_v20  ;;  %v1669_v20 = vpop.f32.mrf.mxu1  ;;  %v486_v12 = vld [vmem:[%s3393_s23 + $0x5b0] sm:$0xff] }
 0x1fa   : > { %v1089_v22 = vld [vmem:[%s3393_s23 + $0x1888] sm:$0xff]  ;;  %1964 = vmatpush.msrb.mxu0 %v1021_v21 }
 0x1fb   : > { %v1149_v24 = vld [vmem:[%s3393_s23 + $0x1a68] sm:$0xff]  ;;  %1983 = vmatpush.msrb.mxu1 %v1089_v22 }
 0x1fc   : > { %v1217_v25 = vld [vmem:[%s3393_s23 + $0x1c88] sm:$0xff]  ;;  %2004 = vmatpush.msrb.mxu2 %v1149_v24  ;;  %v406_v24 = vld [vmem:[%s3393_s23 + $0x330] sm:$0xff] }
 0x1fd   : > { %v1017_v27 = vld [vmem:[%s3393_s23 + $0x1648] sm:$0xff]  ;;  %2023 = vmatpush.msrb.mxu3 %v1217_v25  ;;  %v1689_v25 = vpop.f32.mrf.mxu2 }
 0x1fe   : > { %v1085_v28 = vld [vmem:[%s3393_s23 + $0x1868] sm:$0xff]  ;;  %1965 = vmatpush.msrb.mxu0 %v1017_v27 }
 0x1ff   : > { %v1145_v29 = vld [vmem:[%s3393_s23 + $0x1a48] sm:$0xff]  ;;  %1984 = vmatpush.msrb.mxu1 %v1085_v28  ;;  %v1670_v28 = vadd.f32 %v1669_v20, %v1650_v17  ;;  %v550_v17 = vld [vmem:[%s3393_s23 + $0x7b0] sm:$0xff] }
 0x200   : > { %v1213_v30 = vld [vmem:[%s3393_s23 + $0x1c68] sm:$0xff]  ;;  %2005 = vmatpush.msrb.mxu2 %v1145_v29  ;;  %v334_v29 = vld [vmem:[%s3393_s23 + $0xf0] sm:$0xff] }
 0x201   : > { %v1013_v31 = vld [vmem:[%s3393_s23 + $0x1628] sm:$0xff]  ;;  %2024 = vmatpush.msrb.mxu3 %v1213_v30  ;;  %v402_v30 = vld [vmem:[%s3393_s23 + $0x310] sm:$0xff]  ;;  %v1690_v33 = vadd.f32 %v1689_v25, %v1670_v28 }
 0x202   : > { %v1081_v32 = vld [vmem:[%s3393_s23 + $0x1848] sm:$0xff]  ;;  %1966 = vmatpush.msrb.mxu0 %v1013_v31  ;;  %v478_v20 = vld [vmem:[%s3393_s23 + $0x570] sm:$0xff] }
 0x203   : > { %v1141_v34 = vld [vmem:[%s3393_s23 + $0x1a28] sm:$0xff]  ;;  %1985 = vmatpush.msrb.mxu1 %v1081_v32  ;;  %v542_v25 = vld [vmem:[%s3393_s23 + $0x770] sm:$0xff] }
 0x204   : > { %v1209_v35 = vld [vmem:[%s3393_s23 + $0x1c48] sm:$0xff]  ;;  %2006 = vmatpush.msrb.mxu2 %v1141_v34  ;;  %v330_v34 = vld [vmem:[%s3393_s23 + $0xd0] sm:$0xff] }
 0x205   : > { %v1009_v37 = vld [vmem:[%s3393_s23 + $0x1608] sm:$0xff]  ;;  %2025 = vmatpush.msrb.mxu3 %v1209_v35  ;;  %v398_v35 = vld [vmem:[%s3393_s23 + $0x2f0] sm:$0xff] }
 0x206   : > { %v1077_v38 = vld [vmem:[%s3393_s23 + $0x1828] sm:$0xff]  ;;  %1967 = vmatpush.msrb.mxu0 %v1009_v37  ;;  %v470_v28 = vld [vmem:[%s3393_s23 + $0x530] sm:$0xff] }
 0x207   : > { %v1137_v39 = vld [vmem:[%s3393_s23 + $0x1a08] sm:$0xff]  ;;  %1986 = vmatpush.msrb.mxu1 %v1077_v38  ;;  %1968 = vmatmul.f32.vlgmr.msrb.gmra.mxu0 %v3043_v48  ;;  %v283_v48 = vld [vmem:[#allocation2 + $0x10] sm:$0xff] }
 0x208   : > { %v1205_v40 = vld [vmem:[%s3393_s23 + $0x1c28] sm:$0xff]  ;;  %2007 = vmatpush.msrb.mxu2 %v1137_v39  ;;  %v326_v39 = vld [vmem:[%s3393_s23 + $0xb0] sm:$0xff] }
 0x209   : > { %v1325_v43 = vld [vmem:[%s3393_s23 + $0x1fe8] sm:$0xff]  ;;  %2026 = vmatpush.msrb.mxu3 %v1205_v40  ;;  %v394_v40 = vld [vmem:[%s3393_s23 + $0x2d0] sm:$0xff] }
 0x20a   : > { %v1073_v45 = vld [vmem:[%s3393_s23 + $0x1808] sm:$0xff]  ;;  %2032 = vmatpush.msra.mxu0 %v1325_v43  ;;  %2072 = vmatpush.msra.mxu2 %v366_v44  ;;  %v1710_v43 = vadd.f32 %v1709_v36, %v1690_v33  ;;  %v322_v44 = vld [vmem:[%s3393_s23 + $0x90] sm:$0xff] }
 0x20b   : > { %v1201_v46 = vld [vmem:[%s3393_s23 + $0x1c08] sm:$0xff]  ;;  %1987 = vmatpush.msrb.mxu1 %v1073_v45  ;;  %v390_v45 = vld [vmem:[%s3393_s23 + $0x2b0] sm:$0xff] }
 0x20c   : > { %v3044_v49 = vld [vmem:[%s3417_s10 + $0x68] sm:$0xff]  ;;  %2027 = vmatpush.msrb.mxu3 %v1201_v46  ;;  %1988 = vmatmul.f32.vlgmr.msrb.gmra.mxu1 %v3045_v56  ;;  %v382_v56 = vld [vmem:[%s3393_s23 + $0x270] sm:$0xff] }
 0x20d   : > { %2008 = vmatmul.f32.vlgmr.msrb.gmra.mxu2 %v3044_v49  ;;  %v1321_v51 = vld [vmem:[%s3393_s23 + $0x1fc8] sm:$0xff]  ;;  %2028 = vmatmul.f32.vlgmr.msrb.gmra.mxu3 %v3046_v57  ;;  %v1729_v49 = vpop.f32.mrf.mxu0  ;;  %v534_v33 = vld [vmem:[%s3393_s23 + $0x730] sm:$0xff] }
 0x20e   : > { %v1389_v52 = vld [vmem:[%s3393_s23 + $0x21e8] sm:$0xff]  ;;  %2033 = vmatpush.msra.mxu0 %v1321_v51  ;;  %2073 = vmatpush.msra.mxu2 %v362_v53  ;;  %v386_v51 = vld [vmem:[%s3393_s23 + $0x290] sm:$0xff] }
 0x20f   : > { %v1317_v58 = vld [vmem:[%s3393_s23 + $0x1fa8] sm:$0xff]  ;;  %2052 = vmatpush.msra.mxu1 %v1389_v52  ;;  %2092 = vmatpush.msra.mxu3 %v430_v54  ;;  %v1730_v52 = vadd.f32 %v1729_v49, %v1710_v43  ;;  %v462_v36 = vld [vmem:[%s3393_s23 + $0x4f0] sm:$0xff] }
 0x210   : > { %v1385_v59 = vld [vmem:[%s3393_s23 + $0x21c8] sm:$0xff]  ;;  %2034 = vmatpush.msra.mxu0 %v1317_v58  ;;  %2074 = vmatpush.msra.mxu2 %v358_v61  ;;  %v378_v61 = vld [vmem:[%s3393_s23 + $0x250] sm:$0xff] }
 0x211   : > { %v1313_v63 = vld [vmem:[%s3393_s23 + $0x1f88] sm:$0xff]  ;;  %2053 = vmatpush.msra.mxu1 %v1385_v59  ;;  %2093 = vmatpush.msra.mxu3 %v426_v62  ;;  %v2752_v57 = vadd.f32 %v1730_v52, %v283_v48  ;;  %v654_v43 = vld [vmem:[%s3393_s23 + $0xaf0] sm:$0xff] }
 0x212   : > { %v1381_v0 = vld [vmem:[%s3393_s23 + $0x21a8] sm:$0xff]  ;;  %2035 = vmatpush.msra.mxu0 %v1313_v63  ;;  %2075 = vmatpush.msra.mxu2 %v354_v2  ;;  %v622_v2 = vld [vmem:[%s3393_s23 + $0x9f0] sm:$0xff] }
 0x213   : > { %v1309_v5 = vld [vmem:[%s3393_s23 + $0x1f68] sm:$0xff]  ;;  %2054 = vmatpush.msra.mxu1 %v1381_v0  ;;  %2094 = vmatpush.msra.mxu3 %v422_v3  ;;  %2756 = vst [vmem:[#allocation2 + $0x10] sm:$0xff] %v2752_v57  ;;  %v306_v0 = vld [vmem:[%s3393_s23 + $0x10] sm:$0xff] }
 0x214   : > { %v1377_v6 = vld [vmem:[%s3393_s23 + $0x2188] sm:$0xff]  ;;  %2036 = vmatpush.msra.mxu0 %v1309_v5  ;;  %2076 = vmatpush.msra.mxu2 %v350_v7  ;;  %v494_v3 = vld [vmem:[%s3393_s23 + $0x5f0] sm:$0xff] }
 0x215   : > { %v1305_v10 = vld [vmem:[%s3393_s23 + $0x1f48] sm:$0xff]  ;;  %2055 = vmatpush.msra.mxu1 %v1377_v6  ;;  %2095 = vmatpush.msra.mxu3 %v418_v8  ;;  %v370_v5 = vld [vmem:[%s3393_s23 + $0x210] sm:$0xff]  ;;  %v3047_v6 = vld [vmem:[%s3417_s10 + $0x78] sm:$0xff] }
 0x216   : > { %v1373_v11 = vld [vmem:[%s3393_s23 + $0x2168] sm:$0xff]  ;;  %2037 = vmatpush.msra.mxu0 %v1305_v10  ;;  %2077 = vmatpush.msra.mxu2 %v346_v13  ;;  %v490_v7 = vld [vmem:[%s3393_s23 + $0x5d0] sm:$0xff] }
 0x217   : > { %v1301_v15 = vld [vmem:[%s3393_s23 + $0x1f28] sm:$0xff]  ;;  %2056 = vmatpush.msra.mxu1 %v1373_v11  ;;  %2096 = vmatpush.msra.mxu3 %v414_v14  ;;  %v558_v8 = vld [vmem:[%s3393_s23 + $0x7f0] sm:$0xff]  ;;  %v3048_v11 = vld [vmem:[%s3417_s10 + $0x80] sm:$0xff] }
 0x218   : > { %v1369_v16 = vld [vmem:[%s3393_s23 + $0x2148] sm:$0xff]  ;;  %2038 = vmatpush.msra.mxu0 %v1301_v15  ;;  %2078 = vmatpush.msra.mxu2 %v342_v18  ;;  %v686_v10 = vld [vmem:[%s3393_s23 + $0xbf0] sm:$0xff] }
 0x219   : > { %v1297_v21 = vld [vmem:[%s3393_s23 + $0x1f08] sm:$0xff]  ;;  %2057 = vmatpush.msra.mxu1 %v1369_v16  ;;  %2097 = vmatpush.msra.mxu3 %v410_v19  ;;  %v554_v13 = vld [vmem:[%s3393_s23 + $0x7d0] sm:$0xff] }
 0x21a   : > { %v1365_v22 = vld [vmem:[%s3393_s23 + $0x2128] sm:$0xff]  ;;  %2039 = vmatpush.msra.mxu0 %v1297_v21  ;;  %2079 = vmatpush.msra.mxu2 %v338_v23  ;;  %v614_v14 = vld [vmem:[%s3393_s23 + $0x9b0] sm:$0xff] }
 0x21b   : > { %v1293_v26 = vld [vmem:[%s3393_s23 + $0x1ee8] sm:$0xff]  ;;  %2058 = vmatpush.msra.mxu1 %v1365_v22  ;;  %2098 = vmatpush.msra.mxu3 %v406_v24  ;;  %v682_v15 = vld [vmem:[%s3393_s23 + $0xbd0] sm:$0xff] }
 0x21c   : > { %v1361_v27 = vld [vmem:[%s3393_s23 + $0x2108] sm:$0xff]  ;;  %2040 = vmatpush.msra.mxu0 %v1293_v26  ;;  %2080 = vmatpush.msra.mxu2 %v334_v29  ;;  %v482_v16 = vld [vmem:[%s3393_s23 + $0x590] sm:$0xff] }
 0x21d   : > { %v1289_v31 = vld [vmem:[%s3393_s23 + $0x1ec8] sm:$0xff]  ;;  %2059 = vmatpush.msra.mxu1 %v1361_v27  ;;  %2099 = vmatpush.msra.mxu3 %v402_v30  ;;  %v610_v18 = vld [vmem:[%s3393_s23 + $0x990] sm:$0xff] }
 0x21e   : > { %v1357_v32 = vld [vmem:[%s3393_s23 + $0x20e8] sm:$0xff]  ;;  %2041 = vmatpush.msra.mxu0 %v1289_v31  ;;  %2081 = vmatpush.msra.mxu2 %v330_v34  ;;  %v678_v19 = vld [vmem:[%s3393_s23 + $0xbb0] sm:$0xff] }
 0x21f   : > { %v1285_v37 = vld [vmem:[%s3393_s23 + $0x1ea8] sm:$0xff]  ;;  %2060 = vmatpush.msra.mxu1 %v1357_v32  ;;  %2100 = vmatpush.msra.mxu3 %v398_v35  ;;  %v546_v21 = vld [vmem:[%s3393_s23 + $0x790] sm:$0xff] }
 0x220   : > { %v1353_v38 = vld [vmem:[%s3393_s23 + $0x20c8] sm:$0xff]  ;;  %2042 = vmatpush.msra.mxu0 %v1285_v37  ;;  %2082 = vmatpush.msra.mxu2 %v326_v39  ;;  %v606_v22 = vld [vmem:[%s3393_s23 + $0x970] sm:$0xff] }
 0x221   : > { %v1281_v41 = vld [vmem:[%s3393_s23 + $0x1e88] sm:$0xff]  ;;  %2061 = vmatpush.msra.mxu1 %v1353_v38  ;;  %2101 = vmatpush.msra.mxu3 %v394_v40  ;;  %v674_v23 = vld [vmem:[%s3393_s23 + $0xb90] sm:$0xff] }
 0x222   : > { %v1349_v42 = vld [vmem:[%s3393_s23 + $0x20a8] sm:$0xff]  ;;  %2043 = vmatpush.msra.mxu0 %v1281_v41  ;;  %2083 = vmatpush.msra.mxu2 %v322_v44  ;;  %v474_v24 = vld [vmem:[%s3393_s23 + $0x550] sm:$0xff] }
 0x223   : > { %v1277_v46 = vld [vmem:[%s3393_s23 + $0x1e68] sm:$0xff]  ;;  %2062 = vmatpush.msra.mxu1 %v1349_v42  ;;  %2102 = vmatpush.msra.mxu3 %v390_v45  ;;  %v602_v26 = vld [vmem:[%s3393_s23 + $0x950] sm:$0xff] }
 0x224   : > { %v1345_v47 = vld [vmem:[%s3393_s23 + $0x2088] sm:$0xff]  ;;  %2044 = vmatpush.msra.mxu0 %v1277_v46  ;;  %2084 = vmatpush.msra.mxu2 %v318_v50  ;;  %v670_v27 = vld [vmem:[%s3393_s23 + $0xb70] sm:$0xff] }
 0x225   : > { %v1273_v53 = vld [vmem:[%s3393_s23 + $0x1e48] sm:$0xff]  ;;  %2063 = vmatpush.msra.mxu1 %v1345_v47  ;;  %2103 = vmatpush.msra.mxu3 %v386_v51  ;;  %v538_v29 = vld [vmem:[%s3393_s23 + $0x750] sm:$0xff] }
 0x226   : > { %v1341_v54 = vld [vmem:[%s3393_s23 + $0x2068] sm:$0xff]  ;;  %2045 = vmatpush.msra.mxu0 %v1273_v53  ;;  %2085 = vmatpush.msra.mxu2 %v314_v55  ;;  %v598_v30 = vld [vmem:[%s3393_s23 + $0x930] sm:$0xff] }
 0x227   : > { %v1269_v58 = vld [vmem:[%s3393_s23 + $0x1e28] sm:$0xff]  ;;  %2064 = vmatpush.msra.mxu1 %v1341_v54  ;;  %2104 = vmatpush.msra.mxu3 %v382_v56  ;;  %v666_v31 = vld [vmem:[%s3393_s23 + $0xb50] sm:$0xff] }
 0x228   : > { %v1337_v59 = vld [vmem:[%s3393_s23 + $0x2048] sm:$0xff]  ;;  %2046 = vmatpush.msra.mxu0 %v1269_v58  ;;  %2086 = vmatpush.msra.mxu2 %v310_v60  ;;  %v466_v32 = vld [vmem:[%s3393_s23 + $0x510] sm:$0xff] }
 0x229   : > { %v1265_v62 = vld [vmem:[%s3393_s23 + $0x1e08] sm:$0xff]  ;;  %2065 = vmatpush.msra.mxu1 %v1337_v59  ;;  %2105 = vmatpush.msra.mxu3 %v378_v61  ;;  %v594_v34 = vld [vmem:[%s3393_s23 + $0x910] sm:$0xff] }
 0x22a   : > { %v1333_v63 = vld [vmem:[%s3393_s23 + $0x2028] sm:$0xff]  ;;  %2047 = vmatpush.msra.mxu0 %v1265_v62  ;;  %2087 = vmatpush.msra.mxu2 %v306_v0  ;;  %v662_v35 = vld [vmem:[%s3393_s23 + $0xb30] sm:$0xff] }
 0x22b   : > { %2066 = vmatpush.msra.mxu1 %v1333_v63  ;;  %v1329_v4 = vld [vmem:[%s3393_s23 + $0x2008] sm:$0xff]  ;;  %2106 = vmatpush.msra.mxu3 %v374_v1  ;;  %v530_v37 = vld [vmem:[%s3393_s23 + $0x710] sm:$0xff] }
 0x22c   : > { %2048 = vmatmul.f32.vlgmr.msra.gmra.mxu0 %v3047_v6  ;;  %2152 = vmatpush.msrb.mxu2 %v622_v2  ;;  %v590_v38 = vld [vmem:[%s3393_s23 + $0x8f0] sm:$0xff] }
 0x22d   : > { %2112 = vmatpush.msrb.mxu0 %v494_v3  ;;  %2067 = vmatpush.msra.mxu1 %v1329_v4  ;;  %v658_v39 = vld [vmem:[%s3393_s23 + $0xb10] sm:$0xff] }
 0x22e   : > { %2107 = vmatpush.msra.mxu3 %v370_v5  ;;  %2068 = vmatmul.f32.vlgmr.msra.gmra.mxu1 %v3048_v11  ;;  %v458_v40 = vld [vmem:[%s3393_s23 + $0x4d0] sm:$0xff]  ;;  %v3049_v5 = vld [vmem:[%s3417_s10] sm:$0xff]  ;;  %v3050_v11 = vld [vmem:[%s3417_s10 + $0x8] sm:$0xff] }
 0x22f   : > { %2113 = vmatpush.msrb.mxu0 %v490_v7  ;;  %2132 = vmatpush.msrb.mxu1 %v558_v8  ;;  %v526_v41 = vld [vmem:[%s3393_s23 + $0x6f0] sm:$0xff] }
 0x230   : > { %2153 = vmatpush.msrb.mxu2 %v618_v9  ;;  %2172 = vmatpush.msrb.mxu3 %v686_v10  ;;  %v586_v42 = vld [vmem:[%s3393_s23 + $0x8d0] sm:$0xff] }
 0x231   : > { %2114 = vmatpush.msrb.mxu0 %v486_v12  ;;  %2133 = vmatpush.msrb.mxu1 %v554_v13  ;;  %v454_v44 = vld [vmem:[%s3393_s23 + $0x4b0] sm:$0xff] }
 0x232   : > { %2154 = vmatpush.msrb.mxu2 %v614_v14  ;;  %2173 = vmatpush.msrb.mxu3 %v682_v15  ;;  %v522_v45 = vld [vmem:[%s3393_s23 + $0x6d0] sm:$0xff] }
 0x233   : > { %2115 = vmatpush.msrb.mxu0 %v482_v16  ;;  %2134 = vmatpush.msrb.mxu1 %v550_v17  ;;  %v582_v46 = vld [vmem:[%s3393_s23 + $0x8b0] sm:$0xff] }
 0x234   : > { %2155 = vmatpush.msrb.mxu2 %v610_v18  ;;  %2174 = vmatpush.msrb.mxu3 %v678_v19  ;;  %v650_v47 = vld [vmem:[%s3393_s23 + $0xad0] sm:$0xff] }
 0x235   : > { %2116 = vmatpush.msrb.mxu0 %v478_v20  ;;  %2135 = vmatpush.msrb.mxu1 %v546_v21  ;;  %v450_v48 = vld [vmem:[%s3393_s23 + $0x490] sm:$0xff] }
 0x236   : > { %2156 = vmatpush.msrb.mxu2 %v606_v22  ;;  %2175 = vmatpush.msrb.mxu3 %v674_v23  ;;  %v518_v49 = vld [vmem:[%s3393_s23 + $0x6b0] sm:$0xff]  ;;  %v3051_v22 = vld [vmem:[%s3417_s10 + $0x20] sm:$0xff] }
 0x237   : > { %2117 = vmatpush.msrb.mxu0 %v474_v24  ;;  %2136 = vmatpush.msrb.mxu1 %v542_v25  ;;  %v578_v50 = vld [vmem:[%s3393_s23 + $0x890] sm:$0xff] }
 0x238   : > { %2157 = vmatpush.msrb.mxu2 %v602_v26  ;;  %2176 = vmatpush.msrb.mxu3 %v670_v27  ;;  %v646_v51 = vld [vmem:[%s3393_s23 + $0xab0] sm:$0xff] }
 0x239   : > { %2118 = vmatpush.msrb.mxu0 %v470_v28  ;;  %2137 = vmatpush.msrb.mxu1 %v538_v29  ;;  %v446_v52 = vld [vmem:[%s3393_s23 + $0x470] sm:$0xff]  ;;  %v3053_v28 = vld [vmem:[%s3417_s10 + $0x28] sm:$0xff] }
 0x23a   : > { %2158 = vmatpush.msrb.mxu2 %v598_v30  ;;  %2177 = vmatpush.msrb.mxu3 %v666_v31  ;;  %v514_v53 = vld [vmem:[%s3393_s23 + $0x690] sm:$0xff] }
 0x23b   : > { %2119 = vmatpush.msrb.mxu0 %v466_v32  ;;  %2138 = vmatpush.msrb.mxu1 %v534_v33  ;;  %v574_v54 = vld [vmem:[%s3393_s23 + $0x870] sm:$0xff]  ;;  %v3054_v33 = vld [vmem:[%s3417_s10 + $0x18] sm:$0xff] }
 0x23c   : > { %2159 = vmatpush.msrb.mxu2 %v594_v34  ;;  %2178 = vmatpush.msrb.mxu3 %v662_v35  ;;  %v642_v55 = vld [vmem:[%s3393_s23 + $0xa90] sm:$0xff] }
 0x23d   : > { %2120 = vmatpush.msrb.mxu0 %v462_v36  ;;  %2139 = vmatpush.msrb.mxu1 %v530_v37  ;;  %v442_v56 = vld [vmem:[%s3393_s23 + $0x450] sm:$0xff] }
 0x23e   : > { %2160 = vmatpush.msrb.mxu2 %v590_v38  ;;  %2179 = vmatpush.msrb.mxu3 %v658_v39  ;;  %v510_v57 = vld [vmem:[%s3393_s23 + $0x670] sm:$0xff] }
 0x23f   : > { %2121 = vmatpush.msrb.mxu0 %v458_v40  ;;  %2140 = vmatpush.msrb.mxu1 %v526_v41  ;;  %v570_v58 = vld [vmem:[%s3393_s23 + $0x850] sm:$0xff] }
 0x240   : > { %2161 = vmatpush.msrb.mxu2 %v586_v42  ;;  %2180 = vmatpush.msrb.mxu3 %v654_v43  ;;  %v638_v59 = vld [vmem:[%s3393_s23 + $0xa70] sm:$0xff] }
 0x241   : > { %2122 = vmatpush.msrb.mxu0 %v454_v44  ;;  %2141 = vmatpush.msrb.mxu1 %v522_v45  ;;  %v438_v60 = vld [vmem:[%s3393_s23 + $0x430] sm:$0xff] }
 0x242   : > { %2162 = vmatpush.msrb.mxu2 %v582_v46  ;;  %2181 = vmatpush.msrb.mxu3 %v650_v47  ;;  %v506_v61 = vld [vmem:[%s3393_s23 + $0x650] sm:$0xff] }
 0x243   : > { %2123 = vmatpush.msrb.mxu0 %v450_v48  ;;  %2142 = vmatpush.msrb.mxu1 %v518_v49  ;;  %v566_v62 = vld [vmem:[%s3393_s23 + $0x830] sm:$0xff] }
 0x244   : > { %2163 = vmatpush.msrb.mxu2 %v578_v50  ;;  %2182 = vmatpush.msrb.mxu3 %v646_v51  ;;  %v634_v63 = vld [vmem:[%s3393_s23 + $0xa50] sm:$0xff] }
 0x245   : > { %2124 = vmatpush.msrb.mxu0 %v446_v52  ;;  %2143 = vmatpush.msrb.mxu1 %v514_v53  ;;  %v434_v0 = vld [vmem:[%s3393_s23 + $0x410] sm:$0xff] }
 0x246   : > { %2164 = vmatpush.msrb.mxu2 %v574_v54  ;;  %2183 = vmatpush.msrb.mxu3 %v642_v55  ;;  %v502_v1 = vld [vmem:[%s3393_s23 + $0x630] sm:$0xff] }
 0x247   : > { %2125 = vmatpush.msrb.mxu0 %v442_v56  ;;  %2144 = vmatpush.msrb.mxu1 %v510_v57  ;;  %v562_v2 = vld [vmem:[%s3393_s23 + $0x810] sm:$0xff] }
 0x248   : > { %2165 = vmatpush.msrb.mxu2 %v570_v58  ;;  %2184 = vmatpush.msrb.mxu3 %v638_v59  ;;  %v630_v3 = vld [vmem:[%s3393_s23 + $0xa30] sm:$0xff] }
 0x249   : > { %2126 = vmatpush.msrb.mxu0 %v438_v60  ;;  %2145 = vmatpush.msrb.mxu1 %v506_v61  ;;  %v750_v4 = vld [vmem:[%s3393_s23 + $0xdf0] sm:$0xff] }
 0x24a   : > { %2166 = vmatpush.msrb.mxu2 %v566_v62  ;;  %2185 = vmatpush.msrb.mxu3 %v634_v63  ;;  %v878_v6 = vld [vmem:[%s3393_s23 + $0x11f0] sm:$0xff] }
 0x24b   : > { %2088 = vmatmul.f32.vlgmr.msra.gmra.mxu2 %v3049_v5  ;;  %2127 = vmatpush.msrb.mxu0 %v434_v0  ;;  %v498_v7 = vld [vmem:[%s3393_s23 + $0x610] sm:$0xff] }
 0x24c   : > { %2146 = vmatpush.msrb.mxu1 %v502_v1  ;;  %2167 = vmatpush.msrb.mxu2 %v562_v2  ;;  %v626_v8 = vld [vmem:[%s3393_s23 + $0xa10] sm:$0xff] }
 0x24d   : > { %2186 = vmatpush.msrb.mxu3 %v630_v3  ;;  %2192 = vmatpush.msra.mxu0 %v750_v4  ;;  %v746_v9 = vld [vmem:[%s3393_s23 + $0xdd0] sm:$0xff] }
 0x24e   : > { %v814_v10 = vld [vmem:[%s3393_s23 + $0xff0] sm:$0xff]  ;;  %2108 = vmatmul.f32.vlgmr.msra.gmra.mxu3 %v3050_v11  ;;  %2232 = vmatpush.msra.mxu2 %v878_v6 }
 0x24f   : > { %v874_v12 = vld [vmem:[%s3393_s23 + $0x11d0] sm:$0xff]  ;;  %2147 = vmatpush.msrb.mxu1 %v498_v7  ;;  %2187 = vmatpush.msrb.mxu3 %v626_v8 }
 0x250   : > { %v942_v13 = vld [vmem:[%s3393_s23 + $0x13f0] sm:$0xff]  ;;  %2193 = vmatpush.msra.mxu0 %v746_v9  ;;  %2233 = vmatpush.msra.mxu2 %v874_v12 }
 0x251   : > { %v742_v14 = vld [vmem:[%s3393_s23 + $0xdb0] sm:$0xff]  ;;  %2212 = vmatpush.msra.mxu1 %v814_v10  ;;  %2252 = vmatpush.msra.mxu3 %v942_v13 }
 0x252   : > { %v810_v15 = vld [vmem:[%s3393_s23 + $0xfd0] sm:$0xff]  ;;  %2194 = vmatpush.msra.mxu0 %v742_v14  ;;  %2148 = vmatmul.f32.vlgmr.msrb.gmra.mxu1 %v3054_v33 }
 0x253   : > { %v870_v16 = vld [vmem:[%s3393_s23 + $0x11b0] sm:$0xff]  ;;  %2213 = vmatpush.msra.mxu1 %v810_v15  ;;  %2168 = vmatmul.f32.vlgmr.msrb.gmra.mxu2 %v3051_v22  ;;  %v3056_v15 = vld [vmem:[%s3417_s10 + $0x40] sm:$0xff] }
 0x254   : > { %v938_v17 = vld [vmem:[%s3393_s23 + $0x13d0] sm:$0xff]  ;;  %2234 = vmatpush.msra.mxu2 %v870_v16 }
 0x255   : > { %v738_v18 = vld [vmem:[%s3393_s23 + $0xd90] sm:$0xff]  ;;  %2253 = vmatpush.msra.mxu3 %v938_v17 }
 0x256   : > { %v806_v19 = vld [vmem:[%s3393_s23 + $0xfb0] sm:$0xff]  ;;  %2195 = vmatpush.msra.mxu0 %v738_v18  ;;  %2188 = vmatmul.f32.vlgmr.msrb.gmra.mxu3 %v3053_v28 }
 0x257   : > { %v866_v20 = vld [vmem:[%s3393_s23 + $0x1190] sm:$0xff]  ;;  %2214 = vmatpush.msra.mxu1 %v806_v19 }
 0x258   : > { %v934_v21 = vld [vmem:[%s3393_s23 + $0x13b0] sm:$0xff]  ;;  %2235 = vmatpush.msra.mxu2 %v866_v20  ;;  %v3057_v20 = vld [vmem:[%s3417_s10 + $0x38] sm:$0xff] }
 0x259   : > { %v734_v23 = vld [vmem:[%s3393_s23 + $0xd70] sm:$0xff]  ;;  %2254 = vmatpush.msra.mxu3 %v934_v21  ;;  %v3058_v21 = vld [vmem:[%s3417_s10 + $0x48] sm:$0xff] }
 0x25a   : > { %v802_v24 = vld [vmem:[%s3393_s23 + $0xf90] sm:$0xff]  ;;  %2196 = vmatpush.msra.mxu0 %v734_v23 }
 0x25b   : > { %v862_v25 = vld [vmem:[%s3393_s23 + $0x1170] sm:$0xff]  ;;  %2215 = vmatpush.msra.mxu1 %v802_v24 }
 0x25c   : > { %v3052_v26 = vld [vmem:[%s3417_s10 + $0x10] sm:$0xff]  ;;  %2236 = vmatpush.msra.mxu2 %v862_v25 }
 0x25d   : > { %2128 = vmatmul.f32.vlgmr.msrb.gmra.mxu0 %v3052_v26  ;;  %v930_v27 = vld [vmem:[%s3393_s23 + $0x1390] sm:$0xff] }
 0x25e   : > { %v730_v29 = vld [vmem:[%s3393_s23 + $0xd50] sm:$0xff]  ;;  %2255 = vmatpush.msra.mxu3 %v930_v27 }
 0x25f   : > { %v798_v30 = vld [vmem:[%s3393_s23 + $0xf70] sm:$0xff]  ;;  %2197 = vmatpush.msra.mxu0 %v730_v29 }
 0x260   : > { %v858_v31 = vld [vmem:[%s3393_s23 + $0x1150] sm:$0xff]  ;;  %2216 = vmatpush.msra.mxu1 %v798_v30 }
 0x261   : > { %v926_v32 = vld [vmem:[%s3393_s23 + $0x1370] sm:$0xff]  ;;  %2237 = vmatpush.msra.mxu2 %v858_v31 }
 0x262   : > { %v726_v34 = vld [vmem:[%s3393_s23 + $0xd30] sm:$0xff]  ;;  %2256 = vmatpush.msra.mxu3 %v926_v32 }
 0x263   : > { %v794_v35 = vld [vmem:[%s3393_s23 + $0xf50] sm:$0xff]  ;;  %2198 = vmatpush.msra.mxu0 %v726_v34  ;;  %v1769_v34 = vpop.f32.mrf.mxu2 }
 0x264   : > { %v854_v36 = vld [vmem:[%s3393_s23 + $0x1130] sm:$0xff]  ;;  %2217 = vmatpush.msra.mxu1 %v794_v35 }
 0x265   : > { %v922_v37 = vld [vmem:[%s3393_s23 + $0x1350] sm:$0xff]  ;;  %2238 = vmatpush.msra.mxu2 %v854_v36 }
 0x266   : > { %v722_v38 = vld [vmem:[%s3393_s23 + $0xd10] sm:$0xff]  ;;  %2257 = vmatpush.msra.mxu3 %v922_v37 }
 0x267   : > { %v790_v39 = vld [vmem:[%s3393_s23 + $0xf30] sm:$0xff]  ;;  %2199 = vmatpush.msra.mxu0 %v722_v38 }
 0x268   : > { %v850_v40 = vld [vmem:[%s3393_s23 + $0x1110] sm:$0xff]  ;;  %2218 = vmatpush.msra.mxu1 %v790_v39  ;;  %v1749_v39 = vpop.f32.mrf.mxu1 }
 0x269   : > { %v918_v41 = vld [vmem:[%s3393_s23 + $0x1330] sm:$0xff]  ;;  %2239 = vmatpush.msra.mxu2 %v850_v40 }
 0x26a   : > { %v718_v42 = vld [vmem:[%s3393_s23 + $0xcf0] sm:$0xff]  ;;  %2258 = vmatpush.msra.mxu3 %v918_v41 }
 0x26b   : > { %v786_v43 = vld [vmem:[%s3393_s23 + $0xf10] sm:$0xff]  ;;  %2200 = vmatpush.msra.mxu0 %v718_v42  ;;  %v1770_v42 = vadd.f32 %v1769_v34, %v1749_v39  ;;  %v3060_v34 = vld [vmem:[%s3417_s10 + $0x60] sm:$0xff]  ;;  %v367_v39 = vld [vmem:[%s3393_s23 + $0x1f8] sm:$0xff] }
 0x26c   : > { %v846_v44 = vld [vmem:[%s3393_s23 + $0x10f0] sm:$0xff]  ;;  %2219 = vmatpush.msra.mxu1 %v786_v43 }
 0x26d   : > { %v914_v45 = vld [vmem:[%s3393_s23 + $0x1310] sm:$0xff]  ;;  %2240 = vmatpush.msra.mxu2 %v846_v44 }
 0x26e   : > { %v714_v46 = vld [vmem:[%s3393_s23 + $0xcd0] sm:$0xff]  ;;  %2259 = vmatpush.msra.mxu3 %v914_v45  ;;  %v1789_v45 = vpop.f32.mrf.mxu3 }
 0x26f   : > { %v782_v47 = vld [vmem:[%s3393_s23 + $0xef0] sm:$0xff]  ;;  %2201 = vmatpush.msra.mxu0 %v714_v46 }
 0x270   : > { %v842_v48 = vld [vmem:[%s3393_s23 + $0x10d0] sm:$0xff]  ;;  %2220 = vmatpush.msra.mxu1 %v782_v47 }
 0x271   : > { %v910_v49 = vld [vmem:[%s3393_s23 + $0x12f0] sm:$0xff]  ;;  %2241 = vmatpush.msra.mxu2 %v842_v48 }
 0x272   : > { %v710_v50 = vld [vmem:[%s3393_s23 + $0xcb0] sm:$0xff]  ;;  %2260 = vmatpush.msra.mxu3 %v910_v49 }
 0x273   : > { %v778_v51 = vld [vmem:[%s3393_s23 + $0xed0] sm:$0xff]  ;;  %2202 = vmatpush.msra.mxu0 %v710_v50 }
 0x274   : > { %v838_v52 = vld [vmem:[%s3393_s23 + $0x10b0] sm:$0xff]  ;;  %2221 = vmatpush.msra.mxu1 %v778_v51 }
 0x275   : > { %v906_v53 = vld [vmem:[%s3393_s23 + $0x12d0] sm:$0xff]  ;;  %2242 = vmatpush.msra.mxu2 %v838_v52  ;;  %v1790_v52 = vadd.f32 %v1789_v45, %v1770_v42  ;;  %v3062_v42 = vld [vmem:[%s3417_s10 + $0x68] sm:$0xff] }
 0x276   : > { %v706_v54 = vld [vmem:[%s3393_s23 + $0xc90] sm:$0xff]  ;;  %2261 = vmatpush.msra.mxu3 %v906_v53 }
 0x277   : > { %v774_v55 = vld [vmem:[%s3393_s23 + $0xeb0] sm:$0xff]  ;;  %2203 = vmatpush.msra.mxu0 %v706_v54 }
 0x278   : > { %v834_v56 = vld [vmem:[%s3393_s23 + $0x1090] sm:$0xff]  ;;  %2222 = vmatpush.msra.mxu1 %v774_v55  ;;  %v1809_v55 = vpop.f32.mrf.mxu0 }
 0x279   : > { %v902_v57 = vld [vmem:[%s3393_s23 + $0x12b0] sm:$0xff]  ;;  %2243 = vmatpush.msra.mxu2 %v834_v56 }
 0x27a   : > { %v702_v58 = vld [vmem:[%s3393_s23 + $0xc70] sm:$0xff]  ;;  %2262 = vmatpush.msra.mxu3 %v902_v57 }
 0x27b   : > { %v770_v59 = vld [vmem:[%s3393_s23 + $0xe90] sm:$0xff]  ;;  %2204 = vmatpush.msra.mxu0 %v702_v58 }
 0x27c   : > { %v830_v60 = vld [vmem:[%s3393_s23 + $0x1070] sm:$0xff]  ;;  %2223 = vmatpush.msra.mxu1 %v770_v59 }
 0x27d   : > { %v898_v61 = vld [vmem:[%s3393_s23 + $0x1290] sm:$0xff]  ;;  %2244 = vmatpush.msra.mxu2 %v830_v60 }
 0x27e   : > { %v698_v62 = vld [vmem:[%s3393_s23 + $0xc50] sm:$0xff]  ;;  %2263 = vmatpush.msra.mxu3 %v898_v61 }
 0x27f   : > { %v766_v63 = vld [vmem:[%s3393_s23 + $0xe70] sm:$0xff]  ;;  %2205 = vmatpush.msra.mxu0 %v698_v62  ;;  %v1810_v62 = vadd.f32 %v1809_v55, %v1790_v52  ;;  %v359_v52 = vld [vmem:[%s3393_s23 + $0x1b8] sm:$0xff] }
 0x280   : > { %v826_v0 = vld [vmem:[%s3393_s23 + $0x1050] sm:$0xff]  ;;  %2224 = vmatpush.msra.mxu1 %v766_v63 }
 0x281   : > { %v894_v1 = vld [vmem:[%s3393_s23 + $0x1270] sm:$0xff]  ;;  %2245 = vmatpush.msra.mxu2 %v826_v0 }
 0x282   : > { %v694_v2 = vld [vmem:[%s3393_s23 + $0xc30] sm:$0xff]  ;;  %2264 = vmatpush.msra.mxu3 %v894_v1  ;;  %v1829_v1 = vpop.f32.mrf.mxu1 }
 0x283   : > { %v762_v3 = vld [vmem:[%s3393_s23 + $0xe50] sm:$0xff]  ;;  %2206 = vmatpush.msra.mxu0 %v694_v2 }
 0x284   : > { %v822_v4 = vld [vmem:[%s3393_s23 + $0x1030] sm:$0xff]  ;;  %2225 = vmatpush.msra.mxu1 %v762_v3 }
 0x285   : > { %v890_v5 = vld [vmem:[%s3393_s23 + $0x1250] sm:$0xff]  ;;  %2246 = vmatpush.msra.mxu2 %v822_v4 }
 0x286   : > { %v690_v6 = vld [vmem:[%s3393_s23 + $0xc10] sm:$0xff]  ;;  %2265 = vmatpush.msra.mxu3 %v890_v5 }
 0x287   : > { %v758_v7 = vld [vmem:[%s3393_s23 + $0xe30] sm:$0xff]  ;;  %2207 = vmatpush.msra.mxu0 %v690_v6 }
 0x288   : > { %v818_v8 = vld [vmem:[%s3393_s23 + $0x1010] sm:$0xff]  ;;  %2226 = vmatpush.msra.mxu1 %v758_v7 }
 0x289   : > { %v886_v9 = vld [vmem:[%s3393_s23 + $0x1230] sm:$0xff]  ;;  %2247 = vmatpush.msra.mxu2 %v818_v8  ;;  %v1830_v8 = vadd.f32 %v1829_v1, %v1810_v62 }
 0x28a   : > { %v1006_v10 = vld [vmem:[%s3393_s23 + $0x15f0] sm:$0xff]  ;;  %2266 = vmatpush.msra.mxu3 %v886_v9  ;;  %2248 = vmatmul.f32.vlgmr.msra.gmra.mxu2 %v3056_v15 }
 0x28b   : > { %v1134_v11 = vld [vmem:[%s3393_s23 + $0x19f0] sm:$0xff]  ;;  %2272 = vmatpush.msrb.mxu0 %v1006_v10 }
 0x28c   : > { %v754_v12 = vld [vmem:[%s3393_s23 + $0xe10] sm:$0xff]  ;;  %2312 = vmatpush.msrb.mxu2 %v1134_v11  ;;  %v1849_v11 = vpop.f32.mrf.mxu2 }
 0x28d   : > { %v882_v13 = vld [vmem:[%s3393_s23 + $0x1210] sm:$0xff]  ;;  %2227 = vmatpush.msra.mxu1 %v754_v12 }
 0x28e   : > { %v3055_v14 = vld [vmem:[%s3417_s10 + $0x30] sm:$0xff]  ;;  %2267 = vmatpush.msra.mxu3 %v882_v13  ;;  %2228 = vmatmul.f32.vlgmr.msra.gmra.mxu1 %v3057_v20 }
 0x28f   : > { %2208 = vmatmul.f32.vlgmr.msra.gmra.mxu0 %v3055_v14  ;;  %v1002_v16 = vld [vmem:[%s3393_s23 + $0x15d0] sm:$0xff]  ;;  %2268 = vmatmul.f32.vlgmr.msra.gmra.mxu3 %v3058_v21  ;;  %v1869_v21 = vpop.f32.mrf.mxu3 }
 0x290   : > { %v1070_v17 = vld [vmem:[%s3393_s23 + $0x17f0] sm:$0xff]  ;;  %2273 = vmatpush.msrb.mxu0 %v1002_v16 }
 0x291   : > { %v1130_v18 = vld [vmem:[%s3393_s23 + $0x19d0] sm:$0xff]  ;;  %2292 = vmatpush.msrb.mxu1 %v1070_v17 }
 0x292   : > { %v1198_v19 = vld [vmem:[%s3393_s23 + $0x1bf0] sm:$0xff]  ;;  %2313 = vmatpush.msrb.mxu2 %v1130_v18  ;;  %v1850_v18 = vadd.f32 %v1849_v11, %v1830_v8 }
 0x293   : > { %v998_v22 = vld [vmem:[%s3393_s23 + $0x15b0] sm:$0xff]  ;;  %2332 = vmatpush.msrb.mxu3 %v1198_v19 }
 0x294   : > { %v1066_v23 = vld [vmem:[%s3393_s23 + $0x17d0] sm:$0xff]  ;;  %2274 = vmatpush.msrb.mxu0 %v998_v22 }
 0x295   : > { %v1126_v24 = vld [vmem:[%s3393_s23 + $0x19b0] sm:$0xff]  ;;  %2293 = vmatpush.msrb.mxu1 %v1066_v23 }
 0x296   : > { %v1194_v25 = vld [vmem:[%s3393_s23 + $0x1bd0] sm:$0xff]  ;;  %2314 = vmatpush.msrb.mxu2 %v1126_v24 }
 0x297   : > { %v994_v26 = vld [vmem:[%s3393_s23 + $0x1590] sm:$0xff]  ;;  %2333 = vmatpush.msrb.mxu3 %v1194_v25 }
 0x298   : > { %v1062_v27 = vld [vmem:[%s3393_s23 + $0x17b0] sm:$0xff]  ;;  %2275 = vmatpush.msrb.mxu0 %v994_v26  ;;  %v1889_v26 = vpop.f32.mrf.mxu0 }
 0x299   : > { %v1122_v28 = vld [vmem:[%s3393_s23 + $0x1990] sm:$0xff]  ;;  %2294 = vmatpush.msrb.mxu1 %v1062_v27  ;;  %v1870_v27 = vadd.f32 %v1869_v21, %v1850_v18 }
 0x29a   : > { %v1190_v29 = vld [vmem:[%s3393_s23 + $0x1bb0] sm:$0xff]  ;;  %2315 = vmatpush.msrb.mxu2 %v1122_v28 }
 0x29b   : > { %v990_v30 = vld [vmem:[%s3393_s23 + $0x1570] sm:$0xff]  ;;  %2334 = vmatpush.msrb.mxu3 %v1190_v29 }
 0x29c   : > { %v1058_v31 = vld [vmem:[%s3393_s23 + $0x1790] sm:$0xff]  ;;  %2276 = vmatpush.msrb.mxu0 %v990_v30 }
 0x29d   : > { %v1118_v32 = vld [vmem:[%s3393_s23 + $0x1970] sm:$0xff]  ;;  %2295 = vmatpush.msrb.mxu1 %v1058_v31 }
 0x29e   : > { %v1186_v33 = vld [vmem:[%s3393_s23 + $0x1b90] sm:$0xff]  ;;  %2316 = vmatpush.msrb.mxu2 %v1118_v32  ;;  %v1890_v32 = vadd.f32 %v1889_v26, %v1870_v27 }
 0x29f   : > { %v986_v35 = vld [vmem:[%s3393_s23 + $0x1550] sm:$0xff]  ;;  %2335 = vmatpush.msrb.mxu3 %v1186_v33 }
 0x2a0   : > { %v1054_v36 = vld [vmem:[%s3393_s23 + $0x1770] sm:$0xff]  ;;  %2277 = vmatpush.msrb.mxu0 %v986_v35  ;;  %v1909_v35 = vpop.f32.mrf.mxu1 }
 0x2a1   : > { %v1114_v37 = vld [vmem:[%s3393_s23 + $0x1950] sm:$0xff]  ;;  %2296 = vmatpush.msrb.mxu1 %v1054_v36  ;;  %v1910_v45 = vadd.f32 %v1909_v35, %v1890_v32  ;;  %v323_v35 = vld [vmem:[%s3393_s23 + $0x98] sm:$0xff] }
 0x2a2   : > { %v1182_v38 = vld [vmem:[%s3393_s23 + $0x1b70] sm:$0xff]  ;;  %2317 = vmatpush.msrb.mxu2 %v1114_v37 }
 0x2a3   : > { %v982_v40 = vld [vmem:[%s3393_s23 + $0x1530] sm:$0xff]  ;;  %2336 = vmatpush.msrb.mxu3 %v1182_v38 }
 0x2a4   : > { %v1050_v41 = vld [vmem:[%s3393_s23 + $0x1750] sm:$0xff]  ;;  %2278 = vmatpush.msrb.mxu0 %v982_v40  ;;  %v1929_v40 = vpop.f32.mrf.mxu2 }
 0x2a5   : > { %v1110_v43 = vld [vmem:[%s3393_s23 + $0x1930] sm:$0xff]  ;;  %2297 = vmatpush.msrb.mxu1 %v1050_v41  ;;  %v3061_v41 = vld [vmem:[%s3417_s10 + $0x58] sm:$0xff] }
 0x2a6   : > { %v1178_v44 = vld [vmem:[%s3393_s23 + $0x1b50] sm:$0xff]  ;;  %2318 = vmatpush.msrb.mxu2 %v1110_v43 }
 0x2a7   : > { %v978_v46 = vld [vmem:[%s3393_s23 + $0x1510] sm:$0xff]  ;;  %2337 = vmatpush.msrb.mxu3 %v1178_v44 }
 0x2a8   : > { %v1046_v47 = vld [vmem:[%s3393_s23 + $0x1730] sm:$0xff]  ;;  %2279 = vmatpush.msrb.mxu0 %v978_v46 }
 0x2a9   : > { %v1106_v48 = vld [vmem:[%s3393_s23 + $0x1910] sm:$0xff]  ;;  %2298 = vmatpush.msrb.mxu1 %v1046_v47  ;;  %v363_v47 = vld [vmem:[%s3393_s23 + $0x1d8] sm:$0xff] }
 0x2aa   : > { %v1174_v49 = vld [vmem:[%s3393_s23 + $0x1b30] sm:$0xff]  ;;  %2319 = vmatpush.msrb.mxu2 %v1106_v48 }
 0x2ab   : > { %v974_v50 = vld [vmem:[%s3393_s23 + $0x14f0] sm:$0xff]  ;;  %2338 = vmatpush.msrb.mxu3 %v1174_v49 }
 0x2ac   : > { %v1042_v51 = vld [vmem:[%s3393_s23 + $0x1710] sm:$0xff]  ;;  %2280 = vmatpush.msrb.mxu0 %v974_v50  ;;  %v1930_v50 = vadd.f32 %v1929_v40, %v1910_v45 }
 0x2ad   : > { %v1102_v53 = vld [vmem:[%s3393_s23 + $0x18f0] sm:$0xff]  ;;  %2299 = vmatpush.msrb.mxu1 %v1042_v51 }
 0x2ae   : > { %v1170_v54 = vld [vmem:[%s3393_s23 + $0x1b10] sm:$0xff]  ;;  %2320 = vmatpush.msrb.mxu2 %v1102_v53  ;;  %v1949_v53 = vpop.f32.mrf.mxu3 }
 0x2af   : > { %v970_v56 = vld [vmem:[%s3393_s23 + $0x14d0] sm:$0xff]  ;;  %2339 = vmatpush.msrb.mxu3 %v1170_v54 }
 0x2b0   : > { %v1038_v57 = vld [vmem:[%s3393_s23 + $0x16f0] sm:$0xff]  ;;  %2281 = vmatpush.msrb.mxu0 %v970_v56 }
 0x2b1   : > { %v1098_v58 = vld [vmem:[%s3393_s23 + $0x18d0] sm:$0xff]  ;;  %2300 = vmatpush.msrb.mxu1 %v1038_v57  ;;  %v355_v57 = vld [vmem:[%s3393_s23 + $0x198] sm:$0xff] }
 0x2b2   : > { %v1166_v59 = vld [vmem:[%s3393_s23 + $0x1af0] sm:$0xff]  ;;  %2321 = vmatpush.msrb.mxu2 %v1098_v58  ;;  %v1969_v58 = vpop.f32.mrf.mxu0 }
 0x2b3   : > { %v966_v60 = vld [vmem:[%s3393_s23 + $0x14b0] sm:$0xff]  ;;  %2340 = vmatpush.msrb.mxu3 %v1166_v59 }
 0x2b4   : > { %v1034_v61 = vld [vmem:[%s3393_s23 + $0x16d0] sm:$0xff]  ;;  %2282 = vmatpush.msrb.mxu0 %v966_v60 }
 0x2b5   : > { %v1094_v63 = vld [vmem:[%s3393_s23 + $0x18b0] sm:$0xff]  ;;  %2301 = vmatpush.msrb.mxu1 %v1034_v61  ;;  %v1950_v61 = vadd.f32 %v1949_v53, %v1930_v50  ;;  %v431_v53 = vld [vmem:[%s3393_s23 + $0x3f8] sm:$0xff] }
 0x2b6   : > { %v1162_v0 = vld [vmem:[%s3393_s23 + $0x1ad0] sm:$0xff]  ;;  %2322 = vmatpush.msrb.mxu2 %v1094_v63  ;;  %v351_v63 = vld [vmem:[%s3393_s23 + $0x178] sm:$0xff]  ;;  %v2029_v21 = vpop.f32.mrf.mxu3 }
 0x2b7   : > { %v962_v2 = vld [vmem:[%s3393_s23 + $0x1490] sm:$0xff]  ;;  %2341 = vmatpush.msrb.mxu3 %v1162_v0 }
 0x2b8   : > { %v1030_v3 = vld [vmem:[%s3393_s23 + $0x16b0] sm:$0xff]  ;;  %2283 = vmatpush.msrb.mxu0 %v962_v2  ;;  %v1970_v2 = vadd.f32 %v1969_v58, %v1950_v61  ;;  %v3064_v58 = vld [vmem:[%s3417_s10 + $0x80] sm:$0xff]  ;;  %v555_v61 = vld [vmem:[%s3393_s23 + $0x7d8] sm:$0xff] }
 0x2b9   : > { %v1090_v4 = vld [vmem:[%s3393_s23 + $0x1890] sm:$0xff]  ;;  %2302 = vmatpush.msrb.mxu1 %v1030_v3 }
 0x2ba   : > { %v1158_v5 = vld [vmem:[%s3393_s23 + $0x1ab0] sm:$0xff]  ;;  %2323 = vmatpush.msrb.mxu2 %v1090_v4  ;;  %v347_v4 = vld [vmem:[%s3393_s23 + $0x158] sm:$0xff] }
 0x2bb   : > { %v958_v6 = vld [vmem:[%s3393_s23 + $0x1470] sm:$0xff]  ;;  %2342 = vmatpush.msrb.mxu3 %v1158_v5  ;;  %v1989_v5 = vpop.f32.mrf.mxu1 }
 0x2bc   : > { %v1026_v7 = vld [vmem:[%s3393_s23 + $0x1690] sm:$0xff]  ;;  %2284 = vmatpush.msrb.mxu0 %v958_v6 }
 0x2bd   : > { %v1086_v9 = vld [vmem:[%s3393_s23 + $0x1870] sm:$0xff]  ;;  %2303 = vmatpush.msrb.mxu1 %v1026_v7 }
 0x2be   : > { %v1154_v10 = vld [vmem:[%s3393_s23 + $0x1a90] sm:$0xff]  ;;  %2324 = vmatpush.msrb.mxu2 %v1086_v9  ;;  %v343_v9 = vld [vmem:[%s3393_s23 + $0x138] sm:$0xff] }
 0x2bf   : > { %v954_v12 = vld [vmem:[%s3393_s23 + $0x1450] sm:$0xff]  ;;  %2343 = vmatpush.msrb.mxu3 %v1154_v10  ;;  %v2009_v10 = vpop.f32.mrf.mxu2 }
 0x2c0   : > { %v1022_v13 = vld [vmem:[%s3393_s23 + $0x1670] sm:$0xff]  ;;  %2285 = vmatpush.msrb.mxu0 %v954_v12 }
 0x2c1   : > { %v1082_v14 = vld [vmem:[%s3393_s23 + $0x1850] sm:$0xff]  ;;  %2304 = vmatpush.msrb.mxu1 %v1022_v13  ;;  %v1990_v13 = vadd.f32 %v1989_v5, %v1970_v2  ;;  %v551_v2 = vld [vmem:[%s3393_s23 + $0x7b8] sm:$0xff] }
 0x2c2   : > { %v1150_v15 = vld [vmem:[%s3393_s23 + $0x1a70] sm:$0xff]  ;;  %2325 = vmatpush.msrb.mxu2 %v1082_v14  ;;  %v487_v5 = vld [vmem:[%s3393_s23 + $0x5b8] sm:$0xff] }
 0x2c3   : > { %v950_v16 = vld [vmem:[%s3393_s23 + $0x1430] sm:$0xff]  ;;  %2344 = vmatpush.msrb.mxu3 %v1150_v15  ;;  %v339_v15 = vld [vmem:[%s3393_s23 + $0x118] sm:$0xff]  ;;  %v2010_v18 = vadd.f32 %v2009_v10, %v1990_v13  ;;  %v2069_v40 = vpop.f32.mrf.mxu1 }
 0x2c4   : > { %v1018_v17 = vld [vmem:[%s3393_s23 + $0x1650] sm:$0xff]  ;;  %2286 = vmatpush.msrb.mxu0 %v950_v16  ;;  %v543_v10 = vld [vmem:[%s3393_s23 + $0x778] sm:$0xff] }
 0x2c5   : > { %v1078_v19 = vld [vmem:[%s3393_s23 + $0x1830] sm:$0xff]  ;;  %2305 = vmatpush.msrb.mxu1 %v1018_v17  ;;  %v479_v13 = vld [vmem:[%s3393_s23 + $0x578] sm:$0xff] }
 0x2c6   : > { %v1146_v20 = vld [vmem:[%s3393_s23 + $0x1a50] sm:$0xff]  ;;  %2326 = vmatpush.msrb.mxu2 %v1078_v19 }
 0x2c7   : > { %v946_v22 = vld [vmem:[%s3393_s23 + $0x1410] sm:$0xff]  ;;  %2345 = vmatpush.msrb.mxu3 %v1146_v20  ;;  %v335_v20 = vld [vmem:[%s3393_s23 + $0xf8] sm:$0xff] }
 0x2c8   : > { %v1014_v23 = vld [vmem:[%s3393_s23 + $0x1630] sm:$0xff]  ;;  %2287 = vmatpush.msrb.mxu0 %v946_v22 }
 0x2c9   : > { %v1074_v24 = vld [vmem:[%s3393_s23 + $0x1810] sm:$0xff]  ;;  %2306 = vmatpush.msrb.mxu1 %v1014_v23 }
 0x2ca   : > { %v1142_v25 = vld [vmem:[%s3393_s23 + $0x1a30] sm:$0xff]  ;;  %2327 = vmatpush.msrb.mxu2 %v1074_v24 }
 0x2cb   : > { %v1262_v28 = vld [vmem:[%s3393_s23 + $0x1df0] sm:$0xff]  ;;  %2346 = vmatpush.msrb.mxu3 %v1142_v25  ;;  %2328 = vmatmul.f32.vlgmr.msrb.gmra.mxu2 %v3060_v34  ;;  %v331_v25 = vld [vmem:[%s3393_s23 + $0xd8] sm:$0xff] }
 0x2cc   : > { %v1390_v29 = vld [vmem:[%s3393_s23 + $0x21f0] sm:$0xff]  ;;  %2352 = vmatpush.msra.mxu0 %v1262_v28  ;;  %v2030_v28 = vadd.f32 %v2029_v21, %v2010_v18  ;;  %v535_v18 = vld [vmem:[%s3393_s23 + $0x738] sm:$0xff] }
 0x2cd   : > { %v1010_v30 = vld [vmem:[%s3393_s23 + $0x1610] sm:$0xff]  ;;  %2392 = vmatpush.msra.mxu2 %v1390_v29  ;;  %v471_v21 = vld [vmem:[%s3393_s23 + $0x538] sm:$0xff] }
 0x2ce   : > { %v1138_v31 = vld [vmem:[%s3393_s23 + $0x1a10] sm:$0xff]  ;;  %2307 = vmatpush.msrb.mxu1 %v1010_v30  ;;  %v327_v30 = vld [vmem:[%s3393_s23 + $0xb8] sm:$0xff] }
 0x2cf   : > { %v3059_v33 = vld [vmem:[%s3417_s10 + $0x50] sm:$0xff]  ;;  %2347 = vmatpush.msrb.mxu3 %v1138_v31  ;;  %2308 = vmatmul.f32.vlgmr.msrb.gmra.mxu1 %v3061_v41 }
 0x2d0   : > { %2288 = vmatmul.f32.vlgmr.msrb.gmra.mxu0 %v3059_v33  ;;  %v1258_v36 = vld [vmem:[%s3393_s23 + $0x1dd0] sm:$0xff]  ;;  %2348 = vmatmul.f32.vlgmr.msrb.gmra.mxu3 %v3062_v42  ;;  %v2049_v33 = vpop.f32.mrf.mxu0  ;;  %v319_v42 = vld [vmem:[%s3393_s23 + $0x78] sm:$0xff] }
 0x2d1   : > { %v1326_v37 = vld [vmem:[%s3393_s23 + $0x1ff0] sm:$0xff]  ;;  %2353 = vmatpush.msra.mxu0 %v1258_v36  ;;  %2412 = vmatpush.msra.mxu3 %v367_v39  ;;  %v2050_v36 = vadd.f32 %v2049_v33, %v2030_v28  ;;  %v284_v39 = vld [vmem:[#allocation2] sm:$0xff]  ;;  %v395_v28 = vld [vmem:[%s3393_s23 + $0x2d8] sm:$0xff] }
 0x2d2   : > { %v1386_v38 = vld [vmem:[%s3393_s23 + $0x21d0] sm:$0xff]  ;;  %2372 = vmatpush.msra.mxu1 %v1326_v37  ;;  %v459_v33 = vld [vmem:[%s3393_s23 + $0x4d8] sm:$0xff] }
 0x2d3   : > { %v1254_v43 = vld [vmem:[%s3393_s23 + $0x1db0] sm:$0xff]  ;;  %2393 = vmatpush.msra.mxu2 %v1386_v38  ;;  %2413 = vmatpush.msra.mxu3 %v363_v47  ;;  %v315_v47 = vld [vmem:[%s3393_s23 + $0x58] sm:$0xff] }
 0x2d4   : > { %v1322_v44 = vld [vmem:[%s3393_s23 + $0x1fd0] sm:$0xff]  ;;  %2354 = vmatpush.msra.mxu0 %v1254_v43  ;;  %v2070_v43 = vadd.f32 %v2069_v40, %v2050_v36  ;;  %v387_v36 = vld [vmem:[%s3393_s23 + $0x298] sm:$0xff] }
 0x2d5   : > { %v1382_v46 = vld [vmem:[%s3393_s23 + $0x21b0] sm:$0xff]  ;;  %2373 = vmatpush.msra.mxu1 %v1322_v44  ;;  %2414 = vmatpush.msra.mxu3 %v359_v52  ;;  %v311_v52 = vld [vmem:[%s3393_s23 + $0x38] sm:$0xff] }
 0x2d6   : > { %v1250_v48 = vld [vmem:[%s3393_s23 + $0x1d90] sm:$0xff]  ;;  %2394 = vmatpush.msra.mxu2 %v1382_v46  ;;  %v383_v40 = vld [vmem:[%s3393_s23 + $0x278] sm:$0xff] }
 0x2d7   : > { %v1318_v49 = vld [vmem:[%s3393_s23 + $0x1fb0] sm:$0xff]  ;;  %2355 = vmatpush.msra.mxu0 %v1250_v48  ;;  %2415 = vmatpush.msra.mxu3 %v355_v57  ;;  %v2753_v48 = vadd.f32 %v2070_v43, %v284_v39  ;;  %v583_v39 = vld [vmem:[%s3393_s23 + $0x8b8] sm:$0xff] }
 0x2d8   : > { %v1378_v51 = vld [vmem:[%s3393_s23 + $0x2190] sm:$0xff]  ;;  %2374 = vmatpush.msra.mxu1 %v1318_v49  ;;  %v579_v43 = vld [vmem:[%s3393_s23 + $0x898] sm:$0xff] }
 0x2d9   : > { %v1246_v54 = vld [vmem:[%s3393_s23 + $0x1d70] sm:$0xff]  ;;  %2395 = vmatpush.msra.mxu2 %v1378_v51  ;;  %2416 = vmatpush.msra.mxu3 %v351_v63  ;;  %2757 = vst [vmem:[#allocation2] sm:$0xff] %v2753_v48  ;;  %v423_v63 = vld [vmem:[%s3393_s23 + $0x3b8] sm:$0xff] }
 0x2da   : > { %v1314_v55 = vld [vmem:[%s3393_s23 + $0x1f90] sm:$0xff]  ;;  %2356 = vmatpush.msra.mxu0 %v1246_v54  ;;  %v559_v54 = vld [vmem:[%s3393_s23 + $0x7f8] sm:$0xff] }
 0x2db   : > { %v1374_v56 = vld [vmem:[%s3393_s23 + $0x2170] sm:$0xff]  ;;  %2375 = vmatpush.msra.mxu1 %v1314_v55  ;;  %2417 = vmatpush.msra.mxu3 %v347_v4  ;;  %v419_v4 = vld [vmem:[%s3393_s23 + $0x398] sm:$0xff] }
 0x2dc   : > { %v1242_v59 = vld [vmem:[%s3393_s23 + $0x1d50] sm:$0xff]  ;;  %2396 = vmatpush.msra.mxu2 %v1374_v56  ;;  %v307_v56 = vld [vmem:[%s3393_s23 + $0x18] sm:$0xff] }
 0x2dd   : > { %v1310_v60 = vld [vmem:[%s3393_s23 + $0x1f70] sm:$0xff]  ;;  %2357 = vmatpush.msra.mxu0 %v1242_v59  ;;  %2418 = vmatpush.msra.mxu3 %v343_v9  ;;  %v427_v59 = vld [vmem:[%s3393_s23 + $0x3d8] sm:$0xff] }
 0x2de   : > { %v1370_v62 = vld [vmem:[%s3393_s23 + $0x2150] sm:$0xff]  ;;  %2376 = vmatpush.msra.mxu1 %v1310_v60  ;;  %v495_v60 = vld [vmem:[%s3393_s23 + $0x5f8] sm:$0xff] }
 0x2df   : > { %v1238_v0 = vld [vmem:[%s3393_s23 + $0x1d30] sm:$0xff]  ;;  %2397 = vmatpush.msra.mxu2 %v1370_v62  ;;  %2419 = vmatpush.msra.mxu3 %v339_v15  ;;  %v623_v62 = vld [vmem:[%s3393_s23 + $0x9f8] sm:$0xff] }
 0x2e0   : > { %v1306_v1 = vld [vmem:[%s3393_s23 + $0x1f50] sm:$0xff]  ;;  %2358 = vmatpush.msra.mxu0 %v1238_v0  ;;  %v3065_v0 = vld [vmem:[%s3417_s10 + $0x78] sm:$0xff] }
 0x2e1   : > { %v1366_v3 = vld [vmem:[%s3393_s23 + $0x2130] sm:$0xff]  ;;  %2377 = vmatpush.msra.mxu1 %v1306_v1  ;;  %2420 = vmatpush.msra.mxu3 %v335_v20  ;;  %v491_v1 = vld [vmem:[%s3393_s23 + $0x5d8] sm:$0xff] }
 0x2e2   : > { %v1234_v6 = vld [vmem:[%s3393_s23 + $0x1d10] sm:$0xff]  ;;  %2398 = vmatpush.msra.mxu2 %v1366_v3  ;;  %v619_v3 = vld [vmem:[%s3393_s23 + $0x9d8] sm:$0xff] }
 0x2e3   : > { %v1302_v7 = vld [vmem:[%s3393_s23 + $0x1f30] sm:$0xff]  ;;  %2359 = vmatpush.msra.mxu0 %v1234_v6  ;;  %2421 = vmatpush.msra.mxu3 %v331_v25  ;;  %v547_v6 = vld [vmem:[%s3393_s23 + $0x798] sm:$0xff] }
 0x2e4   : > { %v1362_v8 = vld [vmem:[%s3393_s23 + $0x2110] sm:$0xff]  ;;  %2378 = vmatpush.msra.mxu1 %v1302_v7  ;;  %v615_v7 = vld [vmem:[%s3393_s23 + $0x9b8] sm:$0xff] }
 0x2e5   : > { %v1230_v11 = vld [vmem:[%s3393_s23 + $0x1cf0] sm:$0xff]  ;;  %2399 = vmatpush.msra.mxu2 %v1362_v8  ;;  %2422 = vmatpush.msra.mxu3 %v327_v30  ;;  %v415_v8 = vld [vmem:[%s3393_s23 + $0x378] sm:$0xff] }
 0x2e6   : > { %v1298_v12 = vld [vmem:[%s3393_s23 + $0x1f10] sm:$0xff]  ;;  %2360 = vmatpush.msra.mxu0 %v1230_v11  ;;  %v483_v9 = vld [vmem:[%s3393_s23 + $0x598] sm:$0xff] }
 0x2e7   : > { %v1358_v14 = vld [vmem:[%s3393_s23 + $0x20f0] sm:$0xff]  ;;  %2379 = vmatpush.msra.mxu1 %v1298_v12  ;;  %2423 = vmatpush.msra.mxu3 %v323_v35  ;;  %v611_v11 = vld [vmem:[%s3393_s23 + $0x998] sm:$0xff] }
 0x2e8   : > { %v1226_v16 = vld [vmem:[%s3393_s23 + $0x1cd0] sm:$0xff]  ;;  %2400 = vmatpush.msra.mxu2 %v1358_v14  ;;  %v411_v12 = vld [vmem:[%s3393_s23 + $0x358] sm:$0xff] }
 0x2e9   : > { %v1294_v17 = vld [vmem:[%s3393_s23 + $0x1ef0] sm:$0xff]  ;;  %2361 = vmatpush.msra.mxu0 %v1226_v16  ;;  %2424 = vmatpush.msra.mxu3 %v319_v42  ;;  %v539_v14 = vld [vmem:[%s3393_s23 + $0x758] sm:$0xff] }
 0x2ea   : > { %v1354_v19 = vld [vmem:[%s3393_s23 + $0x20d0] sm:$0xff]  ;;  %2380 = vmatpush.msra.mxu1 %v1294_v17  ;;  %v607_v15 = vld [vmem:[%s3393_s23 + $0x978] sm:$0xff] }
 0x2eb   : > { %v1222_v22 = vld [vmem:[%s3393_s23 + $0x1cb0] sm:$0xff]  ;;  %2401 = vmatpush.msra.mxu2 %v1354_v19  ;;  %2425 = vmatpush.msra.mxu3 %v315_v47  ;;  %v407_v16 = vld [vmem:[%s3393_s23 + $0x338] sm:$0xff] }
 0x2ec   : > { %v1290_v23 = vld [vmem:[%s3393_s23 + $0x1ed0] sm:$0xff]  ;;  %2362 = vmatpush.msra.mxu0 %v1222_v22  ;;  %v475_v17 = vld [vmem:[%s3393_s23 + $0x558] sm:$0xff] }
 0x2ed   : > { %v1350_v24 = vld [vmem:[%s3393_s23 + $0x20b0] sm:$0xff]  ;;  %2381 = vmatpush.msra.mxu1 %v1290_v23  ;;  %2426 = vmatpush.msra.mxu3 %v311_v52  ;;  %v603_v19 = vld [vmem:[%s3393_s23 + $0x958] sm:$0xff] }
 0x2ee   : > { %v1218_v26 = vld [vmem:[%s3393_s23 + $0x1c90] sm:$0xff]  ;;  %2402 = vmatpush.msra.mxu2 %v1350_v24  ;;  %v403_v20 = vld [vmem:[%s3393_s23 + $0x318] sm:$0xff] }
 0x2ef   : > { %v1286_v27 = vld [vmem:[%s3393_s23 + $0x1eb0] sm:$0xff]  ;;  %2363 = vmatpush.msra.mxu0 %v1218_v26  ;;  %2427 = vmatpush.msra.mxu3 %v307_v56  ;;  %v531_v22 = vld [vmem:[%s3393_s23 + $0x718] sm:$0xff] }
 0x2f0   : > { %v1346_v29 = vld [vmem:[%s3393_s23 + $0x2090] sm:$0xff]  ;;  %2382 = vmatpush.msra.mxu1 %v1286_v27  ;;  %v599_v23 = vld [vmem:[%s3393_s23 + $0x938] sm:$0xff] }
 0x2f1   : > { %v1214_v31 = vld [vmem:[%s3393_s23 + $0x1c70] sm:$0xff]  ;;  %2403 = vmatpush.msra.mxu2 %v1346_v29  ;;  %2492 = vmatpush.msrb.mxu3 %v623_v62  ;;  %v399_v24 = vld [vmem:[%s3393_s23 + $0x2f8] sm:$0xff]  ;;  %v3066_v62 = vld [vmem:[%s3417_s10] sm:$0xff] }
 0x2f2   : > { %v1282_v32 = vld [vmem:[%s3393_s23 + $0x1e90] sm:$0xff]  ;;  %2364 = vmatpush.msra.mxu0 %v1214_v31  ;;  %v467_v25 = vld [vmem:[%s3393_s23 + $0x518] sm:$0xff]  ;;  %2428 = vmatmul.f32.vlgmr.msra.gmra.mxu3 %v3066_v62 }
 0x2f3   : > { %v1342_v34 = vld [vmem:[%s3393_s23 + $0x2070] sm:$0xff]  ;;  %2383 = vmatpush.msra.mxu1 %v1282_v32  ;;  %2493 = vmatpush.msrb.mxu3 %v619_v3  ;;  %v527_v26 = vld [vmem:[%s3393_s23 + $0x6f8] sm:$0xff] }
 0x2f4   : > { %v1210_v37 = vld [vmem:[%s3393_s23 + $0x1c50] sm:$0xff]  ;;  %2404 = vmatpush.msra.mxu2 %v1342_v34  ;;  %v595_v27 = vld [vmem:[%s3393_s23 + $0x918] sm:$0xff] }
 0x2f5   : > { %v1278_v38 = vld [vmem:[%s3393_s23 + $0x1e70] sm:$0xff]  ;;  %2365 = vmatpush.msra.mxu0 %v1210_v37  ;;  %2494 = vmatpush.msrb.mxu3 %v615_v7  ;;  %v463_v29 = vld [vmem:[%s3393_s23 + $0x4f8] sm:$0xff] }
 0x2f6   : > { %v1338_v41 = vld [vmem:[%s3393_s23 + $0x2050] sm:$0xff]  ;;  %2384 = vmatpush.msra.mxu1 %v1278_v38  ;;  %v523_v30 = vld [vmem:[%s3393_s23 + $0x6d8] sm:$0xff] }
 0x2f7   : > { %v1206_v44 = vld [vmem:[%s3393_s23 + $0x1c30] sm:$0xff]  ;;  %2405 = vmatpush.msra.mxu2 %v1338_v41  ;;  %2495 = vmatpush.msrb.mxu3 %v611_v11  ;;  %v591_v31 = vld [vmem:[%s3393_s23 + $0x8f8] sm:$0xff] }
 0x2f8   : > { %v1274_v45 = vld [vmem:[%s3393_s23 + $0x1e50] sm:$0xff]  ;;  %2366 = vmatpush.msra.mxu0 %v1206_v44  ;;  %v391_v32 = vld [vmem:[%s3393_s23 + $0x2b8] sm:$0xff] }
 0x2f9   : > { %v1334_v46 = vld [vmem:[%s3393_s23 + $0x2030] sm:$0xff]  ;;  %2385 = vmatpush.msra.mxu1 %v1274_v45  ;;  %2496 = vmatpush.msrb.mxu3 %v607_v15  ;;  %v519_v34 = vld [vmem:[%s3393_s23 + $0x6b8] sm:$0xff]  ;;  %v3069_v15 = vld [vmem:[%s3417_s10 + $0x20] sm:$0xff] }
 0x2fa   : > { %v1202_v49 = vld [vmem:[%s3393_s23 + $0x1c10] sm:$0xff]  ;;  %2406 = vmatpush.msra.mxu2 %v1334_v46  ;;  %v587_v35 = vld [vmem:[%s3393_s23 + $0x8d8] sm:$0xff] }
 0x2fb   : > { %v1270_v50 = vld [vmem:[%s3393_s23 + $0x1e30] sm:$0xff]  ;;  %2367 = vmatpush.msra.mxu0 %v1202_v49  ;;  %2497 = vmatpush.msrb.mxu3 %v603_v19  ;;  %v455_v37 = vld [vmem:[%s3393_s23 + $0x4b8] sm:$0xff] }
 0x2fc   : > { %v1330_v51 = vld [vmem:[%s3393_s23 + $0x2010] sm:$0xff]  ;;  %2386 = vmatpush.msra.mxu1 %v1270_v50  ;;  %v515_v38 = vld [vmem:[%s3393_s23 + $0x698] sm:$0xff] }
 0x2fd   : > { %2407 = vmatpush.msra.mxu2 %v1330_v51  ;;  %v1266_v55 = vld [vmem:[%s3393_s23 + $0x1e10] sm:$0xff]  ;;  %2432 = vmatpush.msrb.mxu0 %v431_v53  ;;  %v451_v41 = vld [vmem:[%s3393_s23 + $0x498] sm:$0xff] }
 0x2fe   : > { %v3063_v57 = vld [vmem:[%s3417_s10 + $0x70] sm:$0xff]  ;;  %2408 = vmatmul.f32.vlgmr.msra.gmra.mxu2 %v3064_v58  ;;  %2387 = vmatpush.msra.mxu1 %v1266_v55  ;;  %v511_v42 = vld [vmem:[%s3393_s23 + $0x678] sm:$0xff] }
 0x2ff   : > { %2368 = vmatmul.f32.vlgmr.msra.gmra.mxu0 %v3063_v57  ;;  %2472 = vmatpush.msrb.mxu2 %v559_v54  ;;  %v379_v44 = vld [vmem:[%s3393_s23 + $0x258] sm:$0xff] }
 0x300   : > { %2388 = vmatmul.f32.vlgmr.msra.gmra.mxu1 %v3065_v0  ;;  %2433 = vmatpush.msrb.mxu0 %v427_v59  ;;  %v447_v45 = vld [vmem:[%s3393_s23 + $0x478] sm:$0xff] }
 0x301   : > { %2452 = vmatpush.msrb.mxu1 %v495_v60  ;;  %2473 = vmatpush.msrb.mxu2 %v555_v61  ;;  %v507_v46 = vld [vmem:[%s3393_s23 + $0x658] sm:$0xff] }
 0x302   : > { %2434 = vmatpush.msrb.mxu0 %v423_v63  ;;  %2498 = vmatpush.msrb.mxu3 %v599_v23  ;;  %v575_v47 = vld [vmem:[%s3393_s23 + $0x878] sm:$0xff] }
 0x303   : > { %2453 = vmatpush.msrb.mxu1 %v491_v1  ;;  %2474 = vmatpush.msrb.mxu2 %v551_v2  ;;  %v375_v48 = vld [vmem:[%s3393_s23 + $0x238] sm:$0xff] }
 0x304   : > { %2435 = vmatpush.msrb.mxu0 %v419_v4  ;;  %2499 = vmatpush.msrb.mxu3 %v595_v27  ;;  %v443_v49 = vld [vmem:[%s3393_s23 + $0x458] sm:$0xff] }
 0x305   : > { %2454 = vmatpush.msrb.mxu1 %v487_v5  ;;  %2475 = vmatpush.msrb.mxu2 %v547_v6  ;;  %v503_v50 = vld [vmem:[%s3393_s23 + $0x638] sm:$0xff] }
 0x306   : > { %2436 = vmatpush.msrb.mxu0 %v415_v8  ;;  %2500 = vmatpush.msrb.mxu3 %v591_v31  ;;  %v571_v51 = vld [vmem:[%s3393_s23 + $0x858] sm:$0xff] }
 0x307   : > { %2455 = vmatpush.msrb.mxu1 %v483_v9  ;;  %2476 = vmatpush.msrb.mxu2 %v543_v10  ;;  %v371_v52 = vld [vmem:[%s3393_s23 + $0x218] sm:$0xff] }
 0x308   : > { %2437 = vmatpush.msrb.mxu0 %v411_v12  ;;  %2501 = vmatpush.msrb.mxu3 %v587_v35  ;;  %v439_v53 = vld [vmem:[%s3393_s23 + $0x438] sm:$0xff] }
 0x309   : > { %2456 = vmatpush.msrb.mxu1 %v479_v13  ;;  %2477 = vmatpush.msrb.mxu2 %v539_v14  ;;  %v499_v54 = vld [vmem:[%s3393_s23 + $0x618] sm:$0xff]  ;;  %v3068_v13 = vld [vmem:[%s3417_s10 + $0x8] sm:$0xff] }
 0x30a   : > { %2438 = vmatpush.msrb.mxu0 %v407_v16  ;;  %2502 = vmatpush.msrb.mxu3 %v583_v39  ;;  %v567_v55 = vld [vmem:[%s3393_s23 + $0x838] sm:$0xff] }
 0x30b   : > { %2457 = vmatpush.msrb.mxu1 %v475_v17  ;;  %2478 = vmatpush.msrb.mxu2 %v535_v18  ;;  %v687_v56 = vld [vmem:[%s3393_s23 + $0xbf8] sm:$0xff] }
 0x30c   : > { %2439 = vmatpush.msrb.mxu0 %v403_v20  ;;  %2503 = vmatpush.msrb.mxu3 %v579_v43  ;;  %v815_v57 = vld [vmem:[%s3393_s23 + $0xff8] sm:$0xff]  ;;  %v3070_v20 = vld [vmem:[%s3417_s10 + $0x10] sm:$0xff] }
 0x30d   : > { %2458 = vmatpush.msrb.mxu1 %v471_v21  ;;  %2479 = vmatpush.msrb.mxu2 %v531_v22  ;;  %v435_v58 = vld [vmem:[%s3393_s23 + $0x418] sm:$0xff] }
 0x30e   : > { %2440 = vmatpush.msrb.mxu0 %v399_v24  ;;  %2504 = vmatpush.msrb.mxu3 %v575_v47  ;;  %v563_v59 = vld [vmem:[%s3393_s23 + $0x818] sm:$0xff] }
 0x30f   : > { %2459 = vmatpush.msrb.mxu1 %v467_v25  ;;  %2480 = vmatpush.msrb.mxu2 %v527_v26  ;;  %v683_v60 = vld [vmem:[%s3393_s23 + $0xbd8] sm:$0xff] }
 0x310   : > { %2441 = vmatpush.msrb.mxu0 %v395_v28  ;;  %2505 = vmatpush.msrb.mxu3 %v571_v51  ;;  %v751_v61 = vld [vmem:[%s3393_s23 + $0xdf8] sm:$0xff] }
 0x311   : > { %2460 = vmatpush.msrb.mxu1 %v463_v29  ;;  %2481 = vmatpush.msrb.mxu2 %v523_v30  ;;  %v811_v63 = vld [vmem:[%s3393_s23 + $0xfd8] sm:$0xff] }
 0x312   : > { %2442 = vmatpush.msrb.mxu0 %v391_v32  ;;  %2506 = vmatpush.msrb.mxu3 %v567_v55  ;;  %v879_v0 = vld [vmem:[%s3393_s23 + $0x11f8] sm:$0xff] }
 0x313   : > { %2461 = vmatpush.msrb.mxu1 %v459_v33  ;;  %2482 = vmatpush.msrb.mxu2 %v519_v34  ;;  %v679_v1 = vld [vmem:[%s3393_s23 + $0xbb8] sm:$0xff] }
 0x314   : > { %2443 = vmatpush.msrb.mxu0 %v387_v36  ;;  %2507 = vmatpush.msrb.mxu3 %v563_v59  ;;  %v747_v2 = vld [vmem:[%s3393_s23 + $0xdd8] sm:$0xff] }
 0x315   : > { %2462 = vmatpush.msrb.mxu1 %v455_v37  ;;  %2483 = vmatpush.msrb.mxu2 %v515_v38  ;;  %v807_v3 = vld [vmem:[%s3393_s23 + $0xfb8] sm:$0xff] }
 0x316   : > { %2444 = vmatpush.msrb.mxu0 %v383_v40  ;;  %v875_v4 = vld [vmem:[%s3393_s23 + $0x11d8] sm:$0xff]  ;;  %2572 = vmatpush.msra.mxu3 %v879_v0 }
 0x317   : > { %2463 = vmatpush.msrb.mxu1 %v451_v41  ;;  %2484 = vmatpush.msrb.mxu2 %v511_v42  ;;  %v675_v5 = vld [vmem:[%s3393_s23 + $0xb98] sm:$0xff] }
 0x318   : > { %2445 = vmatpush.msrb.mxu0 %v379_v44  ;;  %v743_v6 = vld [vmem:[%s3393_s23 + $0xdb8] sm:$0xff]  ;;  %2573 = vmatpush.msra.mxu3 %v875_v4 }
 0x319   : > { %2464 = vmatpush.msrb.mxu1 %v447_v45  ;;  %2485 = vmatpush.msrb.mxu2 %v507_v46  ;;  %v803_v7 = vld [vmem:[%s3393_s23 + $0xf98] sm:$0xff] }
 0x31a   : > { %2446 = vmatpush.msrb.mxu0 %v375_v48  ;;  %v871_v8 = vld [vmem:[%s3393_s23 + $0x11b8] sm:$0xff]  ;;  %2508 = vmatmul.f32.vlgmr.msrb.gmra.mxu3 %v3069_v15 }
 0x31b   : > { %2465 = vmatpush.msrb.mxu1 %v443_v49  ;;  %2486 = vmatpush.msrb.mxu2 %v503_v50  ;;  %v3067_v9 = vld [vmem:[%s3417_s10 + $0x18] sm:$0xff] }
 0x31c   : > { %2447 = vmatpush.msrb.mxu0 %v371_v52  ;;  %v671_v10 = vld [vmem:[%s3393_s23 + $0xb78] sm:$0xff]  ;;  %2574 = vmatpush.msra.mxu3 %v871_v8  ;;  %v3074_v8 = vld [vmem:[%s3417_s10 + $0x40] sm:$0xff] }
 0x31d   : > { %2466 = vmatpush.msrb.mxu1 %v439_v53  ;;  %2487 = vmatpush.msrb.mxu2 %v499_v54  ;;  %v739_v11 = vld [vmem:[%s3393_s23 + $0xd98] sm:$0xff] }
 0x31e   : > { %2512 = vmatpush.msra.mxu0 %v687_v56  ;;  %2488 = vmatmul.f32.vlgmr.msrb.gmra.mxu2 %v3067_v9  ;;  %v799_v12 = vld [vmem:[%s3393_s23 + $0xf78] sm:$0xff] }
 0x31f   : > { %2552 = vmatpush.msra.mxu2 %v815_v57  ;;  %2467 = vmatpush.msrb.mxu1 %v435_v58  ;;  %v867_v14 = vld [vmem:[%s3393_s23 + $0x1198] sm:$0xff] }
 0x320   : > { %2513 = vmatpush.msra.mxu0 %v683_v60  ;;  %v667_v16 = vld [vmem:[%s3393_s23 + $0xb58] sm:$0xff]  ;;  %2575 = vmatpush.msra.mxu3 %v867_v14 }
 0x321   : > { %2532 = vmatpush.msra.mxu1 %v751_v61  ;;  %2553 = vmatpush.msra.mxu2 %v811_v63  ;;  %v735_v17 = vld [vmem:[%s3393_s23 + $0xd78] sm:$0xff] }
 0x322   : > { %2514 = vmatpush.msra.mxu0 %v679_v1  ;;  %v795_v18 = vld [vmem:[%s3393_s23 + $0xf58] sm:$0xff]  ;;  %2468 = vmatmul.f32.vlgmr.msrb.gmra.mxu1 %v3070_v20  ;;  %v3071_v1 = vld [vmem:[%s3417_s10 + $0x28] sm:$0xff] }
 0x323   : > { %2533 = vmatpush.msra.mxu1 %v747_v2  ;;  %2554 = vmatpush.msra.mxu2 %v807_v3  ;;  %v863_v19 = vld [vmem:[%s3393_s23 + $0x1178] sm:$0xff] }
 0x324   : > { %2515 = vmatpush.msra.mxu0 %v675_v5  ;;  %v663_v21 = vld [vmem:[%s3393_s23 + $0xb38] sm:$0xff]  ;;  %2576 = vmatpush.msra.mxu3 %v863_v19 }
 0x325   : > { %2534 = vmatpush.msra.mxu1 %v743_v6  ;;  %2555 = vmatpush.msra.mxu2 %v803_v7  ;;  %v731_v22 = vld [vmem:[%s3393_s23 + $0xd58] sm:$0xff]  ;;  %v3073_v7 = vld [vmem:[%s3417_s10 + $0x30] sm:$0xff] }
 0x326   : > { %2448 = vmatmul.f32.vlgmr.msrb.gmra.mxu0 %v3068_v13  ;;  %v791_v23 = vld [vmem:[%s3393_s23 + $0xf38] sm:$0xff] }
 0x327   : > { %2516 = vmatpush.msra.mxu0 %v671_v10  ;;  %2535 = vmatpush.msra.mxu1 %v739_v11  ;;  %v859_v24 = vld [vmem:[%s3393_s23 + $0x1158] sm:$0xff] }
 0x328   : > { %2556 = vmatpush.msra.mxu2 %v799_v12  ;;  %v659_v25 = vld [vmem:[%s3393_s23 + $0xb18] sm:$0xff]  ;;  %2577 = vmatpush.msra.mxu3 %v859_v24 }
 0x329   : > { %2517 = vmatpush.msra.mxu0 %v667_v16  ;;  %2536 = vmatpush.msra.mxu1 %v735_v17  ;;  %v727_v26 = vld [vmem:[%s3393_s23 + $0xd38] sm:$0xff] }
 0x32a   : > { %2557 = vmatpush.msra.mxu2 %v795_v18  ;;  %v787_v27 = vld [vmem:[%s3393_s23 + $0xf18] sm:$0xff] }
 0x32b   : > { %2518 = vmatpush.msra.mxu0 %v663_v21  ;;  %2537 = vmatpush.msra.mxu1 %v731_v22  ;;  %v855_v28 = vld [vmem:[%s3393_s23 + $0x1138] sm:$0xff] }
 0x32c   : > { %2558 = vmatpush.msra.mxu2 %v791_v23  ;;  %v655_v29 = vld [vmem:[%s3393_s23 + $0xaf8] sm:$0xff]  ;;  %2578 = vmatpush.msra.mxu3 %v855_v28 }
 0x32d   : > { %v723_v30 = vld [vmem:[%s3393_s23 + $0xd18] sm:$0xff]  ;;  %2519 = vmatpush.msra.mxu0 %v659_v25  ;;  %2538 = vmatpush.msra.mxu1 %v727_v26 }
 0x32e   : > { %v783_v31 = vld [vmem:[%s3393_s23 + $0xef8] sm:$0xff]  ;;  %2559 = vmatpush.msra.mxu2 %v787_v27 }
 0x32f   : > { %v851_v32 = vld [vmem:[%s3393_s23 + $0x1118] sm:$0xff]  ;;  %2520 = vmatpush.msra.mxu0 %v655_v29  ;;  %2539 = vmatpush.msra.mxu1 %v723_v30  ;;  %v2109_v29 = vpop.f32.mrf.mxu3 }
 0x330   : > { %v651_v33 = vld [vmem:[%s3393_s23 + $0xad8] sm:$0xff]  ;;  %2560 = vmatpush.msra.mxu2 %v783_v31  ;;  %2579 = vmatpush.msra.mxu3 %v851_v32 }
 0x331   : > { %v719_v34 = vld [vmem:[%s3393_s23 + $0xcf8] sm:$0xff]  ;;  %2521 = vmatpush.msra.mxu0 %v651_v33 }
 0x332   : > { %v779_v35 = vld [vmem:[%s3393_s23 + $0xed8] sm:$0xff]  ;;  %2540 = vmatpush.msra.mxu1 %v719_v34  ;;  %v2089_v34 = vpop.f32.mrf.mxu2 }
 0x333   : > { %v847_v36 = vld [vmem:[%s3393_s23 + $0x10f8] sm:$0xff]  ;;  %2561 = vmatpush.msra.mxu2 %v779_v35 }
 0x334   : > { %v647_v37 = vld [vmem:[%s3393_s23 + $0xab8] sm:$0xff]  ;;  %2580 = vmatpush.msra.mxu3 %v847_v36 }
 0x335   : > { %v715_v38 = vld [vmem:[%s3393_s23 + $0xcd8] sm:$0xff]  ;;  %2522 = vmatpush.msra.mxu0 %v647_v37  ;;  %v2110_v37 = vadd.f32 %v2109_v29, %v2089_v34 }
 0x336   : > { %v775_v39 = vld [vmem:[%s3393_s23 + $0xeb8] sm:$0xff]  ;;  %2541 = vmatpush.msra.mxu1 %v715_v38 }
 0x337   : > { %v843_v40 = vld [vmem:[%s3393_s23 + $0x10d8] sm:$0xff]  ;;  %2562 = vmatpush.msra.mxu2 %v775_v39 }
 0x338   : > { %v643_v41 = vld [vmem:[%s3393_s23 + $0xa98] sm:$0xff]  ;;  %2581 = vmatpush.msra.mxu3 %v843_v40  ;;  %v2129_v40 = vpop.f32.mrf.mxu0 }
 0x339   : > { %v711_v42 = vld [vmem:[%s3393_s23 + $0xcb8] sm:$0xff]  ;;  %2523 = vmatpush.msra.mxu0 %v643_v41 }
 0x33a   : > { %v771_v43 = vld [vmem:[%s3393_s23 + $0xe98] sm:$0xff]  ;;  %2542 = vmatpush.msra.mxu1 %v711_v42 }
 0x33b   : > { %v839_v44 = vld [vmem:[%s3393_s23 + $0x10b8] sm:$0xff]  ;;  %2563 = vmatpush.msra.mxu2 %v771_v43 }
 0x33c   : > { %v639_v45 = vld [vmem:[%s3393_s23 + $0xa78] sm:$0xff]  ;;  %2582 = vmatpush.msra.mxu3 %v839_v44 }
 0x33d   : > { %v707_v46 = vld [vmem:[%s3393_s23 + $0xc98] sm:$0xff]  ;;  %2524 = vmatpush.msra.mxu0 %v639_v45 }
 0x33e   : > { %v767_v47 = vld [vmem:[%s3393_s23 + $0xe78] sm:$0xff]  ;;  %2543 = vmatpush.msra.mxu1 %v707_v46 }
 0x33f   : > { %v835_v48 = vld [vmem:[%s3393_s23 + $0x1098] sm:$0xff]  ;;  %2564 = vmatpush.msra.mxu2 %v767_v47  ;;  %v2130_v47 = vadd.f32 %v2129_v40, %v2110_v37 }
 0x340   : > { %v635_v49 = vld [vmem:[%s3393_s23 + $0xa58] sm:$0xff]  ;;  %2583 = vmatpush.msra.mxu3 %v835_v48 }
 0x341   : > { %v703_v50 = vld [vmem:[%s3393_s23 + $0xc78] sm:$0xff]  ;;  %2525 = vmatpush.msra.mxu0 %v635_v49 }
 0x342   : > { %v763_v51 = vld [vmem:[%s3393_s23 + $0xe58] sm:$0xff]  ;;  %2544 = vmatpush.msra.mxu1 %v703_v50  ;;  %v2149_v50 = vpop.f32.mrf.mxu1 }
 0x343   : > { %v831_v52 = vld [vmem:[%s3393_s23 + $0x1078] sm:$0xff]  ;;  %2565 = vmatpush.msra.mxu2 %v763_v51 }
 0x344   : > { %v631_v53 = vld [vmem:[%s3393_s23 + $0xa38] sm:$0xff]  ;;  %2584 = vmatpush.msra.mxu3 %v831_v52 }
 0x345   : > { %v699_v54 = vld [vmem:[%s3393_s23 + $0xc58] sm:$0xff]  ;;  %2526 = vmatpush.msra.mxu0 %v631_v53 }
 0x346   : > { %v759_v55 = vld [vmem:[%s3393_s23 + $0xe38] sm:$0xff]  ;;  %2545 = vmatpush.msra.mxu1 %v699_v54 }
 0x347   : > { %v827_v56 = vld [vmem:[%s3393_s23 + $0x1058] sm:$0xff]  ;;  %2566 = vmatpush.msra.mxu2 %v759_v55 }
 0x348   : > { %v627_v57 = vld [vmem:[%s3393_s23 + $0xa18] sm:$0xff]  ;;  %2585 = vmatpush.msra.mxu3 %v827_v56 }
 0x349   : > { %v695_v58 = vld [vmem:[%s3393_s23 + $0xc38] sm:$0xff]  ;;  %2527 = vmatpush.msra.mxu0 %v627_v57  ;;  %v2150_v57 = vadd.f32 %v2149_v50, %v2130_v47 }
 0x34a   : > { %v755_v59 = vld [vmem:[%s3393_s23 + $0xe18] sm:$0xff]  ;;  %2546 = vmatpush.msra.mxu1 %v695_v58  ;;  %2528 = vmatmul.f32.vlgmr.msra.gmra.mxu0 %v3071_v1 }
 0x34b   : > { %v823_v60 = vld [vmem:[%s3393_s23 + $0x1038] sm:$0xff]  ;;  %2567 = vmatpush.msra.mxu2 %v755_v59 }
 0x34c   : > { %v943_v61 = vld [vmem:[%s3393_s23 + $0x13f8] sm:$0xff]  ;;  %2586 = vmatpush.msra.mxu3 %v823_v60  ;;  %v2169_v60 = vpop.f32.mrf.mxu2 }
 0x34d   : > { %v1071_v62 = vld [vmem:[%s3393_s23 + $0x17f8] sm:$0xff]  ;;  %2592 = vmatpush.msrb.mxu0 %v943_v61 }
 0x34e   : > { %v691_v63 = vld [vmem:[%s3393_s23 + $0xc18] sm:$0xff]  ;;  %2632 = vmatpush.msrb.mxu2 %v1071_v62 }
 0x34f   : > { %v819_v0 = vld [vmem:[%s3393_s23 + $0x1018] sm:$0xff]  ;;  %2547 = vmatpush.msra.mxu1 %v691_v63 }
 0x350   : > { %v3072_v2 = vld [vmem:[%s3417_s10 + $0x38] sm:$0xff]  ;;  %2587 = vmatpush.msra.mxu3 %v819_v0  ;;  %2548 = vmatmul.f32.vlgmr.msra.gmra.mxu1 %v3073_v7 }
 0x351   : > { %2568 = vmatmul.f32.vlgmr.msra.gmra.mxu2 %v3072_v2  ;;  %v939_v3 = vld [vmem:[%s3393_s23 + $0x13d8] sm:$0xff]  ;;  %2588 = vmatmul.f32.vlgmr.msra.gmra.mxu3 %v3074_v8 }
 0x352   : > { %v1007_v4 = vld [vmem:[%s3393_s23 + $0x15f8] sm:$0xff]  ;;  %2593 = vmatpush.msrb.mxu0 %v939_v3  ;;  %v2170_v3 = vadd.f32 %v2169_v60, %v2150_v57 }
 0x353   : > { %v1067_v5 = vld [vmem:[%s3393_s23 + $0x17d8] sm:$0xff]  ;;  %2612 = vmatpush.msrb.mxu1 %v1007_v4 }
 0x354   : > { %v1135_v6 = vld [vmem:[%s3393_s23 + $0x19f8] sm:$0xff]  ;;  %2633 = vmatpush.msrb.mxu2 %v1067_v5 }
 0x355   : > { %v935_v9 = vld [vmem:[%s3393_s23 + $0x13b8] sm:$0xff]  ;;  %2652 = vmatpush.msrb.mxu3 %v1135_v6  ;;  %v2189_v6 = vpop.f32.mrf.mxu3 }
 0x356   : > { %v1003_v10 = vld [vmem:[%s3393_s23 + $0x15d8] sm:$0xff]  ;;  %2594 = vmatpush.msrb.mxu0 %v935_v9 }
 0x357   : > { %v1063_v11 = vld [vmem:[%s3393_s23 + $0x17b8] sm:$0xff]  ;;  %2613 = vmatpush.msrb.mxu1 %v1003_v10 }
 0x358   : > { %v1131_v12 = vld [vmem:[%s3393_s23 + $0x19d8] sm:$0xff]  ;;  %2634 = vmatpush.msrb.mxu2 %v1063_v11  ;;  %v2209_v11 = vpop.f32.mrf.mxu0 }
 0x359   : > { %v931_v13 = vld [vmem:[%s3393_s23 + $0x1398] sm:$0xff]  ;;  %2653 = vmatpush.msrb.mxu3 %v1131_v12  ;;  %v2190_v12 = vadd.f32 %v2189_v6, %v2170_v3 }
 0x35a   : > { %v999_v14 = vld [vmem:[%s3393_s23 + $0x15b8] sm:$0xff]  ;;  %2595 = vmatpush.msrb.mxu0 %v931_v13 }
 0x35b   : > { %v1059_v15 = vld [vmem:[%s3393_s23 + $0x1798] sm:$0xff]  ;;  %2614 = vmatpush.msrb.mxu1 %v999_v14 }
 0x35c   : > { %v1127_v16 = vld [vmem:[%s3393_s23 + $0x19b8] sm:$0xff]  ;;  %2635 = vmatpush.msrb.mxu2 %v1059_v15 }
 0x35d   : > { %v927_v17 = vld [vmem:[%s3393_s23 + $0x1378] sm:$0xff]  ;;  %2654 = vmatpush.msrb.mxu3 %v1127_v16 }
 0x35e   : > { %v995_v18 = vld [vmem:[%s3393_s23 + $0x1598] sm:$0xff]  ;;  %2596 = vmatpush.msrb.mxu0 %v927_v17  ;;  %v2210_v17 = vadd.f32 %v2209_v11, %v2190_v12 }
 0x35f   : > { %v1055_v19 = vld [vmem:[%s3393_s23 + $0x1778] sm:$0xff]  ;;  %2615 = vmatpush.msrb.mxu1 %v995_v18  ;;  %v3075_v18 = vld [vmem:[%s3417_s10 + $0x48] sm:$0xff] }
 0x360   : > { %v1123_v20 = vld [vmem:[%s3393_s23 + $0x1998] sm:$0xff]  ;;  %2636 = vmatpush.msrb.mxu2 %v1055_v19 }
 0x361   : > { %v923_v21 = vld [vmem:[%s3393_s23 + $0x1358] sm:$0xff]  ;;  %2655 = vmatpush.msrb.mxu3 %v1123_v20  ;;  %v2229_v20 = vpop.f32.mrf.mxu1 }
 0x362   : > { %v991_v22 = vld [vmem:[%s3393_s23 + $0x1578] sm:$0xff]  ;;  %2597 = vmatpush.msrb.mxu0 %v923_v21 }
 0x363   : > { %v1051_v23 = vld [vmem:[%s3393_s23 + $0x1758] sm:$0xff]  ;;  %2616 = vmatpush.msrb.mxu1 %v991_v22 }
 0x364   : > { %v1119_v24 = vld [vmem:[%s3393_s23 + $0x1978] sm:$0xff]  ;;  %2637 = vmatpush.msrb.mxu2 %v1051_v23 }
 0x365   : > { %v919_v25 = vld [vmem:[%s3393_s23 + $0x1338] sm:$0xff]  ;;  %2656 = vmatpush.msrb.mxu3 %v1119_v24 }
 0x366   : > { %v987_v26 = vld [vmem:[%s3393_s23 + $0x1558] sm:$0xff]  ;;  %2598 = vmatpush.msrb.mxu0 %v919_v25  ;;  %v2249_v25 = vpop.f32.mrf.mxu2 }
 0x367   : > { %v1047_v27 = vld [vmem:[%s3393_s23 + $0x1738] sm:$0xff]  ;;  %2617 = vmatpush.msrb.mxu1 %v987_v26  ;;  %v3077_v26 = vld [vmem:[%s3417_s10 + $0x50] sm:$0xff] }
 0x368   : > { %v1115_v28 = vld [vmem:[%s3393_s23 + $0x1958] sm:$0xff]  ;;  %2638 = vmatpush.msrb.mxu2 %v1047_v27  ;;  %v3078_v27 = vld [vmem:[%s3417_s10 + $0x60] sm:$0xff] }
 0x369   : > { %v915_v30 = vld [vmem:[%s3393_s23 + $0x1318] sm:$0xff]  ;;  %2657 = vmatpush.msrb.mxu3 %v1115_v28 }
 0x36a   : > { %v983_v31 = vld [vmem:[%s3393_s23 + $0x1538] sm:$0xff]  ;;  %2599 = vmatpush.msrb.mxu0 %v915_v30  ;;  %v2230_v30 = vadd.f32 %v2229_v20, %v2210_v17 }
 0x36b   : > { %v1043_v32 = vld [vmem:[%s3393_s23 + $0x1718] sm:$0xff]  ;;  %2618 = vmatpush.msrb.mxu1 %v983_v31 }
 0x36c   : > { %v1111_v33 = vld [vmem:[%s3393_s23 + $0x1938] sm:$0xff]  ;;  %2639 = vmatpush.msrb.mxu2 %v1043_v32 }
 0x36d   : > { %v911_v35 = vld [vmem:[%s3393_s23 + $0x12f8] sm:$0xff]  ;;  %2658 = vmatpush.msrb.mxu3 %v1111_v33 }
 0x36e   : > { %v979_v36 = vld [vmem:[%s3393_s23 + $0x1518] sm:$0xff]  ;;  %2600 = vmatpush.msrb.mxu0 %v911_v35  ;;  %v2250_v35 = vadd.f32 %v2249_v25, %v2230_v30 }
 0x36f   : > { %v1039_v38 = vld [vmem:[%s3393_s23 + $0x16f8] sm:$0xff]  ;;  %2619 = vmatpush.msrb.mxu1 %v979_v36 }
 0x370   : > { %v1107_v39 = vld [vmem:[%s3393_s23 + $0x1918] sm:$0xff]  ;;  %2640 = vmatpush.msrb.mxu2 %v1039_v38  ;;  %v2269_v38 = vpop.f32.mrf.mxu3 }
 0x371   : > { %v907_v41 = vld [vmem:[%s3393_s23 + $0x12d8] sm:$0xff]  ;;  %2659 = vmatpush.msrb.mxu3 %v1107_v39 }
 0x372   : > { %v975_v42 = vld [vmem:[%s3393_s23 + $0x14f8] sm:$0xff]  ;;  %2601 = vmatpush.msrb.mxu0 %v907_v41 }
 0x373   : > { %v1035_v43 = vld [vmem:[%s3393_s23 + $0x16d8] sm:$0xff]  ;;  %2620 = vmatpush.msrb.mxu1 %v975_v42 }
 0x374   : > { %v1103_v44 = vld [vmem:[%s3393_s23 + $0x18f8] sm:$0xff]  ;;  %2641 = vmatpush.msrb.mxu2 %v1035_v43  ;;  %v2289_v43 = vpop.f32.mrf.mxu0 }
 0x375   : > { %v903_v45 = vld [vmem:[%s3393_s23 + $0x12b8] sm:$0xff]  ;;  %2660 = vmatpush.msrb.mxu3 %v1103_v44 }
 0x376   : > { %v971_v46 = vld [vmem:[%s3393_s23 + $0x14d8] sm:$0xff]  ;;  %2602 = vmatpush.msrb.mxu0 %v903_v45 }
 0x377   : > { %v1031_v48 = vld [vmem:[%s3393_s23 + $0x16b8] sm:$0xff]  ;;  %2621 = vmatpush.msrb.mxu1 %v971_v46  ;;  %v2270_v46 = vadd.f32 %v2269_v38, %v2250_v35 }
 0x378   : > { %v1099_v49 = vld [vmem:[%s3393_s23 + $0x18d8] sm:$0xff]  ;;  %2642 = vmatpush.msrb.mxu2 %v1031_v48  ;;  %v2349_v6 = vpop.f32.mrf.mxu3 }
 0x379   : > { %v899_v51 = vld [vmem:[%s3393_s23 + $0x1298] sm:$0xff]  ;;  %2661 = vmatpush.msrb.mxu3 %v1099_v49 }
 0x37a   : > { %v967_v52 = vld [vmem:[%s3393_s23 + $0x14b8] sm:$0xff]  ;;  %2603 = vmatpush.msrb.mxu0 %v899_v51  ;;  %v2290_v51 = vadd.f32 %v2289_v43, %v2270_v46 }
 0x37b   : > { %v1027_v53 = vld [vmem:[%s3393_s23 + $0x1698] sm:$0xff]  ;;  %2622 = vmatpush.msrb.mxu1 %v967_v52 }
 0x37c   : > { %v1095_v54 = vld [vmem:[%s3393_s23 + $0x18b8] sm:$0xff]  ;;  %2643 = vmatpush.msrb.mxu2 %v1027_v53 }
 0x37d   : > { %v895_v55 = vld [vmem:[%s3393_s23 + $0x1278] sm:$0xff]  ;;  %2662 = vmatpush.msrb.mxu3 %v1095_v54  ;;  %v2309_v54 = vpop.f32.mrf.mxu1 }
 0x37e   : > { %v963_v56 = vld [vmem:[%s3393_s23 + $0x1498] sm:$0xff]  ;;  %2604 = vmatpush.msrb.mxu0 %v895_v55 }
 0x37f   : > { %v1023_v58 = vld [vmem:[%s3393_s23 + $0x1678] sm:$0xff]  ;;  %2623 = vmatpush.msrb.mxu1 %v963_v56 }
 0x380   : > { %v1091_v59 = vld [vmem:[%s3393_s23 + $0x1898] sm:$0xff]  ;;  %2644 = vmatpush.msrb.mxu2 %v1023_v58 }
 0x381   : > { %v891_v61 = vld [vmem:[%s3393_s23 + $0x1258] sm:$0xff]  ;;  %2663 = vmatpush.msrb.mxu3 %v1091_v59  ;;  %v2329_v59 = vpop.f32.mrf.mxu2 }
 0x382   : > { %v959_v62 = vld [vmem:[%s3393_s23 + $0x1478] sm:$0xff]  ;;  %2605 = vmatpush.msrb.mxu0 %v891_v61 }
 0x383   : > { %v1019_v63 = vld [vmem:[%s3393_s23 + $0x1658] sm:$0xff]  ;;  %2624 = vmatpush.msrb.mxu1 %v959_v62  ;;  %v2310_v62 = vadd.f32 %v2309_v54, %v2290_v51 }
 0x384   : > { %v1087_v0 = vld [vmem:[%s3393_s23 + $0x1878] sm:$0xff]  ;;  %2645 = vmatpush.msrb.mxu2 %v1019_v63 }
 0x385   : > { %v887_v1 = vld [vmem:[%s3393_s23 + $0x1238] sm:$0xff]  ;;  %2664 = vmatpush.msrb.mxu3 %v1087_v0  ;;  %v2330_v3 = vadd.f32 %v2329_v59, %v2310_v62 }
 0x386   : > { %v955_v2 = vld [vmem:[%s3393_s23 + $0x1458] sm:$0xff]  ;;  %2606 = vmatpush.msrb.mxu0 %v887_v1 }
 0x387   : > { %v1015_v4 = vld [vmem:[%s3393_s23 + $0x1638] sm:$0xff]  ;;  %2625 = vmatpush.msrb.mxu1 %v955_v2 }
 0x388   : > { %v1083_v5 = vld [vmem:[%s3393_s23 + $0x1858] sm:$0xff]  ;;  %2646 = vmatpush.msrb.mxu2 %v1015_v4 }
 0x389   : > { %v883_v7 = vld [vmem:[%s3393_s23 + $0x1218] sm:$0xff]  ;;  %2665 = vmatpush.msrb.mxu3 %v1083_v5  ;;  %v2409_v35 = vpop.f32.mrf.mxu2 }
 0x38a   : > { %v951_v8 = vld [vmem:[%s3393_s23 + $0x1438] sm:$0xff]  ;;  %2607 = vmatpush.msrb.mxu0 %v883_v7 }
 0x38b   : > { %v1011_v9 = vld [vmem:[%s3393_s23 + $0x1618] sm:$0xff]  ;;  %2626 = vmatpush.msrb.mxu1 %v951_v8  ;;  %2608 = vmatmul.f32.vlgmr.msrb.gmra.mxu0 %v3075_v18  ;;  %v2369_v18 = vpop.f32.mrf.mxu0 }
 0x38c   : > { %v1079_v10 = vld [vmem:[%s3393_s23 + $0x1838] sm:$0xff]  ;;  %2647 = vmatpush.msrb.mxu2 %v1011_v9 }
 0x38d   : > { %v1199_v13 = vld [vmem:[%s3393_s23 + $0x1bf8] sm:$0xff]  ;;  %2666 = vmatpush.msrb.mxu3 %v1079_v10 }
 0x38e   : > { %v1327_v14 = vld [vmem:[%s3393_s23 + $0x1ff8] sm:$0xff]  ;;  %2672 = vmatpush.msra.mxu0 %v1199_v13  ;;  %v2350_v13 = vadd.f32 %v2349_v6, %v2330_v3 }
 0x38f   : > { %v947_v15 = vld [vmem:[%s3393_s23 + $0x1418] sm:$0xff]  ;;  %2712 = vmatpush.msra.mxu2 %v1327_v14 }
 0x390   : > { %v1075_v16 = vld [vmem:[%s3393_s23 + $0x1818] sm:$0xff]  ;;  %2627 = vmatpush.msrb.mxu1 %v947_v15 }
 0x391   : > { %v3076_v19 = vld [vmem:[%s3417_s10 + $0x58] sm:$0xff]  ;;  %2667 = vmatpush.msrb.mxu3 %v1075_v16  ;;  %2628 = vmatmul.f32.vlgmr.msrb.gmra.mxu1 %v3077_v26  ;;  %v2389_v26 = vpop.f32.mrf.mxu1 }
 0x392   : > { %2648 = vmatmul.f32.vlgmr.msrb.gmra.mxu2 %v3076_v19  ;;  %v1195_v21 = vld [vmem:[%s3393_s23 + $0x1bd8] sm:$0xff]  ;;  %2668 = vmatmul.f32.vlgmr.msrb.gmra.mxu3 %v3078_v27 }
 0x393   : > { %v1263_v22 = vld [vmem:[%s3393_s23 + $0x1df8] sm:$0xff]  ;;  %2673 = vmatpush.msra.mxu0 %v1195_v21  ;;  %v2370_v21 = vadd.f32 %v2369_v18, %v2350_v13  ;;  %v286_v13 = vld [vmem:[#allocation2 + $0x8] sm:$0xff] }
 0x394   : > { %v1323_v23 = vld [vmem:[%s3393_s23 + $0x1fd8] sm:$0xff]  ;;  %2692 = vmatpush.msra.mxu1 %v1263_v22 }
 0x395   : > { %v1391_v24 = vld [vmem:[%s3393_s23 + $0x21f8] sm:$0xff]  ;;  %2713 = vmatpush.msra.mxu2 %v1323_v23 }
 0x396   : > { %v1191_v28 = vld [vmem:[%s3393_s23 + $0x1bb8] sm:$0xff]  ;;  %2732 = vmatpush.msra.mxu3 %v1391_v24 }
 0x397   : > { %v1259_v29 = vld [vmem:[%s3393_s23 + $0x1dd8] sm:$0xff]  ;;  %2674 = vmatpush.msra.mxu0 %v1191_v28 }
 0x398   : > { %v1319_v31 = vld [vmem:[%s3393_s23 + $0x1fb8] sm:$0xff]  ;;  %2693 = vmatpush.msra.mxu1 %v1259_v29 }
 0x399   : > { %v1387_v32 = vld [vmem:[%s3393_s23 + $0x21d8] sm:$0xff]  ;;  %2714 = vmatpush.msra.mxu2 %v1319_v31  ;;  %v2390_v31 = vadd.f32 %v2389_v26, %v2370_v21 }
 0x39a   : > { %v1187_v33 = vld [vmem:[%s3393_s23 + $0x1b98] sm:$0xff]  ;;  %2733 = vmatpush.msra.mxu3 %v1387_v32 }
 0x39b   : > { %v1255_v34 = vld [vmem:[%s3393_s23 + $0x1db8] sm:$0xff]  ;;  %2675 = vmatpush.msra.mxu0 %v1187_v33  ;;  %v2410_v38 = vadd.f32 %v2409_v35, %v2390_v31 }
 0x39c   : > { %v1315_v36 = vld [vmem:[%s3393_s23 + $0x1f98] sm:$0xff]  ;;  %2694 = vmatpush.msra.mxu1 %v1255_v34 }
 0x39d   : > { %v1383_v37 = vld [vmem:[%s3393_s23 + $0x21b8] sm:$0xff]  ;;  %2715 = vmatpush.msra.mxu2 %v1315_v36 }
 0x39e   : > { %v1183_v39 = vld [vmem:[%s3393_s23 + $0x1b78] sm:$0xff]  ;;  %2734 = vmatpush.msra.mxu3 %v1383_v37 }
 0x39f   : > { %v1251_v40 = vld [vmem:[%s3393_s23 + $0x1d98] sm:$0xff]  ;;  %2676 = vmatpush.msra.mxu0 %v1183_v39 }
 0x3a0   : > { %v1311_v41 = vld [vmem:[%s3393_s23 + $0x1f78] sm:$0xff]  ;;  %2695 = vmatpush.msra.mxu1 %v1251_v40 }
 0x3a1   : > { %v1379_v42 = vld [vmem:[%s3393_s23 + $0x2198] sm:$0xff]  ;;  %2716 = vmatpush.msra.mxu2 %v1311_v41  ;;  %v2489_v51 = vpop.f32.mrf.mxu2 }
 0x3a2   : > { %v1179_v44 = vld [vmem:[%s3393_s23 + $0x1b58] sm:$0xff]  ;;  %2735 = vmatpush.msra.mxu3 %v1379_v42  ;;  %v3079_v42 = vld [vmem:[%s3417_s10 + $0x68] sm:$0xff] }
 0x3a3   : > { %v1247_v45 = vld [vmem:[%s3393_s23 + $0x1d78] sm:$0xff]  ;;  %2677 = vmatpush.msra.mxu0 %v1179_v44  ;;  %v3081_v44 = vld [vmem:[%s3417_s10 + $0x70] sm:$0xff]  ;;  %v2449_v46 = vpop.f32.mrf.mxu0 }
 0x3a4   : > { %v1307_v47 = vld [vmem:[%s3393_s23 + $0x1f58] sm:$0xff]  ;;  %2696 = vmatpush.msra.mxu1 %v1247_v45  ;;  %v3082_v45 = vld [vmem:[%s3417_s10 + $0x80] sm:$0xff] }
 0x3a5   : > { %v1375_v48 = vld [vmem:[%s3393_s23 + $0x2178] sm:$0xff]  ;;  %2717 = vmatpush.msra.mxu2 %v1307_v47  ;;  %v2429_v47 = vpop.f32.mrf.mxu3 }
 0x3a6   : > { %v1175_v49 = vld [vmem:[%s3393_s23 + $0x1b38] sm:$0xff]  ;;  %2736 = vmatpush.msra.mxu3 %v1375_v48  ;;  %v2450_v48 = vadd.f32 %v2449_v46, %v2429_v47 }
 0x3a7   : > { %v1243_v50 = vld [vmem:[%s3393_s23 + $0x1d58] sm:$0xff]  ;;  %2678 = vmatpush.msra.mxu0 %v1175_v49  ;;  %v2469_v49 = vpop.f32.mrf.mxu1 }
 0x3a8   : > { %v1303_v52 = vld [vmem:[%s3393_s23 + $0x1f38] sm:$0xff]  ;;  %2697 = vmatpush.msra.mxu1 %v1243_v50  ;;  %v2470_v50 = vadd.f32 %v2469_v49, %v2450_v48 }
 0x3a9   : > { %v1371_v53 = vld [vmem:[%s3393_s23 + $0x2158] sm:$0xff]  ;;  %2718 = vmatpush.msra.mxu2 %v1303_v52 }
 0x3aa   : > { %v1171_v55 = vld [vmem:[%s3393_s23 + $0x1b18] sm:$0xff]  ;;  %2737 = vmatpush.msra.mxu3 %v1371_v53  ;;  %v2490_v52 = vadd.f32 %v2489_v51, %v2470_v50 }
 0x3ab   : > { %v1239_v56 = vld [vmem:[%s3393_s23 + $0x1d38] sm:$0xff]  ;;  %2679 = vmatpush.msra.mxu0 %v1171_v55 }
 0x3ac   : > { %v1299_v57 = vld [vmem:[%s3393_s23 + $0x1f18] sm:$0xff]  ;;  %2698 = vmatpush.msra.mxu1 %v1239_v56 }
 0x3ad   : > { %v1367_v58 = vld [vmem:[%s3393_s23 + $0x2138] sm:$0xff]  ;;  %2719 = vmatpush.msra.mxu2 %v1299_v57  ;;  %v2509_v53 = vpop.f32.mrf.mxu3 }
 0x3ae   : > { %v1167_v60 = vld [vmem:[%s3393_s23 + $0x1af8] sm:$0xff]  ;;  %2738 = vmatpush.msra.mxu3 %v1367_v58  ;;  %v2510_v55 = vadd.f32 %v2509_v53, %v2490_v52 }
 0x3af   : > { %v1235_v61 = vld [vmem:[%s3393_s23 + $0x1d18] sm:$0xff]  ;;  %2680 = vmatpush.msra.mxu0 %v1167_v60 }
 0x3b0   : > { %v1295_v63 = vld [vmem:[%s3393_s23 + $0x1ef8] sm:$0xff]  ;;  %2699 = vmatpush.msra.mxu1 %v1235_v61 }
 0x3b1   : > { %v1363_v0 = vld [vmem:[%s3393_s23 + $0x2118] sm:$0xff]  ;;  %2720 = vmatpush.msra.mxu2 %v1295_v63 }
 0x3b2   : > { %v1163_v1 = vld [vmem:[%s3393_s23 + $0x1ad8] sm:$0xff]  ;;  %2739 = vmatpush.msra.mxu3 %v1363_v0 }
 0x3b3   : > { %v1231_v2 = vld [vmem:[%s3393_s23 + $0x1cf8] sm:$0xff]  ;;  %2681 = vmatpush.msra.mxu0 %v1163_v1 }
 0x3b4   : > { %v1291_v4 = vld [vmem:[%s3393_s23 + $0x1ed8] sm:$0xff]  ;;  %2700 = vmatpush.msra.mxu1 %v1231_v2 }
 0x3b5   : > { %v1359_v5 = vld [vmem:[%s3393_s23 + $0x20f8] sm:$0xff]  ;;  %2721 = vmatpush.msra.mxu2 %v1291_v4 }
 0x3b6   : > { %v1159_v7 = vld [vmem:[%s3393_s23 + $0x1ab8] sm:$0xff]  ;;  %2740 = vmatpush.msra.mxu3 %v1359_v5 }
 0x3b7   : > { %v1227_v8 = vld [vmem:[%s3393_s23 + $0x1cd8] sm:$0xff]  ;;  %2682 = vmatpush.msra.mxu0 %v1159_v7 }
 0x3b8   : > { %v1287_v9 = vld [vmem:[%s3393_s23 + $0x1eb8] sm:$0xff]  ;;  %2701 = vmatpush.msra.mxu1 %v1227_v8 }
 0x3b9   : > { %v1355_v10 = vld [vmem:[%s3393_s23 + $0x20d8] sm:$0xff]  ;;  %2722 = vmatpush.msra.mxu2 %v1287_v9 }
 0x3ba   : > { %v1155_v11 = vld [vmem:[%s3393_s23 + $0x1a98] sm:$0xff]  ;;  %2741 = vmatpush.msra.mxu3 %v1355_v10 }
 0x3bb   : > { %v1223_v12 = vld [vmem:[%s3393_s23 + $0x1cb8] sm:$0xff]  ;;  %2683 = vmatpush.msra.mxu0 %v1155_v11 }
 0x3bc   : > { %v1283_v14 = vld [vmem:[%s3393_s23 + $0x1e98] sm:$0xff]  ;;  %2702 = vmatpush.msra.mxu1 %v1223_v12 }
 0x3bd   : > { %v1351_v15 = vld [vmem:[%s3393_s23 + $0x20b8] sm:$0xff]  ;;  %2723 = vmatpush.msra.mxu2 %v1283_v14 }
 0x3be   : > { %v1151_v16 = vld [vmem:[%s3393_s23 + $0x1a78] sm:$0xff]  ;;  %2742 = vmatpush.msra.mxu3 %v1351_v15 }
 0x3bf   : > { %v1219_v17 = vld [vmem:[%s3393_s23 + $0x1c98] sm:$0xff]  ;;  %2684 = vmatpush.msra.mxu0 %v1151_v16 }
 0x3c0   : > { %v1279_v19 = vld [vmem:[%s3393_s23 + $0x1e78] sm:$0xff]  ;;  %2703 = vmatpush.msra.mxu1 %v1219_v17 }
 0x3c1   : > { %v1347_v20 = vld [vmem:[%s3393_s23 + $0x2098] sm:$0xff]  ;;  %2724 = vmatpush.msra.mxu2 %v1279_v19 }
 0x3c2   : > { %v1147_v22 = vld [vmem:[%s3393_s23 + $0x1a58] sm:$0xff]  ;;  %2743 = vmatpush.msra.mxu3 %v1347_v20 }
 0x3c3   : > { %v1215_v23 = vld [vmem:[%s3393_s23 + $0x1c78] sm:$0xff]  ;;  %2685 = vmatpush.msra.mxu0 %v1147_v22 }
 0x3c4   : > { %v1275_v24 = vld [vmem:[%s3393_s23 + $0x1e58] sm:$0xff]  ;;  %2704 = vmatpush.msra.mxu1 %v1215_v23 }
 0x3c5   : > { %v1343_v25 = vld [vmem:[%s3393_s23 + $0x2078] sm:$0xff]  ;;  %2725 = vmatpush.msra.mxu2 %v1275_v24 }
 0x3c6   : > { %v1143_v27 = vld [vmem:[%s3393_s23 + $0x1a38] sm:$0xff]  ;;  %2744 = vmatpush.msra.mxu3 %v1343_v25 }
 0x3c7   : > { %v1211_v28 = vld [vmem:[%s3393_s23 + $0x1c58] sm:$0xff]  ;;  %2686 = vmatpush.msra.mxu0 %v1143_v27  ;;  %v2529_v54 = vpop.f32.mrf.mxu0 }
 0x3c8   : > { %v1271_v29 = vld [vmem:[%s3393_s23 + $0x1e38] sm:$0xff]  ;;  %2705 = vmatpush.msra.mxu1 %v1211_v28  ;;  %v2530_v56 = vadd.f32 %v2529_v54, %v2510_v55 }
 0x3c9   : > { %v1339_v30 = vld [vmem:[%s3393_s23 + $0x2058] sm:$0xff]  ;;  %2726 = vmatpush.msra.mxu2 %v1271_v29 }
 0x3ca   : > { %v1139_v32 = vld [vmem:[%s3393_s23 + $0x1a18] sm:$0xff]  ;;  %2745 = vmatpush.msra.mxu3 %v1339_v30 }
 0x3cb   : > { %v1207_v33 = vld [vmem:[%s3393_s23 + $0x1c38] sm:$0xff]  ;;  %2687 = vmatpush.msra.mxu0 %v1139_v32 }
 0x3cc   : > { %v285_v34 = vld [vmem:[#allocation2 + $0x18] sm:$0xff]  ;;  %2706 = vmatpush.msra.mxu1 %v1207_v33  ;;  %2688 = vmatmul.f32.vlgmr.msra.gmra.mxu0 %v3079_v42 }
 0x3cd   : > { %v1267_v36 = vld [vmem:[%s3393_s23 + $0x1e18] sm:$0xff]  ;;  %v2754_v41 = vadd.f32 %v2410_v38, %v285_v34  ;;  %v2549_v57 = vpop.f32.mrf.mxu1 }
 0x3ce   : > { %v1335_v37 = vld [vmem:[%s3393_s23 + $0x2038] sm:$0xff]  ;;  %2727 = vmatpush.msra.mxu2 %v1267_v36  ;;  %v2550_v59 = vadd.f32 %v2549_v57, %v2530_v56 }
 0x3cf   : > { %v1203_v39 = vld [vmem:[%s3393_s23 + $0x1c18] sm:$0xff]  ;;  %2746 = vmatpush.msra.mxu3 %v1335_v37  ;;  %2758 = vst [vmem:[#allocation2 + $0x18] sm:$0xff] %v2754_v41 }
 0x3d0   : > { %v1331_v40 = vld [vmem:[%s3393_s23 + $0x2018] sm:$0xff]  ;;  %2707 = vmatpush.msra.mxu1 %v1203_v39 }
 0x3d1   : > { %v3080_v43 = vld [vmem:[%s3417_s10 + $0x78] sm:$0xff]  ;;  %2747 = vmatpush.msra.mxu3 %v1331_v40  ;;  %2708 = vmatmul.f32.vlgmr.msra.gmra.mxu1 %v3081_v44 }
 0x3d2   : > { %2728 = vmatmul.f32.vlgmr.msra.gmra.mxu2 %v3080_v43  ;;  %2748 = vmatmul.f32.vlgmr.msra.gmra.mxu3 %v3082_v45 }
 0x3d4   : > { %v2569_v58 = vpop.f32.mrf.mxu2  ;;  %v2589_v61 = vpop.f32.mrf.mxu3 }
 0x3d5   : > { %v2570_v60 = vadd.f32 %v2569_v58, %v2550_v59 }
 0x3d7   : > { %v2590_v63 = vadd.f32 %v2589_v61, %v2570_v60 }
 0x408   : > { %v2609_v62 = vpop.f32.mrf.mxu0 }
 0x409   : > { %v2610_v0 = vadd.f32 %v2609_v62, %v2590_v63 }
 0x40e   : > { %v2629_v1 = vpop.f32.mrf.mxu1 }
 0x40f   : > { %v2630_v3 = vadd.f32 %v2629_v1, %v2610_v0 }
 0x415   : > { %v2649_v2 = vpop.f32.mrf.mxu2  ;;  %v2669_v5 = vpop.f32.mrf.mxu3 }
 0x416   : > { %v2650_v4 = vadd.f32 %v2649_v2, %v2630_v3 }
 0x418   : > { %v2670_v6 = vadd.f32 %v2669_v5, %v2650_v4 }
 0x449   : > { %v2689_v7 = vpop.f32.mrf.mxu0 }
 0x44a   : > { %v2690_v8 = vadd.f32 %v2689_v7, %v2670_v6 }
 0x44e   : > { %v2709_v9 = vpop.f32.mrf.mxu1 }
 0x44f   : > { %v2710_v10 = vadd.f32 %v2709_v9, %v2690_v8 }
 0x455   : > { %v2729_v11 = vpop.f32.mrf.mxu2  ;;  %v2749_v14 = vpop.f32.mrf.mxu3 }
 0x456   : > { %v2730_v12 = vadd.f32 %v2729_v11, %v2710_v10 }
 0x458   : > { %v2750_v15 = vadd.f32 %v2749_v14, %v2730_v12  ;;  %2763 = sbr.rel (%p2922_p9) target bundleno = 1129 (0x469), region = 48 }
 0x45a   : > { %v2755_v16 = vadd.f32 %v2750_v15, %v286_v13 }
 0x45c   : > { %2759 = vst [vmem:[#allocation2 + $0x8] sm:$0xff] %v2755_v16 }
 0x45d   : > { %v2764_v17 = vld [vmem:[#allocation2 + $0x10] sm:$0xff]  ;;  %v2768_v18 = vld [vmem:[%s226_s28] sm:$0xf]  ;;  %v2766_v22 = vld [vmem:[#allocation2 + $0x18] sm:$0xff] }
 0x45e   : > { %v2765_v19 = vld [vmem:[#allocation2] sm:$0xff]  ;;  %v2770_v20 = vperm.slane %v2768_v18, 0  ;;  %v2771_v21 = vperm.slane %v2768_v18, 1  ;;  %v2772_v23 = vperm.slane %v2768_v18, 2  ;;  %v2773_v25 = vperm.slane %v2768_v18, 3 }
 0x460   : > { %v2778_v26 = vadd.f32 %v2770_v20, %v2764_v17  ;;  %v2779_v27 = vadd.f32 %v2771_v21, %v2765_v19  ;;  %v2780_v28 = vadd.f32 %v2772_v23, %v2766_v22 }
 0x462   : > { %v2782_v30 = vmax.f32 %v2778_v26, 0.0  ;;  %v2783_v31 = vmax.f32 %v2779_v27, 0.0  ;;  %v2784_v32 = vmax.f32 %v2780_v28, 0.0 }
 0x463   : > { %v2767_v24 = vld [vmem:[#allocation2 + $0x8] sm:$0xff] }
 0x464   : > { %v2781_v29 = vadd.f32 %v2773_v25, %v2767_v24  ;;  %2786 = vst [vmem:[%s3412_s26] sm:$0xff] %v2782_v30 }
 0x465   : > { %2787 = vst [vmem:[%s3412_s26 + $0x8] sm:$0xff] %v2783_v31 }
 0x466   : > { %v2785_v33 = vmax.f32 %v2781_v29, 0.0  ;;  %2788 = vst [vmem:[%s3412_s26 + $0x10] sm:$0xff] %v2784_v32 }
 0x468   : > { %2789 = vst [vmem:[%s3412_s26 + $0x18] sm:$0xff] %v2785_v33 }
 0x469 PF: > { %s19_s22 = sadd.s32 1, %s3237_s22   ;;  %s4630_s23 = sld [smem:[#allocation9_spill]] }
 0x46a   : > { %p16_p10 = scmp.ge.s32.totalorder %s19_s22, 10   ;;  %s4631_s7 = sld [smem:[#allocation10_spill]] }
 0x46b   : > { %s4632_s12 = smov %s3201_s13  ;;  %s4633_s13 = smov %s3205_s14 }
 0x46c   : > { %s4634_s14 = smov %s3369_s8  ;;  %s4635_s15 = smov %s3213_s16 }
 0x46d   : > { %s4636_s16 = smov %s3217_s17  ;;  %s4637_s17 = smov %s3374_s9 }
 0x46e   : > { %s4638_s18 = smov %s3229_s20  ;;  %s4639_s19 = smov %s3233_s21 }
 0x46f   : > { %s4640_s20 = smov %s4630_s23  ;;  %18 = sbr.rel (!%p16_p10) target bundleno = 11 (0xb), region = 96 }
 0x470   : > { %s4641_s21 = smov %s4631_s7 }
 0x474   :  { %2812 = vsyncpa [#allocation4], 1 }
 0x475   :  { %2814 = vsyncpa [#allocation4 + $0x1], 1 }
 0x476   :  { %2815 = vsyncpa [#allocation6], 1 }
 0x477   :  { %2817 = vsyncpa [#allocation6 + $0x1], 1 }

</bundles_post_ra>
